<compile_context>
chip_gen: v6e
topology: v6e:2x2x1
jax: 0.10.0
libtpu: 0.0.40
codegen_flags: <defaults>
</compile_context>

<pallas_src>
import jax
import jax.numpy as jnp
from jax import lax
from jax.experimental import pallas as pl
from jax.experimental.pallas import tpu as pltpu


def _down_kernel(x_ref, w_ref, b_ref, o_ref, pad_ref):
    """Per-batch-item fused MaxPool2d(2) + Conv2d(3x3, pad=1) + ReLU.

    x_ref   : (1, Cin, H, W)      NCHW input tile
    w_ref   : (Cout, 9*Cin)       conv weights, row index = (kh*3 + kw)*Cin + cin
    b_ref   : (Cout, 1)           conv bias
    o_ref   : (1, Cout, H2*W2)    NCHW-contiguous output slab (H2=H//2, W2=W//2)
    pad_ref : (Cin, H2+2, W2+2)   f32 VMEM scratch: zero-padded pooled map
    """
    _, Cin, H, W = x_ref.shape
    H2, W2 = H // 2, W // 2
    Sp = H2 * W2
    Cout = o_ref.shape[1]

    x = x_ref[0].astype(jnp.float32)                          # (Cin, H, W)

    # ---- MaxPool2d(kernel_size=2, stride=2) ----
    v = jnp.max(x.reshape(Cin, H2, 2, W), axis=2)             # pool rows -> (Cin, H2, W)
    pooled = jnp.max(v.reshape(Cin, H2, W2, 2), axis=3)       # pool cols -> (Cin, H2, W2)

    # ---- zero-padded halo for the 3x3 conv (padding=1), built in VMEM ----
    pad_ref[...] = jnp.zeros_like(pad_ref)
    pad_ref[:, 1:H2 + 1, 1:W2 + 1] = pooled

    # ---- Conv2d 3x3 as one im2col matmul on the MXU ----
    # patches[(kh*3 + kw)*Cin + c, i*W2 + j] = padded[c, i + kh, j + kw]
    cols = []
    for kh in range(3):
        for kw in range(3):
            cols.append(pad_ref[:, kh:kh + H2, kw:kw + W2].reshape(Cin, Sp))
    patches = jnp.concatenate(cols, axis=0)                   # (9*Cin, Sp)

    y = jnp.dot(w_ref[...].astype(jnp.float32), patches,
                preferred_element_type=jnp.float32)           # (Cout, Sp)
    y = jnp.maximum(y + b_ref[...].astype(jnp.float32), 0.0)  # bias + ReLU

    o_ref[...] = y.reshape(1, Cout, Sp).astype(o_ref.dtype)


def down(x_nchw, conv_weight, conv_bias):
    """Matches PyTorch:
        nn.Sequential(nn.MaxPool2d(2),
                      nn.Conv2d(Cin, Cout, 3, padding=1),
                      nn.ReLU(inplace=True))
    x_nchw     : (N, Cin, H, W)    (H, W even)
    conv_weight: (Cout, Cin, 3, 3)
    conv_bias  : (Cout,)
    returns    : (N, Cout, H//2, W//2)
    """
    N, Cin, H, W = x_nchw.shape
    assert H % 2 == 0 and W % 2 == 0, "MaxPool2d(2) path assumes even H, W"
    Cout = conv_weight.shape[0]
    H2, W2 = H // 2, W // 2

    # (Cout, Cin, 3, 3) -> (Cout, 3, 3, Cin) -> (Cout, 9*Cin); tiny, one-time prep.
    w2d = jnp.transpose(conv_weight, (0, 2, 3, 1)).reshape(Cout, 9 * Cin)
    b2d = conv_bias.reshape(Cout, 1)

    out_flat = pl.pallas_call(
        _down_kernel,
        out_shape=jax.ShapeDtypeStruct((N, Cout, H2 * W2), x_nchw.dtype),
        grid_spec=pltpu.PrefetchScalarGridSpec(
            num_scalar_prefetch=0,
            grid=(N,),
            in_specs=[
                pl.BlockSpec((1, Cin, H, W), lambda n: (n, 0, 0, 0)),
                pl.BlockSpec((Cout, 9 * Cin), lambda n: (0, 0)),
                pl.BlockSpec((Cout, 1), lambda n: (0, 0)),
            ],
            out_specs=pl.BlockSpec((1, Cout, H2 * W2), lambda n: (n, 0, 0)),
            scratch_shapes=[pltpu.VMEM((Cin, H2 + 2, W2 + 2), jnp.float32)],
        ),
        compiler_params=pltpu.CompilerParams(
            dimension_semantics=("parallel",)),
    )(x_nchw, w2d, b2d)

    # Row-major-compatible (free) reshape back to NCHW.
    return out_flat.reshape(N, Cout, H2, W2)


def _reference(x_nchw, conv_weight, conv_bias):
    """Pure-JAX reference (reduce_window + conv) for verification."""
    p = lax.reduce_window(x_nchw, -jnp.inf, lax.max,
                          window_dimensions=(1, 1, 2, 2),
                          window_strides=(1, 1, 2, 2),
                          padding="VALID")
    y = lax.conv_general_dilated(
        p, conv_weight, window_strides=(1, 1), padding=((1, 1), (1, 1)),
        dimension_numbers=("NCHW", "OIHW", "NCHW"))
    y = y + conv_bias.reshape(1, -1, 1, 1)
    return jnp.maximum(y, 0.0)


if __name__ == "__main__":
    # Small shapes consistent with the module's forward: Down(4, 8) on a
    # (2, 4, 16, 16) input -> (2, 8, 8, 8) output.
    N, Cin, Cout, H, W = 2, 4, 8, 16, 16

    key = jax.random.PRNGKey(0)
    kx, kw, kb = jax.random.split(key, 3)
    x = jax.random.normal(kx, (N, Cin, H, W), dtype=jnp.float32)
    conv_weight = jax.random.normal(kw, (Cout, Cin, 3, 3), dtype=jnp.float32) * 0.1
    conv_bias = jax.random.normal(kb, (Cout,), dtype=jnp.float32) * 0.1

    out = down(x, conv_weight, conv_bias)
    out = jax.block_until_ready(out)

    ref = _reference(x, conv_weight, conv_bias)
    assert out.shape == (N, Cout, H // 2, W // 2)
    assert jnp.allclose(out, ref, atol=1e-4, rtol=1e-4), "mismatch vs reference"

    print("KERNEL_OK")
</pallas_src>

<mosaic_0001>
module attributes {stable_mosaic.version = 11 : i64} {
  func.func @_down_kernel(%arg0: i32, %arg1: memref<1x4x16x16xf32, #tpu.memory_space<vmem>>, %arg2: memref<8x36xf32, #tpu.memory_space<vmem>>, %arg3: memref<8x1xf32, #tpu.memory_space<vmem>>, %arg4: memref<1x8x64xf32, #tpu.memory_space<vmem>>, %arg5: memref<4x10x10xf32, #tpu.memory_space<vmem>>) attributes {dimension_semantics = [#tpu.dimension_semantics<parallel>], iteration_bounds = array<i64: 2>, scalar_prefetch = 0 : i64, scratch_operands = 1 : i64, tpu.core_type = #tpu.core_type<tc>, window_params = [{transform_indices = @transform_0, window_bounds = array<i64: 1, 4, 16, 16>}, {pipeline_mode = #tpu.pipeline_mode<synchronous>, transform_indices = @transform_1, window_bounds = array<i64: 8, 36>}, {pipeline_mode = #tpu.pipeline_mode<synchronous>, transform_indices = @transform_2, window_bounds = array<i64: 8, 1>}, {transform_indices = @transform_3, window_bounds = array<i64: 1, 8, 64>}]} {
    %c0 = arith.constant 0 : index
    %c0_0 = arith.constant 0 : index
    %c0_1 = arith.constant 0 : index
    %c0_2 = arith.constant 0 : index
    %0 = vector.load %arg1[%c0, %c0_0, %c0_1, %c0_2] : memref<1x4x16x16xf32, #tpu.memory_space<vmem>>, vector<1x4x16x16xf32>
    %1 = vector.shape_cast %0 : vector<1x4x16x16xf32> to vector<4x16x16xf32>
    %2 = vector.shape_cast %1 : vector<4x16x16xf32> to vector<4x8x2x16xf32>
    %cst = arith.constant dense<0xFF800000> : vector<4x8x16xf32>
    %3 = vector.multi_reduction <maximumf>, %2, %cst [2] : vector<4x8x2x16xf32> to vector<4x8x16xf32>
    %4 = vector.shape_cast %3 : vector<4x8x16xf32> to vector<4x8x8x2xf32>
    %cst_3 = arith.constant dense<0xFF800000> : vector<4x8x8xf32>
    %5 = vector.multi_reduction <maximumf>, %4, %cst_3 [3] : vector<4x8x8x2xf32> to vector<4x8x8xf32>
    %cst_4 = arith.constant 0.000000e+00 : f32
    %6 = vector.broadcast %cst_4 : f32 to vector<4x10x10xf32>
    %c0_5 = arith.constant 0 : index
    %c0_6 = arith.constant 0 : index
    %c0_7 = arith.constant 0 : index
    %7 = vector.load %arg5[%c0_5, %c0_6, %c0_7] : memref<4x10x10xf32, #tpu.memory_space<vmem>>, vector<4x10x10xf32>
    tpu.vector_store %arg5[%c0_5, %c0_6, %c0_7], %6 {strides = array<i32>} : memref<4x10x10xf32, #tpu.memory_space<vmem>>, vector<4x10x10xf32>,
    %c0_8 = arith.constant 0 : index
    %c1 = arith.constant 1 : index
    %c1_9 = arith.constant 1 : index
    %8 = vector.load %arg5[%c0_8, %c1, %c1_9] : memref<4x10x10xf32, #tpu.memory_space<vmem>>, vector<4x8x8xf32>
    tpu.vector_store %arg5[%c0_8, %c1, %c1_9], %5 {strides = array<i32>} : memref<4x10x10xf32, #tpu.memory_space<vmem>>, vector<4x8x8xf32>,
    %c0_10 = arith.constant 0 : index
    %c0_11 = arith.constant 0 : index
    %c0_12 = arith.constant 0 : index
    %9 = vector.load %arg5[%c0_10, %c0_11, %c0_12] : memref<4x10x10xf32, #tpu.memory_space<vmem>>, vector<4x8x8xf32>
    %10 = vector.shape_cast %9 : vector<4x8x8xf32> to vector<4x64xf32>
    %c0_13 = arith.constant 0 : index
    %c0_14 = arith.constant 0 : index
    %c1_15 = arith.constant 1 : index
    %11 = vector.load %arg5[%c0_13, %c0_14, %c1_15] : memref<4x10x10xf32, #tpu.memory_space<vmem>>, vector<4x8x8xf32>
    %12 = vector.shape_cast %11 : vector<4x8x8xf32> to vector<4x64xf32>
    %c0_16 = arith.constant 0 : index
    %c0_17 = arith.constant 0 : index
    %c2 = arith.constant 2 : index
    %13 = vector.load %arg5[%c0_16, %c0_17, %c2] : memref<4x10x10xf32, #tpu.memory_space<vmem>>, vector<4x8x8xf32>
    %14 = vector.shape_cast %13 : vector<4x8x8xf32> to vector<4x64xf32>
    %c0_18 = arith.constant 0 : index
    %c1_19 = arith.constant 1 : index
    %c0_20 = arith.constant 0 : index
    %15 = vector.load %arg5[%c0_18, %c1_19, %c0_20] : memref<4x10x10xf32, #tpu.memory_space<vmem>>, vector<4x8x8xf32>
    %16 = vector.shape_cast %15 : vector<4x8x8xf32> to vector<4x64xf32>
    %c0_21 = arith.constant 0 : index
    %c1_22 = arith.constant 1 : index
    %c1_23 = arith.constant 1 : index
    %17 = vector.load %arg5[%c0_21, %c1_22, %c1_23] : memref<4x10x10xf32, #tpu.memory_space<vmem>>, vector<4x8x8xf32>
    %18 = vector.shape_cast %17 : vector<4x8x8xf32> to vector<4x64xf32>
    %c0_24 = arith.constant 0 : index
    %c1_25 = arith.constant 1 : index
    %c2_26 = arith.constant 2 : index
    %19 = vector.load %arg5[%c0_24, %c1_25, %c2_26] : memref<4x10x10xf32, #tpu.memory_space<vmem>>, vector<4x8x8xf32>
    %20 = vector.shape_cast %19 : vector<4x8x8xf32> to vector<4x64xf32>
    %c0_27 = arith.constant 0 : index
    %c2_28 = arith.constant 2 : index
    %c0_29 = arith.constant 0 : index
    %21 = vector.load %arg5[%c0_27, %c2_28, %c0_29] : memref<4x10x10xf32, #tpu.memory_space<vmem>>, vector<4x8x8xf32>
    %22 = vector.shape_cast %21 : vector<4x8x8xf32> to vector<4x64xf32>
    %c0_30 = arith.constant 0 : index
    %c2_31 = arith.constant 2 : index
    %c1_32 = arith.constant 1 : index
    %23 = vector.load %arg5[%c0_30, %c2_31, %c1_32] : memref<4x10x10xf32, #tpu.memory_space<vmem>>, vector<4x8x8xf32>
    %24 = vector.shape_cast %23 : vector<4x8x8xf32> to vector<4x64xf32>
    %c0_33 = arith.constant 0 : index
    %c2_34 = arith.constant 2 : index
    %c2_35 = arith.constant 2 : index
    %25 = vector.load %arg5[%c0_33, %c2_34, %c2_35] : memref<4x10x10xf32, #tpu.memory_space<vmem>>, vector<4x8x8xf32>
    %26 = vector.shape_cast %25 : vector<4x8x8xf32> to vector<4x64xf32>
    %27 = tpu.concatenate %10, %12, %14, %16, %18, %20, %22, %24, %26 in 0 : vector<4x64xf32>, vector<4x64xf32>, vector<4x64xf32>, vector<4x64xf32>, vector<4x64xf32>, vector<4x64xf32>, vector<4x64xf32>, vector<4x64xf32>, vector<4x64xf32> -> vector<36x64xf32>
    %c0_36 = arith.constant 0 : index
    %c0_37 = arith.constant 0 : index
    %28 = vector.load %arg2[%c0_36, %c0_37] : memref<8x36xf32, #tpu.memory_space<vmem>>, vector<8x36xf32>
    %cst_38 = arith.constant dense<0.000000e+00> : vector<8x64xf32>
    %29 = tpu.matmul %28, %27, %cst_38 {dimension_numbers = #tpu.dot_dimension_numbers<[1], [0], [0], [1], [0, 0, 1, 1], [], []>} : vector<8x36xf32>, vector<36x64xf32>, vector<8x64xf32> -> vector<8x64xf32>
    %c0_39 = arith.constant 0 : index
    %c0_40 = arith.constant 0 : index
    %30 = vector.load %arg3[%c0_39, %c0_40] : memref<8x1xf32, #tpu.memory_space<vmem>>, vector<8x1xf32>
    %31 = vector.broadcast %30 : vector<8x1xf32> to vector<8x64xf32>
    %32 = arith.addf %29, %31 : vector<8x64xf32>
    %cst_41 = arith.constant 0.000000e+00 : f32
    %33 = vector.broadcast %cst_41 : f32 to vector<8x64xf32>
    %34 = arith.maximumf %32, %33 : vector<8x64xf32>
    %35 = vector.shape_cast %34 : vector<8x64xf32> to vector<1x8x64xf32>
    %c0_42 = arith.constant 0 : index
    %c0_43 = arith.constant 0 : index
    %c0_44 = arith.constant 0 : index
    %36 = vector.load %arg4[%c0_42, %c0_43, %c0_44] : memref<1x8x64xf32, #tpu.memory_space<vmem>>, vector<1x8x64xf32>
    tpu.vector_store %arg4[%c0_42, %c0_43, %c0_44], %35 {strides = array<i32>} : memref<1x8x64xf32, #tpu.memory_space<vmem>>, vector<1x8x64xf32>,
    return
  }
  func.func @transform_0(%arg0: i32) -> (i32, i32, i32, i32) {
    %c0_i32 = arith.constant 0 : i32
    %c0_i32_0 = arith.constant 0 : i32
    %c0_i32_1 = arith.constant 0 : i32
    %c0_i32_2 = arith.constant 0 : i32
    return %arg0, %c0_i32, %c0_i32_0, %c0_i32_1 : i32, i32, i32, i32
  }
  func.func @transform_1(%arg0: i32) -> (i32, i32) {
    %c0_i32 = arith.constant 0 : i32
    %c0_i32_0 = arith.constant 0 : i32
    %c0_i32_1 = arith.constant 0 : i32
    return %c0_i32, %c0_i32_0 : i32, i32
  }
  func.func @transform_2(%arg0: i32) -> (i32, i32) {
    %c0_i32 = arith.constant 0 : i32
    %c0_i32_0 = arith.constant 0 : i32
    %c0_i32_1 = arith.constant 0 : i32
    return %c0_i32, %c0_i32_0 : i32, i32
  }
  func.func @transform_3(%arg0: i32) -> (i32, i32, i32) {
    %c0_i32 = arith.constant 0 : i32
    %c0_i32_0 = arith.constant 0 : i32
    %c0_i32_1 = arith.constant 0 : i32
    return %arg0, %c0_i32, %c0_i32_0 : i32, i32, i32
  }
}

</mosaic_0001>

<bundles_post_ra>
// kernel: tpu_custom_call.1
= control target key start
LH: loop header
LB: loop body
LE: loop exit
PB: predicated region body
PF: predicated region fallthrough
CT: control target
= control target key end

     0   :  { %8 = vsyncpa [#allocation4], 0  ;;  %s6571_s0 = inlined_call_operand.hbm [shape: f32[2,4,16,16], index: 0, kind: input, shape index: {}]   ;;  %s6572_s1 = inlined_call_operand.vmem [shape: f32[8,36], index: 1, kind: input, shape index: {}]   ;;  %s6573_s2 = inlined_call_operand.vmem [shape: f32[8,1], index: 2, kind: input, shape index: {}]   ;;  %s6574_s3 = inlined_call_operand.hbm [shape: f32[2,8,64], index: 3, kind: output, shape index: {}]  }
   0x1   :  { %10 = vsyncpa [#allocation4 + $0x1], 0 }
   0x2   :  { %11 = vsyncpa [#allocation5], 0 }
   0x3   :  { %13 = vsyncpa [#allocation5 + $0x1], 0  ;;  %s3885_s12 = smov 0   ;;  %s3887_s13 = smov 0  }
   0x4   :  { %s3889_s14 = smov 0   ;;  %s3891_s15 = smov 0  }
   0x5 LB: > { %s3906_s16 = sadd.s32 4294967295, %s3839_s15   ;;  %s3634_s17 = sadd.s32 4294967294, %s3839_s15   ;;  %s3839_s15 = sphi %s3891_s15, %s7021_s15   ;;  %s3835_s14 = sphi %s3889_s14, %s7020_s14   ;;  %s3831_s13 = sphi %s3887_s13, %s7019_s13   ;;  %s3827_s12 = sphi %s3885_s12, %s7018_s12  }
   0x6   : > { %s3910_s18 = sadd.s32 1, %s3839_s15   ;;  %s26_s19 = sadd.s32 1, %s3835_s14 }
   0x7   : > { %s23_s20 = ssub.s32 %s3839_s15, %s3910_s18  ;;  %p33_p0 = scmp.ne.s32.totalorder %s3835_s14, %s3831_s13 }
   0x8   : > { %p24_p1 = scmp.eq.s32.totalorder %s23_s20, 0  ;;  %p34_p2 = scmp.eq.s32.totalorder %s3839_s15, 0 }
   0x9   : > { %p39_p3 = scmp.ne.s32.totalorder %s3831_s13, %s3827_s12  ;;  %p40_p4 = scmp.eq.s32.totalorder %s3906_s16, 0 }
   0xa   : > { %s3922_s21 = scalar_select %p24_p1, %s3835_s14, %s26_s19  }
   0xb   : > { %p3924_p5 = por %p34_p2, %p33_p0  ;;  %p3928_p6 = por %p40_p4, %p39_p3 }
   0xc   : > { %p105_p7 = scmp.eq.s32.totalorder %s3906_s16, 1  ;;  %p111_p8 = scmp.eq.s32.totalorder %s3634_s17, 1 }
   0xd   : > { %s6621_s23 = scalar_select %p3928_p6, 1, 0 }
   0xe   : > { %p3681_p10 = scmp.lt.s32.totalorder %s3839_s15, 2  ;;  %p3935_p11 = por %p105_p7, %p33_p0 }
   0xf   : > { %p3939_p12 = por %p111_p8, %p39_p3  ;;  %s137_s26 = sand.u32 1, %s3835_s14  }
  0x10   : > { %s6622_s24 = scalar_select %p3935_p11, 1, 0 }
  0x11   : > { %s6623_s25 = scalar_select %p3939_p12, 1, 0 }
  0x12   : > { %s3649_s27 = sshll.u32 %s3839_s15, 10  ;;  %s3637_s28 = sshll.u32 %s137_s26, 6 }
  0x13   : > { %s3948_s4 = scalar_lea.hbm %s6571_s0, %s3649_s27  ;;  %s141_s5 = scalar_lea.vmem [#allocation3], %s3637_s28 }
  0x14   : > { %s148_s6 = sshll.u32 %s141_s5, 4  ;;  %p3952_p13 = pnand %p3681_p10, %p3924_p5  ;;  %s3956_s6 = int_to_ptr.vmem [resolvable:$true] %s148_s6 }
  0x15   : > { %s3958_s8 = scalar_lea.sflag [#allocation4], %s137_s26  ;;  %s3747_s9 = scalar_lea.hbm %s3948_s4, 1024 }
  0x16   : > { %p3748_p0 = scmp.ne.s32.totalorder %s3948_s4, %s3747_s9  ;;  %p3749_p1 = pneg %p3952_p13 }
  0x17   : > { %s3752_s17 = scalar_lea.hbm %s6571_s0, 2048  ;;  %p3753_p4 = scmp.lt.s32.totalorder %s3948_s4, %s6571_s0 }
  0x18   : > { %p3750_p2 = pnand %p3749_p1, %p3748_p0  ;;  %p3754_p5 = scmp.lt.s32.totalorder %s3752_s17, %s3747_s9 }
  0x1a   : > { %p3751_p3 = pneg %p3750_p2  ;;  %p3755_p7 = por %p3754_p5, %p3753_p4 }
  0x1c   : > { %p3756_p8 = pnand %p3755_p7, %p3751_p3 }
  0x1e   : > { %3759 = shalt.err (!%p3756_p8)
}
  0x1f   : > { %s3760_s22 = scalar_lea.vmem %s3956_s6, 1024  ;;  %s3841_s26 = smov [#allocation3]  }
  0x20   : > { %p3761_p10 = scmp.ne.s32.totalorder %s3956_s6, %s3760_s22  ;;  %s3765_s27 = sshll.u32 %s3841_s26, 4  ;;  %s3766_s27 = int_to_ptr.vmem [resolvable:$false] %s3765_s27 }
  0x21   : > { %s3767_s28 = scalar_lea.vmem %s3766_s27, 2048  ;;  %p3768_p2 = scmp.lt.s32.totalorder %s3956_s6, %s3766_s27 }
  0x22   : > { %p3763_p9 = pnand %p3761_p10, %p3749_p1  ;;  %p3769_p12 = scmp.lt.s32.totalorder %s3767_s28, %s3760_s22 }
  0x24   : > { %p3764_p0 = pneg %p3763_p9  ;;  %p3770_p11 = por %p3769_p12, %p3768_p2 }
  0x26   : > { %p3771_p6 = pnand %p3770_p11, %p3764_p0 }
  0x28   : > { %3774 = shalt.err (!%p3771_p6)
}
  0x29   : > { %s3842_s29 = smov 128   ;;  %s3843_s30 = smov 8  }
  0x2a   : > { %3676 = dma.hbm_to_vmem [thread:$0]  (!%p3952_p13), %s3948_s4, 1024, %s3956_s6, %s3958_s8, %s3842_s29, %s3842_s29, %s3843_s30  }
  0x2b   : > { %p3640_p9 = scmp.ge.s32.totalorder %s3839_s15, 1  ;;  %p156_p1 = scmp.lt.s32.totalorder %s3839_s15, 3 }
  0x2d   : > { %p157_p3 = pnand %p3640_p9, %p156_p1 }
  0x2f   : > { %160 = sbr.rel (%p157_p3) target bundleno = 1446 (0x5a6), region = 32 }
  0x34   : > { %s3982_s5 = sand.u32 1, %s3831_s13   ;;  %p6625_p6 = scmp.ne.s32.totalorder %s6621_s23, 0 }
  0x35   : > { %s3641_s9 = sshll.u32 %s3982_s5, 6  ;;  %s163_s10 = scalar_lea.sflag [#allocation4], %s3982_s5 }
  0x36   : > { %s3986_s11 = scalar_lea.vmem [#allocation3], %s3641_s9 }
  0x37   : > { %3818 = dma.done.wait (%p6625_p6), %s163_s10, 1024  }
  0x38   : > { %3820 = vsyncadd (%p6625_p6), %s163_s10, 4294966272  ;;  %v6577_v0 = vlaneseq  ;;  %v3844_v1 = vmov 1983009808   ;;  %v189_v6 = vld [vmem:[%s3986_s11] sm:$0xff]  ;;  %vm373_vm0 = vcmask 123904   ;;  %v4000_v7 = vld [vmem:[%s3986_s11 + $0x8] sm:$0xff] }
  0x39   : > { %v207_v2 = vunpack.c.l.s4 %v3844_v1  ;;  %v4003_v8 = vld [vmem:[%s3986_s11 + $0x10] sm:$0xff]  ;;  %v205_v10 = vcombine.high %v189_v6, %v189_v6  ;;  %v4013_v13 = vld [vmem:[%s3986_s11 + $0x18] sm:$0xff]  ;;  %v222_v15 = vcombine.high %v4000_v7, %v4000_v7  ;;  %s3845_s23 = smov 126   ;;  %s3846_s4 = smov 124   ;;  %vm1079_vm1 = vcmask 1041409  }
  0x3a   : > { %v3993_v3 = vshrl.u32 %v6577_v0, 7  ;;  %v239_v16 = vcombine.high %v4003_v8, %v4003_v8  ;;  %v256_v17 = vcombine.high %v4013_v13, %v4013_v13  ;;  %s3847_s6 = smov 122   ;;  %s3848_s7 = smov 120   ;;  %vm1082_vm2 = vcmask 1042434  }
  0x3b   : > { %v208_v4 = vunpack.c.0.s8 %v207_v2  ;;  %s3849_s8 = smov 118   ;;  %s3850_s17 = smov 116   ;;  %vm1085_vm3 = vcmask 1043459   ;;  %vm1088_vm4 = vcmask 1044484   ;;  %vm1091_vm5 = vcmask 1045509  }
  0x3c   : > { %6626 = vst [vmem:[#allocation9_spill] sm:$0xff] %v3993_v3  ;;  %s3851_s19 = smov 114   ;;  %vm1094_vm6 = vcmask 1046534   ;;  %vm1097_vm7 = vcmask 1047559   ;;  %vm2109_vm8 = vcmask 15360   ;;  %vm2206_vm9 = vcmask 80896  }
  0x3d   : > { %v3996_v5 = vsub.s32 %v208_v4, %v3993_v3  ;;  %vm2208_vm10 = vcmask 74752   ;;  %vm2411_vm11 = vcmask 72712   ;;  %s3854_s20 = smov 127   ;;  %s3855_s22 = smov 16   ;;  %vm2516_vm12 = vcmask 64512  }
  0x3e   : > { %s3856_s26 = smov 8   ;;  %s3857_s27 = smov 24   ;;  %vm2518_vm13 = vcmask 130048   ;;  %vm3862_vm14 = vmmov 0   ;;  %vm2520_vm15 = vcmask 195584  }
  0x3f   : > { %6627 = vst [vmem:[#allocation10_spill] sm:$0xff] %v3996_v5  ;;  %v4006_v9 = vrot.slane %v189_v6, %v3996_v5  ;;  %v229_v11 = vrot.slane %v4000_v7, %v3996_v5  ;;  %v246_v12 = vrot.slane %v4003_v8, %v3996_v5  ;;  %v263_v14 = vrot.slane %v4013_v13, %v3996_v5  ;;  %s3858_s28 = smov 32   ;;  %s3859_s29 = smov 40  }
  0x40   : > { %v4026_v19 = vrot.slane %v205_v10, %v3996_v5  ;;  %s3860_s30 = smov 48   ;;  %s3861_s9 = smov 56  }
  0x41   : > { %v374_v18 = vsel %vm373_vm0, %v4006_v9, -inf  ;;  %v402_v20 = vsel %vm373_vm0, %v229_v11, -inf  ;;  %v237_v21 = vcombine.high %v229_v11, %v229_v11  ;;  %v430_v24 = vsel %vm373_vm0, %v246_v12, -inf  ;;  %p7015_p12 = scmp.ne.s32.totalorder %s6622_s24, 0 }
  0x42   : > { %v375_v22 = vrot.slane %v374_v18, 4  ;;  %v403_v23 = vrot.slane %v402_v20, 4  ;;  %v254_v25 = vcombine.high %v246_v12, %v246_v12  ;;  %v388_v26 = vsel %vm373_vm0, %v4026_v19, -inf }
  0x43   : > { %v409_v27 = vsel %vm373_vm0, %v237_v21, -inf  ;;  %v431_v28 = vrot.slane %v430_v24, 4  ;;  %v458_v29 = vsel %vm373_vm0, %v263_v14, -inf  ;;  %v389_v31 = vrot.slane %v388_v26, 4 }
  0x44   : > { %v376_v30 = vmax.f32 %v374_v18, %v375_v22  ;;  %v404_v32 = vmax.f32 %v402_v20, %v403_v23  ;;  %v410_v33 = vrot.slane %v409_v27, 4  ;;  %v437_v35 = vsel %vm373_vm0, %v254_v25, -inf }
  0x45   : > { %v432_v34 = vmax.f32 %v430_v24, %v431_v28  ;;  %v459_v36 = vrot.slane %v458_v29, 4  ;;  %v271_v37 = vcombine.high %v263_v14, %v263_v14  ;;  %v390_v39 = vmax.f32 %v388_v26, %v389_v31 }
  0x46   : > { %v377_v38 = vrot.slane %v376_v30, 2  ;;  %v405_v40 = vrot.slane %v404_v32, 2  ;;  %v411_v41 = vmax.f32 %v409_v27, %v410_v33  ;;  %v438_v43 = vrot.slane %v437_v35, 4 }
  0x47   : > { %v433_v42 = vrot.slane %v432_v34, 2  ;;  %v460_v44 = vmax.f32 %v458_v29, %v459_v36  ;;  %v465_v45 = vsel %vm373_vm0, %v271_v37, -inf  ;;  %v391_v47 = vrot.slane %v390_v39, 2 }
  0x48   : > { %v378_v46 = vmax.f32 %v376_v30, %v377_v38  ;;  %v406_v48 = vmax.f32 %v404_v32, %v405_v40  ;;  %v412_v49 = vrot.slane %v411_v41, 2  ;;  %v439_v51 = vmax.f32 %v437_v35, %v438_v43 }
  0x49   : > { %v434_v50 = vmax.f32 %v432_v34, %v433_v42  ;;  %v461_v52 = vrot.slane %v460_v44, 2  ;;  %v466_v53 = vrot.slane %v465_v45, 4  ;;  %v392_v55 = vmax.f32 %v390_v39, %v391_v47 }
  0x4a   : > { %v379_v54 = vrot.slane %v378_v46, 1  ;;  %v407_v56 = vrot.slane %v406_v48, 1  ;;  %v413_v57 = vmax.f32 %v411_v41, %v412_v49  ;;  %v440_v59 = vrot.slane %v439_v51, 2 }
  0x4b   : > { %v435_v58 = vrot.slane %v434_v50, 1  ;;  %v462_v60 = vmax.f32 %v460_v44, %v461_v52  ;;  %v467_v61 = vmax.f32 %v465_v45, %v466_v53  ;;  %v393_v63 = vrot.slane %v392_v55, 1 }
  0x4c   : > { %v4036_v62 = vmax.f32 %v378_v46, %v379_v54  ;;  %v4038_v1 = vmax.f32 %v406_v48, %v407_v56  ;;  %v414_v2 = vrot.slane %v413_v57, 1  ;;  %v441_v6 = vmax.f32 %v439_v51, %v440_v59 }
  0x4d   : > { %v4040_v4 = vmax.f32 %v434_v50, %v435_v58  ;;  %v463_v10 = vrot.slane %v462_v60, 1  ;;  %v468_v11 = vrot.slane %v467_v61, 2  ;;  %v4044_v12 = vmax.f32 %v392_v55, %v393_v63 }
  0x4e   : > { %630 = vrot.lane.b32.xlu0 %v4036_v62, %s3845_s23  ;;  %v4046_v14 = vmax.f32 %v413_v57, %v414_v2  ;;  %v220_v18 = vcombine.high %v4006_v9, %v4006_v9  ;;  %v221_v20 = vcombine.high %v4026_v19, %v4026_v19  ;;  %v442_v21 = vrot.slane %v441_v6, 1 }
  0x4f   : > { %v4052_v22 = vmax.f32 %v462_v60, %v463_v10  ;;  %v469_v23 = vmax.f32 %v467_v61, %v468_v11  ;;  %v236_v24 = vrot.slane %v222_v15, %v3996_v5  ;;  %634 = vrot.lane.b32.xlu1 %v4044_v12, %s3845_s23  ;;  %v253_v9 = vrot.slane %v239_v16, %v3996_v5  ;;  %v193_v61 = vld [vmem:[%s3986_s11 + $0x20] sm:$0xff] }
  0x50   : > { %v381_v25 = vsel %vm373_vm0, %v220_v18, -inf  ;;  %v395_v26 = vsel %vm373_vm0, %v221_v20, -inf  ;;  %v270_v19 = vrot.slane %v256_v17, %v3996_v5  ;;  %v4070_v27 = vmax.f32 %v441_v6, %v442_v21 }
  0x51   : > { %v470_v7 = vrot.slane %v469_v23, 1  ;;  %v382_v15 = vrot.slane %v381_v25, 4  ;;  %v396_v28 = vrot.slane %v395_v26, 4  ;;  %v416_v29 = vsel %vm373_vm0, %v236_v24, -inf }
  0x52   : > { %638 = vrot.lane.b32.xlu0 %v4038_v1, %s3845_s23  ;;  %v238_v30 = vcombine.high %v236_v24, %v236_v24  ;;  %v444_v31 = vsel %vm373_vm0, %v253_v9, -inf  ;;  %v255_v8 = vcombine.high %v253_v9, %v253_v9  ;;  %v417_v13 = vrot.slane %v416_v29, 4 }
  0x53   : > { %v4076_v16 = vmax.f32 %v469_v23, %v470_v7  ;;  %v383_v32 = vmax.f32 %v381_v25, %v382_v15  ;;  %v397_v33 = vmax.f32 %v395_v26, %v396_v28  ;;  %640 = vrot.lane.b32.xlu1 %v4046_v14, %s3845_s23  ;;  %v445_v34 = vrot.slane %v444_v31, 4  ;;  %v194_v28 = vld [vmem:[%s3986_s11 + $0x28] sm:$0xff] }
  0x54   : > { %v423_v17 = vsel %vm373_vm0, %v238_v30, -inf  ;;  %v451_v35 = vsel %vm373_vm0, %v255_v8, -inf  ;;  %v472_v36 = vsel %vm373_vm0, %v270_v19, -inf  ;;  %v418_v39 = vmax.f32 %v416_v29, %v417_v13 }
  0x55   : > { %v384_v37 = vrot.slane %v383_v32, 2  ;;  %v398_v38 = vrot.slane %v397_v33, 2  ;;  %v424_v40 = vrot.slane %v423_v17, 4  ;;  %v446_v41 = vmax.f32 %v444_v31, %v445_v34 }
  0x56   : > { %646 = vrot.lane.b32.xlu0 %v4040_v4, %s3845_s23  ;;  %v452_v42 = vrot.slane %v451_v35, 4  ;;  %v473_v43 = vrot.slane %v472_v36, 4  ;;  %v272_v44 = vcombine.high %v270_v19, %v270_v19  ;;  %v419_v47 = vrot.slane %v418_v39, 2 }
  0x57   : > { %v385_v45 = vmax.f32 %v383_v32, %v384_v37  ;;  %v399_v46 = vmax.f32 %v397_v33, %v398_v38  ;;  %v425_v48 = vmax.f32 %v423_v17, %v424_v40  ;;  %648 = vrot.lane.b32.xlu1 %v4070_v27, %s3845_s23  ;;  %v447_v49 = vrot.slane %v446_v41, 2 }
  0x58   : > { %v453_v50 = vmax.f32 %v451_v35, %v452_v42  ;;  %v474_v51 = vmax.f32 %v472_v36, %v473_v43  ;;  %v479_v52 = vsel %vm373_vm0, %v272_v44, -inf  ;;  %v420_v55 = vmax.f32 %v418_v39, %v419_v47 }
  0x59   : > { %v386_v53 = vrot.slane %v385_v45, 1  ;;  %v400_v54 = vrot.slane %v399_v46, 1  ;;  %v426_v56 = vrot.slane %v425_v48, 2  ;;  %v448_v57 = vmax.f32 %v446_v41, %v447_v49 }
  0x5a   : > { %654 = vrot.lane.b32.xlu0 %v4052_v22, %s3845_s23  ;;  %v454_v58 = vrot.slane %v453_v50, 2  ;;  %v475_v59 = vrot.slane %v474_v51, 2  ;;  %v480_v60 = vrot.slane %v479_v52, 4  ;;  %v421_v6 = vrot.slane %v420_v55, 1 }
  0x5b   : > { %v4091_v63 = vmax.f32 %v385_v45, %v386_v53  ;;  %v4093_v2 = vmax.f32 %v399_v46, %v400_v54  ;;  %v427_v10 = vmax.f32 %v425_v48, %v426_v56  ;;  %656 = vrot.lane.b32.xlu1 %v4076_v16, %s3845_s23  ;;  %v449_v11 = vrot.slane %v448_v57, 1 }
  0x5c   : > { %v455_v18 = vmax.f32 %v453_v50, %v454_v58  ;;  %v476_v20 = vmax.f32 %v474_v51, %v475_v59  ;;  %v481_v21 = vmax.f32 %v479_v52, %v480_v60  ;;  %v4097_v23 = vmax.f32 %v420_v55, %v421_v6 }
  0x5d   : > { %v428_v24 = vrot.slane %v427_v10, 1  ;;  %v280_v25 = vrot.slane %v193_v61, %v3996_v5  ;;  %v273_v26 = vcombine.high %v193_v61, %v193_v61  ;;  %v4102_v9 = vmax.f32 %v448_v57, %v449_v11 }
  0x5e   : > { %632 = vrot.lane.b32.xlu0 %v4091_v63, %s3845_s23  ;;  %v456_v19 = vrot.slane %v455_v18, 1  ;;  %v477_v7 = vrot.slane %v476_v20, 1  ;;  %v482_v15 = vrot.slane %v481_v21, 2  ;;  %v297_v37 = vrot.slane %v194_v28, %v3996_v5 }
  0x5f   : > { %v4105_v29 = vmax.f32 %v427_v10, %v428_v24  ;;  %v486_v30 = vsel %vm373_vm0, %v280_v25, -inf  ;;  %v288_v31 = vcombine.high %v280_v25, %v280_v25  ;;  %v287_v8 = vrot.slane %v273_v26, %v3996_v5  ;;  %636 = vrot.lane.b32.xlu1 %v4093_v2, %s3845_s23  ;;  %v195_v26 = vld [vmem:[%s3986_s11 + $0x30] sm:$0xff] }
  0x60   : > { %v4111_v32 = vmax.f32 %v455_v18, %v456_v19  ;;  %v4113_v33 = vmax.f32 %v476_v20, %v477_v7  ;;  %v483_v13 = vmax.f32 %v481_v21, %v482_v15  ;;  %v487_v17 = vrot.slane %v486_v30, 4 }
  0x61   : > { %v493_v34 = vsel %vm373_vm0, %v288_v31, -inf  ;;  %v500_v35 = vsel %vm373_vm0, %v287_v8, -inf  ;;  %v289_v36 = vcombine.high %v287_v8, %v287_v8  ;;  %v514_v43 = vsel %vm373_vm0, %v297_v37, -inf }
  0x62   : > { %642 = vrot.lane.b32.xlu0 %v4097_v23, %s3845_s23  ;;  %v484_v38 = vrot.slane %v483_v13, 1  ;;  %v488_v39 = vmax.f32 %v486_v30, %v487_v17  ;;  %v494_v40 = vrot.slane %v493_v34, 4  ;;  %v501_v41 = vrot.slane %v500_v35, 4 }
  0x63   : > { %v507_v42 = vsel %vm373_vm0, %v289_v36, -inf  ;;  %v305_v44 = vcombine.high %v297_v37, %v297_v37  ;;  %v290_v45 = vcombine.high %v194_v28, %v194_v28  ;;  %644 = vrot.lane.b32.xlu1 %v4105_v29, %s3845_s23  ;;  %v515_v51 = vrot.slane %v514_v43, 4 }
  0x64   : > { %v4124_v46 = vmax.f32 %v483_v13, %v484_v38  ;;  %v489_v47 = vrot.slane %v488_v39, 2  ;;  %v495_v48 = vmax.f32 %v493_v34, %v494_v40  ;;  %v502_v49 = vmax.f32 %v500_v35, %v501_v41 }
  0x65   : > { %v508_v50 = vrot.slane %v507_v42, 4  ;;  %v521_v52 = vsel %vm373_vm0, %v305_v44, -inf  ;;  %v304_v53 = vrot.slane %v290_v45, %v3996_v5  ;;  %v516_v59 = vmax.f32 %v514_v43, %v515_v51  ;;  %v196_v45 = vld [vmem:[%s3986_s11 + $0x38] sm:$0xff] }
  0x66   : > { %650 = vrot.lane.b32.xlu0 %v4102_v9, %s3845_s23  ;;  %v490_v54 = vmax.f32 %v488_v39, %v489_v47  ;;  %v496_v55 = vrot.slane %v495_v48, 2  ;;  %v503_v56 = vrot.slane %v502_v49, 2  ;;  %v522_v57 = vrot.slane %v521_v52, 4 }
  0x67   : > { %v509_v58 = vmax.f32 %v507_v42, %v508_v50  ;;  %v528_v60 = vsel %vm373_vm0, %v304_v53, -inf  ;;  %v306_v61 = vcombine.high %v304_v53, %v304_v53  ;;  %652 = vrot.lane.b32.xlu1 %v4111_v32, %s3845_s23  ;;  %v517_v21 = vrot.slane %v516_v59, 2 }
  0x68   : > { %v491_v6 = vrot.slane %v490_v54, 1  ;;  %v497_v10 = vmax.f32 %v495_v48, %v496_v55  ;;  %v504_v11 = vmax.f32 %v502_v49, %v503_v56  ;;  %v523_v18 = vmax.f32 %v521_v52, %v522_v57 }
  0x69   : > { %v510_v20 = vrot.slane %v509_v58, 2  ;;  %v529_v24 = vrot.slane %v528_v60, 4  ;;  %v535_v25 = vsel %vm373_vm0, %v306_v61, -inf  ;;  %v518_v31 = vmax.f32 %v516_v59, %v517_v21 }
  0x6a   : > { %658 = vrot.lane.b32.xlu0 %v4113_v33, %s3845_s23  ;;  %v4137_v19 = vmax.f32 %v490_v54, %v491_v6  ;;  %v498_v7 = vrot.slane %v497_v10, 1  ;;  %v505_v15 = vrot.slane %v504_v11, 1  ;;  %v524_v28 = vrot.slane %v523_v18, 2 }
  0x6b   : > { %v511_v30 = vmax.f32 %v509_v58, %v510_v20  ;;  %v530_v8 = vmax.f32 %v528_v60, %v529_v24  ;;  %v536_v13 = vrot.slane %v535_v25, 4  ;;  %660 = vrot.lane.b32.xlu1 %v4124_v46, %s3845_s23  ;;  %v314_v36 = vrot.slane %v195_v26, %v3996_v5 }
  0x6c   : > { %v4141_v17 = vmax.f32 %v497_v10, %v498_v7  ;;  %v4143_v34 = vmax.f32 %v504_v11, %v505_v15  ;;  %v525_v35 = vmax.f32 %v523_v18, %v524_v28  ;;  %v519_v38 = vrot.slane %v518_v31, 1 }
  0x6d   : > { %v512_v37 = vrot.slane %v511_v30, 1  ;;  %v531_v39 = vrot.slane %v530_v8, 2  ;;  %v537_v40 = vmax.f32 %v535_v25, %v536_v13  ;;  %v542_v42 = vsel %vm373_vm0, %v314_v36, -inf }
  0x6e   : > { %662 = vrot.lane.b32.xlu0 %v4137_v19, %s3845_s23  ;;  %v526_v41 = vrot.slane %v525_v35, 1  ;;  %v322_v43 = vcombine.high %v314_v36, %v314_v36  ;;  %v307_v44 = vcombine.high %v195_v26, %v195_v26  ;;  %v4152_v48 = vmax.f32 %v518_v31, %v519_v38 }
  0x6f   : > { %v4150_v47 = vmax.f32 %v511_v30, %v512_v37  ;;  %v532_v49 = vmax.f32 %v530_v8, %v531_v39  ;;  %v538_v50 = vrot.slane %v537_v40, 2  ;;  %664 = vrot.lane.b32.xlu1 %v4141_v17, %s3845_s23  ;;  %v543_v52 = vrot.slane %v542_v42, 4 }
  0x70   : > { %v4156_v51 = vmax.f32 %v525_v35, %v526_v41  ;;  %v549_v53 = vsel %vm373_vm0, %v322_v43, -inf  ;;  %v321_v54 = vrot.slane %v307_v44, %v3996_v5  ;;  %v331_v58 = vrot.slane %v196_v45, %v3996_v5 }
  0x71   : > { %v533_v55 = vrot.slane %v532_v49, 1  ;;  %v539_v56 = vmax.f32 %v537_v40, %v538_v50  ;;  %v550_v57 = vrot.slane %v549_v53, 4  ;;  %v544_v59 = vmax.f32 %v542_v42, %v543_v52 }
  0x72   : > { %666 = vrot.lane.b32.xlu0 %v4143_v34, %s3845_s23  ;;  %v556_v60 = vsel %vm373_vm0, %v321_v54, -inf  ;;  %v323_v61 = vcombine.high %v321_v54, %v321_v54  ;;  %v324_v6 = vcombine.high %v196_v45, %v196_v45  ;;  %v570_v25 = vsel %vm373_vm0, %v331_v58, -inf }
  0x73   : > { %v4164_v10 = vmax.f32 %v532_v49, %v533_v55  ;;  %v540_v11 = vrot.slane %v539_v56, 1  ;;  %v551_v18 = vmax.f32 %v549_v53, %v550_v57  ;;  %v557_v20 = vrot.slane %v556_v60, 4  ;;  %668 = vrot.lane.b32.xlu1 %v4150_v47, %s3845_s23 }
  0x74   : > { %v545_v21 = vrot.slane %v544_v59, 2  ;;  %v563_v24 = vsel %vm373_vm0, %v323_v61, -inf  ;;  %v339_v26 = vcombine.high %v331_v58, %v331_v58  ;;  %v571_v8 = vrot.slane %v570_v25, 4 }
  0x75   : > { %v4170_v7 = vmax.f32 %v539_v56, %v540_v11  ;;  %v552_v15 = vrot.slane %v551_v18, 2  ;;  %v558_v28 = vmax.f32 %v556_v60, %v557_v20  ;;  %v564_v30 = vrot.slane %v563_v24, 4 }
  0x76   : > { %670 = vrot.lane.b32.xlu0 %v4152_v48, %s3845_s23  ;;  %v546_v31 = vmax.f32 %v544_v59, %v545_v21  ;;  %v577_v13 = vsel %vm373_vm0, %v339_v26, -inf  ;;  %v338_v35 = vrot.slane %v324_v6, %v3996_v5  ;;  %v572_v41 = vmax.f32 %v570_v25, %v571_v8 }
  0x77   : > { %v553_v36 = vmax.f32 %v551_v18, %v552_v15  ;;  %v559_v37 = vrot.slane %v558_v28, 2  ;;  %v565_v38 = vmax.f32 %v563_v24, %v564_v30  ;;  %v578_v39 = vrot.slane %v577_v13, 4  ;;  %672 = vrot.lane.b32.xlu1 %v4156_v51, %s3845_s23 }
  0x78   : > { %v547_v40 = vrot.slane %v546_v31, 1  ;;  %v584_v42 = vsel %vm373_vm0, %v338_v35, -inf  ;;  %v340_v43 = vcombine.high %v338_v35, %v338_v35  ;;  %v573_v53 = vrot.slane %v572_v41, 2 }
  0x79   : > { %v554_v44 = vrot.slane %v553_v36, 1  ;;  %v560_v45 = vmax.f32 %v558_v28, %v559_v37  ;;  %v566_v49 = vrot.slane %v565_v38, 2  ;;  %v579_v50 = vmax.f32 %v577_v13, %v578_v39 }
  0x7a   : > { %674 = vrot.lane.b32.xlu0 %v4164_v10, %s3845_s23  ;;  %v4181_v52 = vmax.f32 %v546_v31, %v547_v40  ;;  %v585_v54 = vrot.slane %v584_v42, 4  ;;  %v591_v55 = vsel %vm373_vm0, %v340_v43, -inf  ;;  %v574_v60 = vmax.f32 %v572_v41, %v573_v53 }
  0x7b   : > { %v561_v56 = vrot.slane %v560_v45, 1  ;;  %v567_v57 = vmax.f32 %v565_v38, %v566_v49  ;;  %v580_v58 = vrot.slane %v579_v50, 2  ;;  %676 = vrot.lane.b32.xlu1 %v4170_v7, %s3845_s23  ;;  %v4186_v59 = vmax.f32 %v553_v36, %v554_v44 }
  0x7c   : > { %v586_v61 = vmax.f32 %v584_v42, %v585_v54  ;;  %v592_v6 = vrot.slane %v591_v55, 4  ;;  %v575_v21 = vrot.slane %v574_v60, 1  ;;  %vm2522_vm0 = vcmask 261120  }
  0x7d   : > { %v568_v11 = vrot.slane %v567_v57, 1  ;;  %v581_v18 = vmax.f32 %v579_v50, %v580_v58  ;;  %v4190_v20 = vmax.f32 %v560_v45, %v561_v56 }
  0x7e   : > { %678 = vrot.lane.b32.xlu0 %v4181_v52, %s3845_s23  ;;  %v587_v24 = vrot.slane %v586_v61, 2  ;;  %v593_v25 = vmax.f32 %v591_v55, %v592_v6  ;;  %v4198_v31 = vmax.f32 %v574_v60, %v575_v21 }
  0x7f   : > { %680 = vrot.lane.b32.xlu1 %v4186_v59, %s3845_s23  ;;  %v4194_v26 = vmax.f32 %v567_v57, %v568_v11  ;;  %v582_v15 = vrot.slane %v581_v18, 1 }
  0x80   : > { %v588_v28 = vmax.f32 %v586_v61, %v587_v24  ;;  %v594_v30 = vrot.slane %v593_v25, 2 }
  0x81   : > { %v4202_v35 = vmax.f32 %v581_v18, %v582_v15 }
  0x82   : > { %682 = vrot.lane.b32.xlu0 %v4190_v20, %s3845_s23  ;;  %v589_v8 = vrot.slane %v588_v28, 1  ;;  %v595_v13 = vmax.f32 %v593_v25, %v594_v30 }
  0x83   : > { %684 = vrot.lane.b32.xlu1 %v4194_v26, %s3845_s23 }
  0x84   : > { %v596_v36 = vrot.slane %v595_v13, 1  ;;  %v4206_v37 = vmax.f32 %v588_v28, %v589_v8 }
  0x86   : > { %686 = vrot.lane.b32.xlu0 %v4198_v31, %s3845_s23  ;;  %v4210_v38 = vmax.f32 %v595_v13, %v596_v36 }
  0x87   : > { %688 = vrot.lane.b32.xlu1 %v4202_v35, %s3845_s23 }
  0x8a   : > { %690 = vrot.lane.b32.xlu0 %v4206_v37, %s3845_s23 }
  0x8b   : > { %692 = vrot.lane.b32.xlu1 %v4210_v38, %s3845_s23 }
  0x8e   : > { %694 = vrot.lane.b32.xlu0 %v4036_v62, %s3846_s4 }
  0x8f   : > { %696 = vrot.lane.b32.xlu1 %v4091_v63, %s3846_s4 }
  0x92   : > { %698 = vrot.lane.b32.xlu0 %v4044_v12, %s3846_s4 }
  0x93   : > { %700 = vrot.lane.b32.xlu1 %v4093_v2, %s3846_s4 }
  0x96   : > { %702 = vrot.lane.b32.xlu0 %v4038_v1, %s3846_s4 }
  0x97   : > { %704 = vrot.lane.b32.xlu1 %v4046_v14, %s3846_s4 }
  0x9a   : > { %706 = vrot.lane.b32.xlu0 %v4097_v23, %s3846_s4 }
  0x9b   : > { %708 = vrot.lane.b32.xlu1 %v4105_v29, %s3846_s4 }
  0x9e   : > { %710 = vrot.lane.b32.xlu0 %v4040_v4, %s3846_s4 }
  0x9f   : > { %712 = vrot.lane.b32.xlu1 %v4070_v27, %s3846_s4 }
  0xa2   : > { %714 = vrot.lane.b32.xlu0 %v4102_v9, %s3846_s4 }
  0xa3   : > { %716 = vrot.lane.b32.xlu1 %v4111_v32, %s3846_s4 }
  0xa6   : > { %718 = vrot.lane.b32.xlu0 %v4052_v22, %s3846_s4 }
  0xa7   : > { %720 = vrot.lane.b32.xlu1 %v4076_v16, %s3846_s4 }
  0xaa   : > { %722 = vrot.lane.b32.xlu0 %v4113_v33, %s3846_s4 }
  0xab   : > { %724 = vrot.lane.b32.xlu1 %v4124_v46, %s3846_s4 }
  0xae   : > { %726 = vrot.lane.b32.xlu0 %v4137_v19, %s3846_s4 }
  0xaf   : > { %728 = vrot.lane.b32.xlu1 %v4141_v17, %s3846_s4 }
  0xb2   : > { %730 = vrot.lane.b32.xlu0 %v4143_v34, %s3846_s4 }
  0xb3   : > { %732 = vrot.lane.b32.xlu1 %v4150_v47, %s3846_s4 }
  0xb6   : > { %734 = vrot.lane.b32.xlu0 %v4152_v48, %s3846_s4 }
  0xb7   : > { %736 = vrot.lane.b32.xlu1 %v4156_v51, %s3846_s4 }
  0xba   : > { %738 = vrot.lane.b32.xlu0 %v4164_v10, %s3846_s4 }
  0xbb   : > { %740 = vrot.lane.b32.xlu1 %v4170_v7, %s3846_s4 }
  0xbe   : > { %742 = vrot.lane.b32.xlu0 %v4181_v52, %s3846_s4 }
  0xbf   : > { %744 = vrot.lane.b32.xlu1 %v4186_v59, %s3846_s4 }
  0xc0   : > { %v4266_v39 = vpop.permute.xlu0 %630 }
  0xc1   : > { %v4272_v40 = vpop.permute.xlu1 %634 }
  0xc2   : > { %746 = vrot.lane.b32.xlu0 %v4190_v20, %s3846_s4 }
  0xc3   : > { %748 = vrot.lane.b32.xlu1 %v4194_v26, %s3846_s4 }
  0xc4   : > { %v4274_v41 = vpop.permute.xlu0 %638 }
  0xc5   : > { %v4280_v42 = vpop.permute.xlu1 %640 }
  0xc6   : > { %750 = vrot.lane.b32.xlu0 %v4198_v31, %s3846_s4 }
  0xc7   : > { %752 = vrot.lane.b32.xlu1 %v4202_v35, %s3846_s4 }
  0xc8   : > { %v4282_v43 = vpop.permute.xlu0 %646 }
  0xc9   : > { %v4288_v44 = vpop.permute.xlu1 %648 }
  0xca   : > { %754 = vrot.lane.b32.xlu0 %v4206_v37, %s3846_s4 }
  0xcb   : > { %756 = vrot.lane.b32.xlu1 %v4210_v38, %s3846_s4 }
  0xcc   : > { %v4290_v45 = vpop.permute.xlu0 %654 }
  0xcd   : > { %v4296_v49 = vpop.permute.xlu1 %656 }
  0xce   : > { %758 = vrot.lane.b32.xlu0 %v4036_v62, %s3847_s6 }
  0xcf   : > { %760 = vrot.lane.b32.xlu1 %v4091_v63, %s3847_s6 }
  0xd0   : > { %v4298_v50 = vpop.permute.xlu0 %632 }
  0xd1   : > { %v4304_v53 = vpop.permute.xlu1 %636 }
  0xd2   : > { %762 = vrot.lane.b32.xlu0 %v4044_v12, %s3847_s6 }
  0xd3   : > { %764 = vrot.lane.b32.xlu1 %v4093_v2, %s3847_s6 }
  0xd4   : > { %v4306_v54 = vpop.permute.xlu0 %642 }
  0xd5   : > { %v4312_v55 = vpop.permute.xlu1 %644 }
  0xd6   : > { %766 = vrot.lane.b32.xlu0 %v4038_v1, %s3847_s6 }
  0xd7   : > { %768 = vrot.lane.b32.xlu1 %v4046_v14, %s3847_s6 }
  0xd8   : > { %v4314_v56 = vpop.permute.xlu0 %650 }
  0xd9   : > { %v4320_v57 = vpop.permute.xlu1 %652 }
  0xda   : > { %770 = vrot.lane.b32.xlu0 %v4097_v23, %s3847_s6 }
  0xdb   : > { %772 = vrot.lane.b32.xlu1 %v4105_v29, %s3847_s6 }
  0xdc   : > { %v4322_v58 = vpop.permute.xlu0 %658 }
  0xdd   : > { %6628 = vst [vmem:[#allocation11_spill] sm:$0xff] %v4322_v58  ;;  %v4328_v60 = vpop.permute.xlu1 %660 }
  0xde   : > { %774 = vrot.lane.b32.xlu0 %v4040_v4, %s3847_s6  ;;  %6629 = vst [vmem:[#allocation12_spill] sm:$0xff] %v4328_v60 }
  0xdf   : > { %776 = vrot.lane.b32.xlu1 %v4070_v27, %s3847_s6 }
  0xe0   : > { %v4330_v61 = vpop.permute.xlu0 %662 }
  0xe1   : > { %v4336_v6 = vpop.permute.xlu1 %664 }
  0xe2   : > { %778 = vrot.lane.b32.xlu0 %v4102_v9, %s3847_s6 }
  0xe3   : > { %780 = vrot.lane.b32.xlu1 %v4111_v32, %s3847_s6 }
  0xe4   : > { %v4338_v11 = vpop.permute.xlu0 %666 }
  0xe5   : > { %v4344_v18 = vpop.permute.xlu1 %668 }
  0xe6   : > { %782 = vrot.lane.b32.xlu0 %v4052_v22, %s3847_s6 }
  0xe7   : > { %784 = vrot.lane.b32.xlu1 %v4076_v16, %s3847_s6 }
  0xe8   : > { %v4346_v21 = vpop.permute.xlu0 %670 }
  0xe9   : > { %6630 = vst [vmem:[#allocation13_spill] sm:$0xff] %v4346_v21  ;;  %v4352_v24 = vpop.permute.xlu1 %672 }
  0xea   : > { %786 = vrot.lane.b32.xlu0 %v4113_v33, %s3847_s6  ;;  %6631 = vst [vmem:[#allocation14_spill] sm:$0xff] %v4352_v24 }
  0xeb   : > { %788 = vrot.lane.b32.xlu1 %v4124_v46, %s3847_s6 }
  0xec   : > { %v4354_v25 = vpop.permute.xlu0 %674 }
  0xed   : > { %6632 = vst [vmem:[#allocation15_spill] sm:$0xff] %v4354_v25  ;;  %v4360_v15 = vpop.permute.xlu1 %676 }
  0xee   : > { %790 = vrot.lane.b32.xlu0 %v4137_v19, %s3847_s6  ;;  %6633 = vst [vmem:[#allocation16_spill] sm:$0xff] %v4360_v15 }
  0xef   : > { %792 = vrot.lane.b32.xlu1 %v4141_v17, %s3847_s6 }
  0xf0   : > { %v4362_v28 = vpop.permute.xlu0 %678 }
  0xf1   : > { %v4368_v30 = vpop.permute.xlu1 %680 }
  0xf2   : > { %794 = vrot.lane.b32.xlu0 %v4143_v34, %s3847_s6 }
  0xf3   : > { %796 = vrot.lane.b32.xlu1 %v4150_v47, %s3847_s6 }
  0xf4   : > { %v4370_v8 = vpop.permute.xlu0 %682 }
  0xf5   : > { %v4376_v13 = vpop.permute.xlu1 %684 }
  0xf6   : > { %798 = vrot.lane.b32.xlu0 %v4152_v48, %s3847_s6 }
  0xf7   : > { %800 = vrot.lane.b32.xlu1 %v4156_v51, %s3847_s6 }
  0xf8   : > { %v4378_v36 = vpop.permute.xlu0 %686 }
  0xf9   : > { %6634 = vst [vmem:[#allocation17_spill] sm:$0xff] %v4378_v36  ;;  %v4384_v0 = vpop.permute.xlu1 %688 }
  0xfa   : > { %802 = vrot.lane.b32.xlu0 %v4164_v10, %s3847_s6  ;;  %6635 = vst [vmem:[#allocation18_spill] sm:$0xff] %v4384_v0 }
  0xfb   : > { %804 = vrot.lane.b32.xlu1 %v4170_v7, %s3847_s6 }
  0xfc   : > { %v4386_v3 = vpop.permute.xlu0 %690 }
  0xfd   : > { %6636 = vst [vmem:[#allocation19_spill] sm:$0xff] %v4386_v3  ;;  %v4392_v5 = vpop.permute.xlu1 %692 }
  0xfe   : > { %806 = vrot.lane.b32.xlu0 %v4181_v52, %s3847_s6  ;;  %6637 = vst [vmem:[#allocation20_spill] sm:$0xff] %v4392_v5 }
  0xff   : > { %808 = vrot.lane.b32.xlu1 %v4186_v59, %s3847_s6 }
 0x100   : > { %v4394_v15 = vpop.permute.xlu0 %694 }
 0x101   : > { %6638 = vst [vmem:[#allocation21_spill] sm:$0xff] %v4394_v15  ;;  %v4400_v25 = vpop.permute.xlu1 %696  ;;  %v1081_v15 = vrot.slane %v4044_v12, 6 }
 0x102   : > { %810 = vrot.lane.b32.xlu0 %v4190_v20, %s3847_s6 }
 0x103   : > { %812 = vrot.lane.b32.xlu1 %v4194_v26, %s3847_s6 }
 0x104   : > { %v4402_v60 = vpop.permute.xlu0 %698 }
 0x105   : > { %v4408_v3 = vpop.permute.xlu1 %700 }
 0x106   : > { %814 = vrot.lane.b32.xlu0 %v4198_v31, %s3847_s6  ;;  %6639 = vst [vmem:[#allocation22_spill] sm:$0xff] %v4408_v3 }
 0x107   : > { %816 = vrot.lane.b32.xlu1 %v4202_v35, %s3847_s6 }
 0x108   : > { %v4410_v5 = vpop.permute.xlu0 %702 }
 0x109   : > { %6640 = vst [vmem:[#allocation23_spill] sm:$0xff] %v4410_v5  ;;  %v4416_v0 = vpop.permute.xlu1 %704 }
 0x10a   : > { %818 = vrot.lane.b32.xlu0 %v4206_v37, %s3847_s6  ;;  %6641 = vst [vmem:[#allocation24_spill] sm:$0xff] %v4416_v0 }
 0x10b   : > { %820 = vrot.lane.b32.xlu1 %v4210_v38, %s3847_s6  ;;  %s3642_s6 = sshll.u32 %s3982_s5, 3 }
 0x10c   : > { %v4418_v24 = vpop.permute.xlu0 %706 }
 0x10d   : > { %6642 = vst [vmem:[#allocation25_spill] sm:$0xff] %v4418_v24  ;;  %v4424_v58 = vpop.permute.xlu1 %708 }
 0x10e   : > { %822 = vrot.lane.b32.xlu0 %v4036_v62, %s3848_s7  ;;  %6643 = vst [vmem:[#allocation26_spill] sm:$0xff] %v4424_v58 }
 0x10f   : > { %824 = vrot.lane.b32.xlu1 %v4091_v63, %s3848_s7 }
 0x110   : > { %v4426_v5 = vpop.permute.xlu0 %710 }
 0x111   : > { %6644 = vst [vmem:[#allocation27_spill] sm:$0xff] %v4426_v5  ;;  %v4432_v0 = vpop.permute.xlu1 %712 }
 0x112   : > { %826 = vrot.lane.b32.xlu0 %v4044_v12, %s3848_s7 }
 0x113   : > { %828 = vrot.lane.b32.xlu1 %v4093_v2, %s3848_s7 }
 0x114   : > { %v4434_v24 = vpop.permute.xlu0 %714 }
 0x115   : > { %6645 = vst [vmem:[#allocation28_spill] sm:$0xff] %v4434_v24  ;;  %v4440_v3 = vpop.permute.xlu1 %716  ;;  %v1197_v24 = vrot.slane %v4070_v27, 7 }
 0x116   : > { %830 = vrot.lane.b32.xlu0 %v4038_v1, %s3848_s7  ;;  %6646 = vst [vmem:[#allocation29_spill] sm:$0xff] %v4440_v3 }
 0x117   : > { %832 = vrot.lane.b32.xlu1 %v4046_v14, %s3848_s7 }
 0x118   : > { %v4442_v58 = vpop.permute.xlu0 %718 }
 0x119   : > { %6647 = vst [vmem:[#allocation30_spill] sm:$0xff] %v4442_v58  ;;  %v4448_v36 = vpop.permute.xlu1 %720 }
 0x11a   : > { %834 = vrot.lane.b32.xlu0 %v4097_v23, %s3848_s7  ;;  %6648 = vst [vmem:[#allocation31_spill] sm:$0xff] %v4448_v36 }
 0x11b   : > { %836 = vrot.lane.b32.xlu1 %v4105_v29, %s3848_s7 }
 0x11c   : > { %v4450_v5 = vpop.permute.xlu0 %722 }
 0x11d   : > { %6649 = vst [vmem:[#allocation32_spill] sm:$0xff] %v4450_v5  ;;  %v4456_v21 = vpop.permute.xlu1 %724 }
 0x11e   : > { %840 = vrot.lane.b32.xlu0 %v4070_v27, %s3848_s7  ;;  %6650 = vst [vmem:[#allocation33_spill] sm:$0xff] %v4456_v21 }
 0x11f   : > { %856 = vrot.lane.b32.xlu1 %v4141_v17, %s3848_s7 }
 0x120   : > { %v4458_v3 = vpop.permute.xlu0 %726 }
 0x121   : > { %6651 = vst [vmem:[#allocation34_spill] sm:$0xff] %v4458_v3  ;;  %v4464_v58 = vpop.permute.xlu1 %728 }
 0x122   : > { %872 = vrot.lane.b32.xlu0 %v4186_v59, %s3848_s7  ;;  %6652 = vst [vmem:[#allocation35_spill] sm:$0xff] %v4464_v58 }
 0x123   : > { %888 = vrot.lane.b32.xlu1 %v4091_v63, %s3849_s8 }
 0x124   : > { %v4466_v36 = vpop.permute.xlu0 %730 }
 0x125   : > { %6653 = vst [vmem:[#allocation36_spill] sm:$0xff] %v4466_v36  ;;  %v4472_v21 = vpop.permute.xlu1 %732 }
 0x126   : > { %904 = vrot.lane.b32.xlu0 %v4070_v27, %s3849_s8  ;;  %6654 = vst [vmem:[#allocation37_spill] sm:$0xff] %v4472_v21 }
 0x127   : > { %920 = vrot.lane.b32.xlu1 %v4141_v17, %s3849_s8 }
 0x128   : > { %v4474_v5 = vpop.permute.xlu0 %734 }
 0x129   : > { %6655 = vst [vmem:[#allocation38_spill] sm:$0xff] %v4474_v5  ;;  %v4480_v3 = vpop.permute.xlu1 %736 }
 0x12a   : > { %936 = vrot.lane.b32.xlu0 %v4186_v59, %s3849_s8  ;;  %6656 = vst [vmem:[#allocation39_spill] sm:$0xff] %v4480_v3 }
 0x12b   : > { %952 = vrot.lane.b32.xlu1 %v4091_v63, %s3850_s17 }
 0x12c   : > { %v4482_v36 = vpop.permute.xlu0 %738 }
 0x12d   : > { %6657 = vst [vmem:[#allocation40_spill] sm:$0xff] %v4482_v36  ;;  %v4488_v21 = vpop.permute.xlu1 %740 }
 0x12e   : > { %968 = vrot.lane.b32.xlu0 %v4070_v27, %s3850_s17  ;;  %6658 = vst [vmem:[#allocation41_spill] sm:$0xff] %v4488_v21 }
 0x12f   : > { %984 = vrot.lane.b32.xlu1 %v4141_v17, %s3850_s17 }
 0x130   : > { %v4490_v5 = vpop.permute.xlu0 %742 }
 0x131   : > { %6659 = vst [vmem:[#allocation42_spill] sm:$0xff] %v4490_v5  ;;  %v4496_v3 = vpop.permute.xlu1 %744 }
 0x132   : > { %1000 = vrot.lane.b32.xlu0 %v4186_v59, %s3850_s17  ;;  %6660 = vst [vmem:[#allocation43_spill] sm:$0xff] %v4496_v3 }
 0x133   : > { %1016 = vrot.lane.b32.xlu1 %v4091_v63, %s3851_s19 }
 0x134   : > { %v4498_v36 = vpop.permute.xlu0 %746 }
 0x135   : > { %6661 = vst [vmem:[#allocation44_spill] sm:$0xff] %v4498_v36  ;;  %v4504_v21 = vpop.permute.xlu1 %748 }
 0x136   : > { %1032 = vrot.lane.b32.xlu0 %v4070_v27, %s3851_s19  ;;  %6662 = vst [vmem:[#allocation45_spill] sm:$0xff] %v4504_v21  ;;  %v1198_v27 = vsel %vm1079_vm1, %v1197_v24, %v4040_v4 }
 0x137   : > { %1048 = vrot.lane.b32.xlu1 %v4141_v17, %s3851_s19 }
 0x138   : > { %v4506_v5 = vpop.permute.xlu0 %750 }
 0x139   : > { %6663 = vst [vmem:[#allocation46_spill] sm:$0xff] %v4506_v5  ;;  %v4512_v3 = vpop.permute.xlu1 %752 }
 0x13a   : > { %1064 = vrot.lane.b32.xlu0 %v4186_v59, %s3851_s19  ;;  %6664 = vst [vmem:[#allocation47_spill] sm:$0xff] %v4512_v3 }
 0x13b   : > { %842 = vrot.lane.b32.xlu1 %v4102_v9, %s3848_s7 }
 0x13c   : > { %v4514_v36 = vpop.permute.xlu0 %754 }
 0x13d   : > { %6665 = vst [vmem:[#allocation48_spill] sm:$0xff] %v4514_v36  ;;  %v4520_v58 = vpop.permute.xlu1 %756 }
 0x13e   : > { %858 = vrot.lane.b32.xlu0 %v4143_v34, %s3848_s7  ;;  %6666 = vst [vmem:[#allocation49_spill] sm:$0xff] %v4520_v58 }
 0x13f   : > { %874 = vrot.lane.b32.xlu1 %v4190_v20, %s3848_s7 }
 0x140   : > { %v4522_v21 = vpop.permute.xlu0 %758 }
 0x141   : > { %6667 = vst [vmem:[#allocation50_spill] sm:$0xff] %v4522_v21  ;;  %v4528_v5 = vpop.permute.xlu1 %760 }
 0x142   : > { %890 = vrot.lane.b32.xlu0 %v4044_v12, %s3849_s8  ;;  %6668 = vst [vmem:[#allocation51_spill] sm:$0xff] %v4528_v5 }
 0x143   : > { %906 = vrot.lane.b32.xlu1 %v4102_v9, %s3849_s8 }
 0x144   : > { %v4530_v3 = vpop.permute.xlu0 %762 }
 0x145   : > { %6669 = vst [vmem:[#allocation52_spill] sm:$0xff] %v4530_v3  ;;  %v4536_v36 = vpop.permute.xlu1 %764 }
 0x146   : > { %922 = vrot.lane.b32.xlu0 %v4143_v34, %s3849_s8  ;;  %6670 = vst [vmem:[#allocation53_spill] sm:$0xff] %v4536_v36 }
 0x147   : > { %938 = vrot.lane.b32.xlu1 %v4190_v20, %s3849_s8 }
 0x148   : > { %v4538_v58 = vpop.permute.xlu0 %766 }
 0x149   : > { %6671 = vst [vmem:[#allocation54_spill] sm:$0xff] %v4538_v58  ;;  %v4544_v21 = vpop.permute.xlu1 %768 }
 0x14a   : > { %954 = vrot.lane.b32.xlu0 %v4044_v12, %s3850_s17  ;;  %6672 = vst [vmem:[#allocation55_spill] sm:$0xff] %v4544_v21 }
 0x14b   : > { %970 = vrot.lane.b32.xlu1 %v4102_v9, %s3850_s17 }
 0x14c   : > { %v4546_v5 = vpop.permute.xlu0 %770 }
 0x14d   : > { %6673 = vst [vmem:[#allocation56_spill] sm:$0xff] %v4546_v5  ;;  %v4552_v3 = vpop.permute.xlu1 %772 }
 0x14e   : > { %986 = vrot.lane.b32.xlu0 %v4143_v34, %s3850_s17  ;;  %6674 = vst [vmem:[#allocation57_spill] sm:$0xff] %v4552_v3 }
 0x14f   : > { %1002 = vrot.lane.b32.xlu1 %v4190_v20, %s3850_s17 }
 0x150   : > { %v4554_v36 = vpop.permute.xlu0 %774 }
 0x151   : > { %6675 = vst [vmem:[#allocation58_spill] sm:$0xff] %v4554_v36  ;;  %v4560_v58 = vpop.permute.xlu1 %776 }
 0x152   : > { %1018 = vrot.lane.b32.xlu0 %v4044_v12, %s3851_s19  ;;  %6676 = vst [vmem:[#allocation59_spill] sm:$0xff] %v4560_v58  ;;  %v1084_v12 = vrot.slane %v4093_v2, 5 }
 0x153   : > { %1034 = vrot.lane.b32.xlu1 %v4102_v9, %s3851_s19 }
 0x154   : > { %v4562_v21 = vpop.permute.xlu0 %778 }
 0x155   : > { %6677 = vst [vmem:[#allocation60_spill] sm:$0xff] %v4562_v21  ;;  %v4568_v5 = vpop.permute.xlu1 %780 }
 0x156   : > { %1050 = vrot.lane.b32.xlu0 %v4143_v34, %s3851_s19  ;;  %6678 = vst [vmem:[#allocation61_spill] sm:$0xff] %v4568_v5 }
 0x157   : > { %1066 = vrot.lane.b32.xlu1 %v4190_v20, %s3851_s19 }
 0x158   : > { %v4570_v3 = vpop.permute.xlu0 %782 }
 0x159   : > { %6679 = vst [vmem:[#allocation62_spill] sm:$0xff] %v4570_v3  ;;  %v4576_v36 = vpop.permute.xlu1 %784 }
 0x15a   : > { %838 = vrot.lane.b32.xlu0 %v4040_v4, %s3848_s7  ;;  %6680 = vst [vmem:[#allocation63_spill] sm:$0xff] %v4576_v36 }
 0x15b   : > { %844 = vrot.lane.b32.xlu1 %v4111_v32, %s3848_s7 }
 0x15c   : > { %v4578_v58 = vpop.permute.xlu0 %786 }
 0x15d   : > { %6681 = vst [vmem:[#allocation64_spill] sm:$0xff] %v4578_v58  ;;  %v4584_v21 = vpop.permute.xlu1 %788 }
 0x15e   : > { %854 = vrot.lane.b32.xlu0 %v4137_v19, %s3848_s7  ;;  %6682 = vst [vmem:[#allocation65_spill] sm:$0xff] %v4584_v21 }
 0x15f   : > { %860 = vrot.lane.b32.xlu1 %v4150_v47, %s3848_s7 }
 0x160   : > { %v4586_v5 = vpop.permute.xlu0 %790 }
 0x161   : > { %6683 = vst [vmem:[#allocation66_spill] sm:$0xff] %v4586_v5  ;;  %v4592_v3 = vpop.permute.xlu1 %792 }
 0x162   : > { %870 = vrot.lane.b32.xlu0 %v4181_v52, %s3848_s7  ;;  %6684 = vst [vmem:[#allocation67_spill] sm:$0xff] %v4592_v3 }
 0x163   : > { %876 = vrot.lane.b32.xlu1 %v4194_v26, %s3848_s7 }
 0x164   : > { %v4594_v36 = vpop.permute.xlu0 %794 }
 0x165   : > { %6685 = vst [vmem:[#allocation68_spill] sm:$0xff] %v4594_v36  ;;  %v4600_v58 = vpop.permute.xlu1 %796 }
 0x166   : > { %886 = vrot.lane.b32.xlu0 %v4036_v62, %s3849_s8  ;;  %6686 = vst [vmem:[#allocation69_spill] sm:$0xff] %v4600_v58 }
 0x167   : > { %892 = vrot.lane.b32.xlu1 %v4093_v2, %s3849_s8 }
 0x168   : > { %v4602_v21 = vpop.permute.xlu0 %798 }
 0x169   : > { %6687 = vst [vmem:[#allocation70_spill] sm:$0xff] %v4602_v21  ;;  %v4608_v5 = vpop.permute.xlu1 %800 }
 0x16a   : > { %902 = vrot.lane.b32.xlu0 %v4040_v4, %s3849_s8  ;;  %6688 = vst [vmem:[#allocation71_spill] sm:$0xff] %v4608_v5 }
 0x16b   : > { %908 = vrot.lane.b32.xlu1 %v4111_v32, %s3849_s8 }
 0x16c   : > { %v4610_v3 = vpop.permute.xlu0 %802 }
 0x16d   : > { %6689 = vst [vmem:[#allocation72_spill] sm:$0xff] %v4610_v3  ;;  %v4616_v36 = vpop.permute.xlu1 %804 }
 0x16e   : > { %918 = vrot.lane.b32.xlu0 %v4137_v19, %s3849_s8  ;;  %6690 = vst [vmem:[#allocation73_spill] sm:$0xff] %v4616_v36 }
 0x16f   : > { %924 = vrot.lane.b32.xlu1 %v4150_v47, %s3849_s8 }
 0x170   : > { %v4618_v58 = vpop.permute.xlu0 %806 }
 0x171   : > { %6691 = vst [vmem:[#allocation74_spill] sm:$0xff] %v4618_v58  ;;  %v4624_v21 = vpop.permute.xlu1 %808 }
 0x172   : > { %934 = vrot.lane.b32.xlu0 %v4181_v52, %s3849_s8  ;;  %6692 = vst [vmem:[#allocation75_spill] sm:$0xff] %v4624_v21 }
 0x173   : > { %940 = vrot.lane.b32.xlu1 %v4194_v26, %s3849_s8 }
 0x174   : > { %v4626_v5 = vpop.permute.xlu0 %810 }
 0x175   : > { %6693 = vst [vmem:[#allocation76_spill] sm:$0xff] %v4626_v5  ;;  %v4632_v3 = vpop.permute.xlu1 %812 }
 0x176   : > { %950 = vrot.lane.b32.xlu0 %v4036_v62, %s3850_s17  ;;  %6694 = vst [vmem:[#allocation77_spill] sm:$0xff] %v4632_v3 }
 0x177   : > { %956 = vrot.lane.b32.xlu1 %v4093_v2, %s3850_s17 }
 0x178   : > { %v4634_v36 = vpop.permute.xlu0 %814 }
 0x179   : > { %6695 = vst [vmem:[#allocation78_spill] sm:$0xff] %v4634_v36  ;;  %v4640_v58 = vpop.permute.xlu1 %816 }
 0x17a   : > { %966 = vrot.lane.b32.xlu0 %v4040_v4, %s3850_s17  ;;  %6696 = vst [vmem:[#allocation79_spill] sm:$0xff] %v4640_v58 }
 0x17b   : > { %972 = vrot.lane.b32.xlu1 %v4111_v32, %s3850_s17 }
 0x17c   : > { %v4642_v21 = vpop.permute.xlu0 %818 }
 0x17d   : > { %6697 = vst [vmem:[#allocation80_spill] sm:$0xff] %v4642_v21  ;;  %v4648_v5 = vpop.permute.xlu1 %820 }
 0x17e   : > { %982 = vrot.lane.b32.xlu0 %v4137_v19, %s3850_s17  ;;  %6698 = vst [vmem:[#allocation81_spill] sm:$0xff] %v4648_v5 }
 0x17f   : > { %988 = vrot.lane.b32.xlu1 %v4150_v47, %s3850_s17 }
 0x180   : > { %v4650_v3 = vpop.permute.xlu0 %822 }
 0x181   : > { %6699 = vst [vmem:[#allocation82_spill] sm:$0xff] %v4650_v3  ;;  %v4656_v36 = vpop.permute.xlu1 %824 }
 0x182   : > { %998 = vrot.lane.b32.xlu0 %v4181_v52, %s3850_s17  ;;  %6700 = vst [vmem:[#allocation83_spill] sm:$0xff] %v4656_v36 }
 0x183   : > { %1004 = vrot.lane.b32.xlu1 %v4194_v26, %s3850_s17 }
 0x184   : > { %v4658_v58 = vpop.permute.xlu0 %826 }
 0x185   : > { %6701 = vst [vmem:[#allocation84_spill] sm:$0xff] %v4658_v58  ;;  %v4664_v21 = vpop.permute.xlu1 %828 }
 0x186   : > { %1014 = vrot.lane.b32.xlu0 %v4036_v62, %s3851_s19  ;;  %6702 = vst [vmem:[#allocation85_spill] sm:$0xff] %v4664_v21 }
 0x187   : > { %1020 = vrot.lane.b32.xlu1 %v4093_v2, %s3851_s19  ;;  %v1087_v2 = vrot.slane %v4038_v1, 4 }
 0x188   : > { %v4666_v5 = vpop.permute.xlu0 %830 }
 0x189   : > { %6703 = vst [vmem:[#allocation86_spill] sm:$0xff] %v4666_v5  ;;  %v4672_v3 = vpop.permute.xlu1 %832 }
 0x18a   : > { %1030 = vrot.lane.b32.xlu0 %v4040_v4, %s3851_s19  ;;  %6704 = vst [vmem:[#allocation87_spill] sm:$0xff] %v4672_v3 }
 0x18b   : > { %1036 = vrot.lane.b32.xlu1 %v4111_v32, %s3851_s19 }
 0x18c   : > { %v4674_v36 = vpop.permute.xlu0 %834 }
 0x18d   : > { %6705 = vst [vmem:[#allocation88_spill] sm:$0xff] %v4674_v36  ;;  %v4680_v58 = vpop.permute.xlu1 %836 }
 0x18e   : > { %1046 = vrot.lane.b32.xlu0 %v4137_v19, %s3851_s19  ;;  %6706 = vst [vmem:[#allocation89_spill] sm:$0xff] %v4680_v58 }
 0x18f   : > { %1052 = vrot.lane.b32.xlu1 %v4150_v47, %s3851_s19 }
 0x190   : > { %v4682_v21 = vpop.permute.xlu0 %840 }
 0x191   : > { %6707 = vst [vmem:[#allocation90_spill] sm:$0xff] %v4682_v21  ;;  %v4688_v5 = vpop.permute.xlu1 %856 }
 0x192   : > { %1062 = vrot.lane.b32.xlu0 %v4181_v52, %s3851_s19  ;;  %6708 = vst [vmem:[#allocation91_spill] sm:$0xff] %v4688_v5 }
 0x193   : > { %1068 = vrot.lane.b32.xlu1 %v4194_v26, %s3851_s19 }
 0x194   : > { %v4690_v3 = vpop.permute.xlu0 %872 }
 0x195   : > { %6709 = vst [vmem:[#allocation92_spill] sm:$0xff] %v4690_v3  ;;  %v4696_v36 = vpop.permute.xlu1 %888 }
 0x196   : > { %846 = vrot.lane.b32.xlu0 %v4052_v22, %s3848_s7  ;;  %6710 = vst [vmem:[#allocation93_spill] sm:$0xff] %v4696_v36 }
 0x197   : > { %862 = vrot.lane.b32.xlu1 %v4152_v48, %s3848_s7 }
 0x198   : > { %v4698_v58 = vpop.permute.xlu0 %904 }
 0x199   : > { %6711 = vst [vmem:[#allocation94_spill] sm:$0xff] %v4698_v58  ;;  %v4704_v21 = vpop.permute.xlu1 %920 }
 0x19a   : > { %878 = vrot.lane.b32.xlu0 %v4198_v31, %s3848_s7  ;;  %6712 = vst [vmem:[#allocation95_spill] sm:$0xff] %v4704_v21 }
 0x19b   : > { %894 = vrot.lane.b32.xlu1 %v4038_v1, %s3849_s8 }
 0x19c   : > { %v4706_v5 = vpop.permute.xlu0 %936 }
 0x19d   : > { %6713 = vst [vmem:[#allocation96_spill] sm:$0xff] %v4706_v5  ;;  %v4712_v3 = vpop.permute.xlu1 %952 }
 0x19e   : > { %910 = vrot.lane.b32.xlu0 %v4052_v22, %s3849_s8  ;;  %6714 = vst [vmem:[#allocation97_spill] sm:$0xff] %v4712_v3 }
 0x19f   : > { %926 = vrot.lane.b32.xlu1 %v4152_v48, %s3849_s8 }
 0x1a0   : > { %v4714_v36 = vpop.permute.xlu0 %968 }
 0x1a1   : > { %6715 = vst [vmem:[#allocation98_spill] sm:$0xff] %v4714_v36  ;;  %v4720_v58 = vpop.permute.xlu1 %984 }
 0x1a2   : > { %942 = vrot.lane.b32.xlu0 %v4198_v31, %s3849_s8  ;;  %6716 = vst [vmem:[#allocation99_spill] sm:$0xff] %v4720_v58 }
 0x1a3   : > { %958 = vrot.lane.b32.xlu1 %v4038_v1, %s3850_s17 }
 0x1a4   : > { %v4722_v21 = vpop.permute.xlu0 %1000 }
 0x1a5   : > { %6717 = vst [vmem:[#allocation100_spill] sm:$0xff] %v4722_v21  ;;  %v4728_v5 = vpop.permute.xlu1 %1016 }
 0x1a6   : > { %974 = vrot.lane.b32.xlu0 %v4052_v22, %s3850_s17  ;;  %6718 = vst [vmem:[#allocation101_spill] sm:$0xff] %v4728_v5 }
 0x1a7   : > { %990 = vrot.lane.b32.xlu1 %v4152_v48, %s3850_s17 }
 0x1a8   : > { %v4730_v3 = vpop.permute.xlu0 %1032 }
 0x1a9   : > { %6719 = vst [vmem:[#allocation102_spill] sm:$0xff] %v4730_v3  ;;  %v4736_v36 = vpop.permute.xlu1 %1048 }
 0x1aa   : > { %1006 = vrot.lane.b32.xlu0 %v4198_v31, %s3850_s17  ;;  %6720 = vst [vmem:[#allocation103_spill] sm:$0xff] %v4736_v36 }
 0x1ab   : > { %1022 = vrot.lane.b32.xlu1 %v4038_v1, %s3851_s19  ;;  %v1425_v1 = vrot.slane %v4194_v26, 5  ;;  %v1317_v26 = vrot.slane %v4156_v51, 3 }
 0x1ac   : > { %v4738_v58 = vpop.permute.xlu0 %1064 }
 0x1ad   : > { %6721 = vst [vmem:[#allocation104_spill] sm:$0xff] %v4738_v58  ;;  %v4744_v21 = vpop.permute.xlu1 %842 }
 0x1ae   : > { %1038 = vrot.lane.b32.xlu0 %v4052_v22, %s3851_s19  ;;  %6722 = vst [vmem:[#allocation105_spill] sm:$0xff] %v4744_v21 }
 0x1af   : > { %1054 = vrot.lane.b32.xlu1 %v4152_v48, %s3851_s19 }
 0x1b0   : > { %v4746_v5 = vpop.permute.xlu0 %858 }
 0x1b1   : > { %6723 = vst [vmem:[#allocation106_spill] sm:$0xff] %v4746_v5  ;;  %v4752_v3 = vpop.permute.xlu1 %874 }
 0x1b2   : > { %1070 = vrot.lane.b32.xlu0 %v4198_v31, %s3851_s19  ;;  %6724 = vst [vmem:[#allocation107_spill] sm:$0xff] %v4752_v3 }
 0x1b3   : > { %848 = vrot.lane.b32.xlu1 %v4076_v16, %s3848_s7 }
 0x1b4   : > { %v4754_v36 = vpop.permute.xlu0 %890 }
 0x1b5   : > { %6725 = vst [vmem:[#allocation108_spill] sm:$0xff] %v4754_v36  ;;  %v4760_v58 = vpop.permute.xlu1 %906 }
 0x1b6   : > { %864 = vrot.lane.b32.xlu0 %v4156_v51, %s3848_s7  ;;  %6726 = vst [vmem:[#allocation109_spill] sm:$0xff] %v4760_v58 }
 0x1b7   : > { %880 = vrot.lane.b32.xlu1 %v4202_v35, %s3848_s7 }
 0x1b8   : > { %v4762_v21 = vpop.permute.xlu0 %922 }
 0x1b9   : > { %6727 = vst [vmem:[#allocation110_spill] sm:$0xff] %v4762_v21  ;;  %v4768_v5 = vpop.permute.xlu1 %938 }
 0x1ba   : > { %896 = vrot.lane.b32.xlu0 %v4046_v14, %s3849_s8  ;;  %6728 = vst [vmem:[#allocation111_spill] sm:$0xff] %v4768_v5 }
 0x1bb   : > { %912 = vrot.lane.b32.xlu1 %v4076_v16, %s3849_s8 }
 0x1bc   : > { %v4770_v3 = vpop.permute.xlu0 %954 }
 0x1bd   : > { %6729 = vst [vmem:[#allocation112_spill] sm:$0xff] %v4770_v3  ;;  %v4776_v36 = vpop.permute.xlu1 %970 }
 0x1be   : > { %928 = vrot.lane.b32.xlu0 %v4156_v51, %s3849_s8  ;;  %6730 = vst [vmem:[#allocation113_spill] sm:$0xff] %v4776_v36 }
 0x1bf   : > { %944 = vrot.lane.b32.xlu1 %v4202_v35, %s3849_s8 }
 0x1c0   : > { %v4778_v58 = vpop.permute.xlu0 %986 }
 0x1c1   : > { %6731 = vst [vmem:[#allocation114_spill] sm:$0xff] %v4778_v58  ;;  %v4784_v21 = vpop.permute.xlu1 %1002 }
 0x1c2   : > { %960 = vrot.lane.b32.xlu0 %v4046_v14, %s3850_s17  ;;  %6732 = vst [vmem:[#allocation115_spill] sm:$0xff] %v4784_v21 }
 0x1c3   : > { %976 = vrot.lane.b32.xlu1 %v4076_v16, %s3850_s17 }
 0x1c4   : > { %v4786_v5 = vpop.permute.xlu0 %1018 }
 0x1c5   : > { %6733 = vst [vmem:[#allocation116_spill] sm:$0xff] %v4786_v5  ;;  %v4792_v3 = vpop.permute.xlu1 %1034 }
 0x1c6   : > { %992 = vrot.lane.b32.xlu0 %v4156_v51, %s3850_s17  ;;  %6734 = vst [vmem:[#allocation117_spill] sm:$0xff] %v4792_v3 }
 0x1c7   : > { %1008 = vrot.lane.b32.xlu1 %v4202_v35, %s3850_s17 }
 0x1c8   : > { %v4794_v36 = vpop.permute.xlu0 %1050 }
 0x1c9   : > { %6735 = vst [vmem:[#allocation118_spill] sm:$0xff] %v4794_v36  ;;  %v4800_v58 = vpop.permute.xlu1 %1066 }
 0x1ca   : > { %1024 = vrot.lane.b32.xlu0 %v4046_v14, %s3851_s19  ;;  %6736 = vst [vmem:[#allocation119_spill] sm:$0xff] %v4800_v58 }
 0x1cb   : > { %1040 = vrot.lane.b32.xlu1 %v4076_v16, %s3851_s19 }
 0x1cc   : > { %v4802_v21 = vpop.permute.xlu0 %838 }
 0x1cd   : > { %6737 = vst [vmem:[#allocation120_spill] sm:$0xff] %v4802_v21  ;;  %v4808_v5 = vpop.permute.xlu1 %844 }
 0x1ce   : > { %1056 = vrot.lane.b32.xlu0 %v4156_v51, %s3851_s19  ;;  %6738 = vst [vmem:[#allocation121_spill] sm:$0xff] %v4808_v5  ;;  %v1101_v51 = vrot.slane %v4272_v40, 6  ;;  %v1209_v40 = vrot.slane %v4124_v46, 1 }
 0x1cf   : > { %1072 = vrot.lane.b32.xlu1 %v4202_v35, %s3851_s19 }
 0x1d0   : > { %v4810_v3 = vpop.permute.xlu0 %854 }
 0x1d1   : > { %6739 = vst [vmem:[#allocation122_spill] sm:$0xff] %v4810_v3  ;;  %v4816_v36 = vpop.permute.xlu1 %860 }
 0x1d2   : > { %850 = vrot.lane.b32.xlu0 %v4113_v33, %s3848_s7  ;;  %6740 = vst [vmem:[#allocation123_spill] sm:$0xff] %v4816_v36 }
 0x1d3   : > { %866 = vrot.lane.b32.xlu1 %v4164_v10, %s3848_s7 }
 0x1d4   : > { %v4818_v58 = vpop.permute.xlu0 %870 }
 0x1d5   : > { %6741 = vst [vmem:[#allocation124_spill] sm:$0xff] %v4818_v58  ;;  %v4824_v21 = vpop.permute.xlu1 %876 }
 0x1d6   : > { %882 = vrot.lane.b32.xlu0 %v4206_v37, %s3848_s7  ;;  %6742 = vst [vmem:[#allocation125_spill] sm:$0xff] %v4824_v21 }
 0x1d7   : > { %898 = vrot.lane.b32.xlu1 %v4097_v23, %s3849_s8 }
 0x1d8   : > { %v4826_v5 = vpop.permute.xlu0 %886 }
 0x1d9   : > { %6743 = vst [vmem:[#allocation126_spill] sm:$0xff] %v4826_v5  ;;  %v4832_v3 = vpop.permute.xlu1 %892 }
 0x1da   : > { %914 = vrot.lane.b32.xlu0 %v4113_v33, %s3849_s8  ;;  %6744 = vst [vmem:[#allocation127_spill] sm:$0xff] %v4832_v3 }
 0x1db   : > { %930 = vrot.lane.b32.xlu1 %v4164_v10, %s3849_s8 }
 0x1dc   : > { %v4834_v36 = vpop.permute.xlu0 %902 }
 0x1dd   : > { %6745 = vst [vmem:[#allocation128_spill] sm:$0xff] %v4834_v36  ;;  %v4840_v58 = vpop.permute.xlu1 %908 }
 0x1de   : > { %946 = vrot.lane.b32.xlu0 %v4206_v37, %s3849_s8  ;;  %6746 = vst [vmem:[#allocation129_spill] sm:$0xff] %v4840_v58 }
 0x1df   : > { %962 = vrot.lane.b32.xlu1 %v4097_v23, %s3850_s17 }
 0x1e0   : > { %v4842_v21 = vpop.permute.xlu0 %918 }
 0x1e1   : > { %6747 = vst [vmem:[#allocation130_spill] sm:$0xff] %v4842_v21  ;;  %v4848_v5 = vpop.permute.xlu1 %924 }
 0x1e2   : > { %978 = vrot.lane.b32.xlu0 %v4113_v33, %s3850_s17  ;;  %6748 = vst [vmem:[#allocation131_spill] sm:$0xff] %v4848_v5 }
 0x1e3   : > { %994 = vrot.lane.b32.xlu1 %v4164_v10, %s3850_s17 }
 0x1e4   : > { %v4850_v3 = vpop.permute.xlu0 %934 }
 0x1e5   : > { %6749 = vst [vmem:[#allocation132_spill] sm:$0xff] %v4850_v3  ;;  %v4856_v36 = vpop.permute.xlu1 %940 }
 0x1e6   : > { %1010 = vrot.lane.b32.xlu0 %v4206_v37, %s3850_s17  ;;  %6750 = vst [vmem:[#allocation133_spill] sm:$0xff] %v4856_v36 }
 0x1e7   : > { %1026 = vrot.lane.b32.xlu1 %v4097_v23, %s3851_s19 }
 0x1e8   : > { %v4858_v58 = vpop.permute.xlu0 %950 }
 0x1e9   : > { %6751 = vst [vmem:[#allocation134_spill] sm:$0xff] %v4858_v58  ;;  %v4864_v21 = vpop.permute.xlu1 %956 }
 0x1ea   : > { %1042 = vrot.lane.b32.xlu0 %v4113_v33, %s3851_s19  ;;  %6752 = vst [vmem:[#allocation135_spill] sm:$0xff] %v4864_v21 }
 0x1eb   : > { %1058 = vrot.lane.b32.xlu1 %v4164_v10, %s3851_s19 }
 0x1ec   : > { %v4866_v5 = vpop.permute.xlu0 %966 }
 0x1ed   : > { %6753 = vst [vmem:[#allocation136_spill] sm:$0xff] %v4866_v5  ;;  %v4872_v3 = vpop.permute.xlu1 %972 }
 0x1ee   : > { %1074 = vrot.lane.b32.xlu0 %v4206_v37, %s3851_s19  ;;  %6754 = vst [vmem:[#allocation137_spill] sm:$0xff] %v4872_v3 }
 0x1ef   : > { %852 = vrot.lane.b32.xlu1 %v4124_v46, %s3848_s7 }
 0x1f0   : > { %v4874_v36 = vpop.permute.xlu0 %982 }
 0x1f1   : > { %6755 = vst [vmem:[#allocation138_spill] sm:$0xff] %v4874_v36  ;;  %v4880_v58 = vpop.permute.xlu1 %988 }
 0x1f2   : > { %868 = vrot.lane.b32.xlu0 %v4170_v7, %s3848_s7  ;;  %6756 = vst [vmem:[#allocation139_spill] sm:$0xff] %v4880_v58 }
 0x1f3   : > { %884 = vrot.lane.b32.xlu1 %v4210_v38, %s3848_s7  ;;  %s3646_s7 = sshll.u32 %s3906_s16, 7 }
 0x1f4   : > { %v4882_v21 = vpop.permute.xlu0 %998 }
 0x1f5   : > { %6757 = vst [vmem:[#allocation140_spill] sm:$0xff] %v4882_v21  ;;  %v4888_v5 = vpop.permute.xlu1 %1004 }
 0x1f6   : > { %900 = vrot.lane.b32.xlu0 %v4105_v29, %s3849_s8  ;;  %6758 = vst [vmem:[#allocation141_spill] sm:$0xff] %v4888_v5 }
 0x1f7   : > { %916 = vrot.lane.b32.xlu1 %v4124_v46, %s3849_s8 }
 0x1f8   : > { %v4890_v3 = vpop.permute.xlu0 %1014 }
 0x1f9   : > { %6759 = vst [vmem:[#allocation142_spill] sm:$0xff] %v4890_v3  ;;  %v4896_v36 = vpop.permute.xlu1 %1020  ;;  %v1078_v3 = vrot.slane %v4091_v63, 7 }
 0x1fa   : > { %932 = vrot.lane.b32.xlu0 %v4170_v7, %s3849_s8  ;;  %6760 = vst [vmem:[#allocation143_spill] sm:$0xff] %v4896_v36  ;;  %v1309_v36 = vrot.slane %v4141_v17, 7  ;;  %v1311_v17 = vrot.slane %v4143_v34, 6  ;;  %v1313_v34 = vrot.slane %v4150_v47, 5 }
 0x1fb   : > { %948 = vrot.lane.b32.xlu1 %v4210_v38, %s3849_s8  ;;  %v1080_v63 = vsel %vm1079_vm1, %v1078_v3, %v4036_v62  ;;  %s188_s8 = scalar_lea.vmem [#allocation6], %s3642_s6 }
 0x1fc   : > { %v4898_v58 = vpop.permute.xlu0 %1030  ;;  %v1310_v3 = vsel %vm1079_vm1, %v1309_v36, %v4137_v19  ;;  %v1315_v36 = vrot.slane %v4152_v48, 4 }
 0x1fd   : > { %6761 = vst [vmem:[#allocation144_spill] sm:$0xff] %v4898_v58  ;;  %v4904_v21 = vpop.permute.xlu1 %1036  ;;  %v1312_v19 = vsel %vm1082_vm2, %v1311_v17, %v1310_v3 }
 0x1fe   : > { %964 = vrot.lane.b32.xlu0 %v4105_v29, %s3850_s17  ;;  %6762 = vst [vmem:[#allocation145_spill] sm:$0xff] %v4904_v21 }
 0x1ff   : > { %980 = vrot.lane.b32.xlu1 %v4124_v46, %s3850_s17 }
 0x200   : > { %v4907_v5 = vpop.permute.xlu0 %1046 }
 0x201   : > { %6763 = vst [vmem:[#allocation146_spill] sm:$0xff] %v4907_v5  ;;  %v4915_v58 = vpop.permute.xlu1 %1052  ;;  %v1199_v5 = vrot.slane %v4102_v9, 6  ;;  %v1083_v9 = vsel %vm1082_vm2, %v1081_v15, %v1080_v63  ;;  %v1099_v63 = vrot.slane %v4298_v50, 7  ;;  %v1427_v50 = vrot.slane %v4198_v31, 4 }
 0x202   : > { %996 = vrot.lane.b32.xlu0 %v4170_v7, %s3850_s17  ;;  %6764 = vst [vmem:[#allocation147_spill] sm:$0xff] %v4915_v58  ;;  %v1421_v58 = vrot.slane %v4186_v59, 7  ;;  %v1423_v59 = vrot.slane %v4190_v20, 6 }
 0x203   : > { %1012 = vrot.lane.b32.xlu1 %v4210_v38, %s3850_s17  ;;  %v1200_v4 = vsel %vm1082_vm2, %v1199_v5, %v1198_v27  ;;  %v1203_v5 = vrot.slane %v4052_v22, 4  ;;  %s3564_s17 = sshll.u32 %s188_s8, 4  ;;  %s3565_s17 = int_to_ptr.vmem [resolvable:$true] %s3564_s17 }
 0x204   : > { %v4921_v21 = vpop.permute.xlu0 %1062  ;;  %v1422_v15 = vsel %vm1079_vm1, %v1421_v58, %v4181_v52  ;;  %v1090_v52 = vrot.slane %v4046_v14, 3  ;;  %v1314_v58 = vsel %vm1085_vm3, %v1313_v34, %v1312_v19  ;;  %v1207_v34 = vrot.slane %v4113_v33, 2 }
 0x205   : > { %6765 = vst [vmem:[#allocation148_spill] sm:$0xff] %v4921_v21  ;;  %v4934_v62 = vpop.permute.xlu1 %1068  ;;  %v1201_v21 = vrot.slane %v4111_v32, 5  ;;  %v1086_v32 = vsel %vm1085_vm3, %v1084_v12, %v1083_v9  ;;  %v1424_v22 = vsel %vm1082_vm2, %v1423_v59, %v1422_v15  ;;  %v1316_v12 = vsel %vm1088_vm4, %v1315_v36, %v1314_v58 }
 0x206   : > { %1028 = vrot.lane.b32.xlu0 %v4105_v29, %s3851_s19  ;;  %v1089_v17 = vsel %vm1088_vm4, %v1087_v2, %v1086_v32  ;;  %v1426_v3 = vsel %vm1085_vm3, %v1425_v1, %v1424_v22  ;;  %v1100_v9 = vsel %vm1079_vm1, %v1099_v63, %v4266_v39  ;;  %v1319_v2 = vrot.slane %v4164_v10, 2 }
 0x207   : > { %1044 = vrot.lane.b32.xlu1 %v4124_v46, %s3851_s19  ;;  %v1202_v20 = vsel %vm1085_vm3, %v1201_v21, %v1200_v4  ;;  %v1205_v21 = vrot.slane %v4076_v16, 3  ;;  %v1093_v4 = vrot.slane %v4097_v23, 2  ;;  %v1092_v16 = vsel %vm1091_vm5, %v1090_v52, %v1089_v17 }
 0x208   : > { %v4941_v24 = vpop.permute.xlu0 %846  ;;  %v1204_v48 = vsel %vm1088_vm4, %v1203_v5, %v1202_v20  ;;  %v1429_v19 = vrot.slane %v4202_v35, 3  ;;  %v1103_v15 = vrot.slane %v4304_v53, 5  ;;  %v1318_v39 = vsel %vm1091_vm5, %v1317_v26, %v1316_v12 }
 0x209   : > { %v4953_v47 = vpop.permute.xlu1 %862  ;;  %v1206_v31 = vsel %vm1091_vm5, %v1205_v21, %v1204_v48  ;;  %v1428_v23 = vsel %vm1088_vm4, %v1427_v50, %v1426_v3  ;;  %v1102_v33 = vsel %vm1082_vm2, %v1101_v51, %v1100_v9  ;;  %v1096_v5 = vrot.slane %v4105_v29, 1 }
 0x20a   : > { %1060 = vrot.lane.b32.xlu0 %v4170_v7, %s3851_s19  ;;  %v1095_v20 = vsel %vm1094_vm6, %v1093_v4, %v1092_v16  ;;  %v1208_v10 = vsel %vm1094_vm6, %v1207_v34, %v1206_v31  ;;  %v1321_v35 = vrot.slane %v4170_v7, 1  ;;  %v1431_v53 = vrot.slane %v4206_v37, 2 }
 0x20b   : > { %1076 = vrot.lane.b32.xlu1 %v4210_v38, %s3851_s19  ;;  %v1211_v1 = vrot.slane %v4288_v44, 7  ;;  %v1320_v63 = vsel %vm1094_vm6, %v1319_v2, %v1318_v39  ;;  %v1430_v52 = vsel %vm1091_vm5, %v1429_v19, %v1428_v23  ;;  %v1104_v29 = vsel %vm1085_vm3, %v1103_v15, %v1102_v33  ;;  %v6769_v19 = vld [vmem:[#allocation21_spill] sm:$0xff]  ;;  %v6770_v15 = vld [vmem:[#allocation28_spill] sm:$0xff] }
 0x20c   : > { %v4962_v27 = vpop.permute.xlu0 %878  ;;  %v1213_v46 = vrot.slane %v4314_v56, 6  ;;  %v1323_v58 = vrot.slane %v4336_v6, 7  ;;  %v1105_v7 = vrot.slane %v4274_v41, 4  ;;  %v1435_v37 = vrot.slane %v4368_v30, 7  ;;  %v6771_v33 = vld [vmem:[#allocation13_spill] sm:$0xff] }
 0x20d   : > { %v4971_v14 = vpop.permute.xlu1 %894  ;;  %v5011_v17 = vsel %vm1097_vm7, %v1096_v5, %v1095_v20  ;;  %v5014_v44 = vsel %vm1097_vm7, %v1209_v40, %v1208_v10  ;;  %v1107_v21 = vrot.slane %v4280_v42, 3  ;;  %v5018_v48 = vsel %vm1097_vm7, %v1321_v35, %v1320_v63  ;;  %v6772_v40 = vld [vmem:[#allocation27_spill] sm:$0xff]  ;;  %v6773_v35 = vld [vmem:[#allocation17_spill] sm:$0xff] }
 0x20e   : > { %6766 = vst [vmem:[#allocation149_spill] sm:$0xff] %v5011_v17  ;;  %6767 = vst [vmem:[#allocation150_spill] sm:$0xff] %v5014_v44  ;;  %v5021_v56 = vsel %vm1094_vm6, %v1431_v53, %v1430_v52  ;;  %v1212_v41 = vsel %vm1079_vm1, %v1211_v1, %v4282_v43  ;;  %v1106_v30 = vsel %vm1088_vm4, %v1105_v7, %v1104_v29  ;;  %v1215_v50 = vrot.slane %v4320_v57, 5  ;;  %v6774_v1 = vld [vmem:[#allocation22_spill] sm:$0xff]  ;;  %v6824_v6 = vld [vmem:[#allocation45_spill] sm:$0xff] }
 0x20f   : > { %6768 = vst [vmem:[#allocation151_spill] sm:$0xff] %v5018_v48  ;;  %v1325_v12 = vrot.slane %v4338_v11, 6  ;;  %v1214_v42 = vsel %vm1082_vm2, %v1213_v46, %v1212_v41  ;;  %v1324_v3 = vsel %vm1079_vm1, %v1323_v58, %v4330_v61  ;;  %v1437_v9 = vrot.slane %v4370_v8, 6  ;;  %v6775_v58 = vld [vmem:[#allocation29_spill] sm:$0xff] }
 0x210   : > { %v4980_v59 = vpop.permute.xlu0 %910  ;;  %v1113_v4 = vrot.slane %v4400_v25, 7  ;;  %v1217_v34 = vrot.slane %v4290_v45, 4  ;;  %v1109_v43 = vrot.slane %v4306_v54, 2  ;;  %v1436_v57 = vsel %vm1079_vm1, %v1435_v37, %v4362_v28  ;;  %v6776_v37 = vld [vmem:[#allocation35_spill] sm:$0xff] }
 0x211   : > { %v4989_v32 = vpop.permute.xlu1 %926  ;;  %v1225_v11 = vrot.slane %v4432_v0, 7  ;;  %v1219_v51 = vrot.slane %v4296_v49, 3  ;;  %v1108_v31 = vsel %vm1091_vm5, %v1107_v21, %v1106_v30  ;;  %v1327_v61 = vrot.slane %v4344_v18, 5  ;;  %v6778_v30 = vld [vmem:[#allocation11_spill] sm:$0xff] }
 0x212   : > { %v1216_v25 = vsel %vm1085_vm3, %v1215_v50, %v1214_v42  ;;  %v1326_v2 = vsel %vm1082_vm2, %v1325_v12, %v1324_v3  ;;  %v1439_v45 = vrot.slane %v4376_v13, 5  ;;  %v1115_v54 = vrot.slane %v4402_v60, 6  ;;  %v6779_v12 = vld [vmem:[#allocation14_spill] sm:$0xff] }
 0x213   : > { %v1111_v28 = vrot.slane %v4312_v55, 1  ;;  %v1438_v0 = vsel %vm1082_vm2, %v1437_v9, %v1436_v57  ;;  %v1114_v49 = vsel %vm1079_vm1, %v1113_v4, %v6769_v19  ;;  %v1227_v39 = vrot.slane %v6770_v15, 6  ;;  %v6784_v19 = vld [vmem:[#allocation12_spill] sm:$0xff]  ;;  %v6785_v15 = vld [vmem:[#allocation15_spill] sm:$0xff] }
 0x214   : > { %v4998_v36 = vpop.permute.xlu0 %942  ;;  %v1110_v23 = vsel %vm1094_vm6, %v1109_v43, %v1108_v31  ;;  %v1329_v5 = vrot.slane %v6771_v33, 4  ;;  %v1226_v13 = vsel %vm1079_vm1, %v1225_v11, %v6772_v40  ;;  %v3852_v20 = vmov 1934713408   ;;  %v6780_v43 = vld [vmem:[#allocation18_spill] sm:$0xff]  ;;  %v6781_v11 = vld [vmem:[#allocation23_spill] sm:$0xff] }
 0x215   : > { %v5006_v22 = vpop.permute.xlu1 %958  ;;  %v5063_v60 = vunpack.c.l.s4 %v3852_v20  ;;  %v1218_v55 = vsel %vm1088_vm4, %v1217_v34, %v1216_v25  ;;  %v1328_v10 = vsel %vm1085_vm3, %v1327_v61, %v1326_v2  ;;  %v1441_v53 = vrot.slane %v6773_v35, 4  ;;  %v6782_v2 = vld [vmem:[#allocation30_spill] sm:$0xff] }
 0x216   : > { %v1117_v63 = vrot.slane %v6774_v1, 5  ;;  %v1440_v29 = vsel %vm1085_vm3, %v1439_v45, %v1438_v0  ;;  %v1116_v46 = vsel %vm1082_vm2, %v1115_v54, %v1114_v49  ;;  %v1229_v7 = vrot.slane %v6775_v58, 5  ;;  %v6783_v54 = vld [vmem:[#allocation36_spill] sm:$0xff] }
 0x217   : > { %v1337_v21 = vrot.slane %v6776_v37, 7  ;;  %v5076_v41 = vsel %vm1097_vm7, %v1111_v28, %v1110_v23  ;;  %v1221_v50 = vrot.slane %v6778_v30, 2  ;;  %v1331_v42 = vrot.slane %v6779_v12, 3  ;;  %v6786_v23 = vld [vmem:[#allocation34_spill] sm:$0xff] }
 0x218   : > { %v5024_v26 = vpop.permute.xlu0 %974  ;;  %6777 = vst [vmem:[#allocation21_spill] sm:$0xff] %v5076_v41  ;;  %v1228_v3 = vsel %vm1082_vm2, %v1227_v39, %v1226_v13  ;;  %v1220_v4 = vsel %vm1091_vm5, %v1219_v51, %v1218_v55  ;;  %v1330_v34 = vsel %vm1088_vm4, %v1329_v5, %v1328_v10  ;;  %v1443_v57 = vrot.slane %v6780_v43, 3  ;;  %v6787_v13 = vld [vmem:[#allocation19_spill] sm:$0xff]  ;;  %v6788_v55 = vld [vmem:[#allocation24_spill] sm:$0xff]  ;;  %v6821_v43 = vld [vmem:[#allocation54_spill] sm:$0xff] }
 0x219   : > { %v5036_v16 = vpop.permute.xlu1 %990  ;;  %v1119_v31 = vrot.slane %v6781_v11, 4  ;;  %v1442_v61 = vsel %vm1088_vm4, %v1441_v53, %v1440_v29  ;;  %v1118_v25 = vsel %vm1085_vm3, %v1117_v63, %v1116_v46  ;;  %v1231_v45 = vrot.slane %v6782_v2, 4  ;;  %v6790_v63 = vld [vmem:[#allocation31_spill] sm:$0xff]  ;;  %v6791_v46 = vld [vmem:[#allocation37_spill] sm:$0xff] }
 0x21a   : > { %v1339_v28 = vrot.slane %v6783_v54, 6  ;;  %v1223_v49 = vrot.slane %v6784_v19, 1  ;;  %v1333_v51 = vrot.slane %v6785_v15, 2  ;;  %v1230_v39 = vsel %vm1085_vm3, %v1229_v7, %v1228_v3  ;;  %v6801_v15 = vld [vmem:[#allocation52_spill] sm:$0xff] }
 0x21b   : > { %v1338_v33 = vsel %vm1079_vm1, %v1337_v21, %v6786_v23  ;;  %v1222_v5 = vsel %vm1094_vm6, %v1221_v50, %v1220_v4  ;;  %v1332_v40 = vsel %vm1091_vm5, %v1331_v42, %v1330_v34  ;;  %v1445_v20 = vrot.slane %v6787_v13, 2  ;;  %v6792_v21 = vld [vmem:[#allocation51_spill] sm:$0xff]  ;;  %v6796_v34 = vld [vmem:[#allocation16_spill] sm:$0xff] }
 0x21c   : > { %v5046_v8 = vpop.permute.xlu0 %1006  ;;  %v1121_v10 = vrot.slane %v6788_v55, 3  ;;  %v1444_v53 = vsel %vm1091_vm5, %v1443_v57, %v1442_v61  ;;  %v1120_v1 = vsel %vm1088_vm4, %v1119_v31, %v1118_v25  ;;  %v1233_v29 = vrot.slane %v6790_v63, 3  ;;  %v6793_v50 = vld [vmem:[#allocation59_spill] sm:$0xff]  ;;  %v6797_v57 = vld [vmem:[#allocation25_spill] sm:$0xff]  ;;  %v6798_v25 = vld [vmem:[#allocation32_spill] sm:$0xff] }
 0x21d   : > { %v5057_v18 = vpop.permute.xlu1 %1022  ;;  %v1341_v58 = vrot.slane %v6791_v46, 5  ;;  %v1232_v7 = vsel %vm1088_vm4, %v1231_v45, %v1230_v39  ;;  %v1340_v37 = vsel %vm1082_vm2, %v1339_v28, %v1338_v33  ;;  %v1127_v30 = vrot.slane %v6792_v21, 7  ;;  %v6799_v45 = vld [vmem:[#allocation38_spill] sm:$0xff]  ;;  %v6802_v39 = vld [vmem:[#allocation60_spill] sm:$0xff]  ;;  %v6803_v33 = vld [vmem:[#allocation43_spill] sm:$0xff] }
 0x21e   : > { %v1239_v12 = vrot.slane %v6793_v50, 7  ;;  %v5115_v3 = vsel %vm1097_vm7, %v1223_v49, %v1222_v5  ;;  %v5118_v4 = vsel %vm1094_vm6, %v1333_v51, %v1332_v40  ;;  %v1123_v11 = vrot.slane %v6797_v57, 2  ;;  %v6804_v40 = vld [vmem:[#allocation50_spill] sm:$0xff]  ;;  %v6811_v57 = vld [vmem:[#allocation53_spill] sm:$0xff]  ;;  %v6827_v46 = vld [vmem:[#allocation40_spill] sm:$0xff] }
 0x21f   : > { %6795 = vst [vmem:[#allocation27_spill] sm:$0xff] %v5115_v3  ;;  %v5123_v31 = vsel %vm1094_vm6, %v1445_v20, %v1444_v53  ;;  %v1122_v61 = vsel %vm1091_vm5, %v1121_v10, %v1120_v1  ;;  %v1235_v2 = vrot.slane %v6798_v25, 2  ;;  %v1343_v54 = vrot.slane %v6799_v45, 4  ;;  %v6805_v20 = vld [vmem:[#allocation58_spill] sm:$0xff]  ;;  %v6806_v10 = vld [vmem:[#allocation67_spill] sm:$0xff]  ;;  %v6812_v25 = vld [vmem:[#allocation61_spill] sm:$0xff] }
 0x220   : > { %v5069_v52 = vpop.permute.xlu0 %1038  ;;  %v1234_v19 = vsel %vm1091_vm5, %v1233_v29, %v1232_v7  ;;  %v1342_v49 = vsel %vm1085_vm3, %v1341_v58, %v1340_v37  ;;  %v1129_v51 = vrot.slane %v6801_v15, 6  ;;  %v1241_v23 = vrot.slane %v6802_v39, 6  ;;  %v6808_v29 = vld [vmem:[#allocation26_spill] sm:$0xff]  ;;  %v6809_v58 = vld [vmem:[#allocation39_spill] sm:$0xff]  ;;  %v6814_v39 = vld [vmem:[#allocation44_spill] sm:$0xff] }
 0x221   : > { %v5081_v9 = vpop.permute.xlu1 %1054  ;;  %v1449_v5 = vrot.slane %v6803_v33, 7  ;;  %v1128_v13 = vsel %vm1079_vm1, %v1127_v30, %v6804_v40  ;;  %v1240_v55 = vsel %vm1079_vm1, %v1239_v12, %v6805_v20  ;;  %v1351_v53 = vrot.slane %v6806_v10, 7  ;;  %v6810_v37 = vld [vmem:[#allocation75_spill] sm:$0xff]  ;;  %v6815_v40 = vld [vmem:[#allocation68_spill] sm:$0xff]  ;;  %v6816_v10 = vld [vmem:[#allocation33_spill] sm:$0xff] }
 0x222   : > { %v5143_v63 = vsel %vm1094_vm6, %v1123_v11, %v1122_v61  ;;  %v1345_v7 = vrot.slane %v6809_v58, 3  ;;  %v1463_v21 = vrot.slane %v6810_v37, 7  ;;  %v5149_v50 = vsel %vm1094_vm6, %v1235_v2, %v1234_v19  ;;  %v6817_v2 = vld [vmem:[#allocation42_spill] sm:$0xff]  ;;  %v6819_v37 = vld [vmem:[#allocation76_spill] sm:$0xff] }
 0x223   : > { %v1344_v30 = vsel %vm1088_vm4, %v1343_v54, %v1342_v49  ;;  %v1131_v12 = vrot.slane %v6811_v57, 5  ;;  %v1243_v45 = vrot.slane %v6812_v25, 5  ;;  %v1451_v11 = vrot.slane %v6814_v39, 6  ;;  %v6818_v54 = vld [vmem:[#allocation66_spill] sm:$0xff] }
 0x224   : > { %v5091_v0 = vpop.permute.xlu0 %1070  ;;  %v1130_v61 = vsel %vm1082_vm2, %v1129_v51, %v1128_v13  ;;  %v1242_v33 = vsel %vm1082_vm2, %v1241_v23, %v1240_v55  ;;  %v1353_v20 = vrot.slane %v6815_v40, 6  ;;  %v1450_v19 = vsel %vm1079_vm1, %v1449_v5, %v6817_v2  ;;  %v6822_v13 = vld [vmem:[#allocation62_spill] sm:$0xff] }
 0x225   : > { %v5102_v35 = vpop.permute.xlu1 %848  ;;  %v1352_v49 = vsel %vm1079_vm1, %v1351_v53, %v6818_v54  ;;  %v1465_v57 = vrot.slane %v6819_v37, 6  ;;  %v1346_v39 = vsel %vm1091_vm5, %v1345_v7, %v1344_v30  ;;  %v1133_v51 = vrot.slane %v6821_v43, 4  ;;  %v6823_v55 = vld [vmem:[#allocation74_spill] sm:$0xff]  ;;  %v6825_v53 = vld [vmem:[#allocation69_spill] sm:$0xff] }
 0x226   : > { %6789 = vst [vmem:[#allocation28_spill] sm:$0xff] %v5102_v35  ;;  %v1245_v23 = vrot.slane %v6822_v13, 4  ;;  %v1464_v40 = vsel %vm1079_vm1, %v1463_v21, %v6823_v55  ;;  %v1453_v58 = vrot.slane %v6824_v6, 5  ;;  %v1132_v5 = vsel %vm1085_vm3, %v1131_v12, %v1130_v61  ;;  %v6828_v30 = vld [vmem:[#allocation77_spill] sm:$0xff]  ;;  %v6830_v55 = vld [vmem:[#allocation63_spill] sm:$0xff] }
 0x227   : > { %v1244_v2 = vsel %vm1085_vm3, %v1243_v45, %v1242_v33  ;;  %v1355_v54 = vrot.slane %v6825_v53, 5  ;;  %v1452_v7 = vsel %vm1082_vm2, %v1451_v11, %v1450_v19  ;;  %v1354_v43 = vsel %vm1082_vm2, %v1353_v20, %v1352_v49  ;;  %v6831_v61 = vld [vmem:[#allocation83_spill] sm:$0xff]  ;;  %v6833_v53 = vld [vmem:[#allocation46_spill] sm:$0xff] }
 0x228   : > { %v5112_v42 = vpop.permute.xlu0 %864  ;;  %v1467_v13 = vrot.slane %v6828_v30, 5  ;;  %v1247_v6 = vrot.slane %v6830_v55, 3  ;;  %v1466_v12 = vsel %vm1082_vm2, %v1465_v57, %v1464_v40  ;;  %v1141_v45 = vrot.slane %v6831_v61, 7  ;;  %v6834_v19 = vld [vmem:[#allocation70_spill] sm:$0xff]  ;;  %v6835_v30 = vld [vmem:[#allocation47_spill] sm:$0xff]  ;;  %v6838_v61 = vld [vmem:[#allocation56_spill] sm:$0xff] }
 0x229   : > { %6794 = vst [vmem:[#allocation13_spill] sm:$0xff] %v5112_v42  ;;  %v5128_v28 = vpop.permute.xlu1 %880  ;;  %v1246_v11 = vsel %vm1088_vm4, %v1245_v23, %v1244_v2  ;;  %v1357_v20 = vrot.slane %v6834_v19, 4  ;;  %v1454_v49 = vsel %vm1085_vm3, %v1453_v58, %v1452_v7  ;;  %v1356_v55 = vsel %vm1085_vm3, %v1355_v54, %v1354_v43  ;;  %v6841_v7 = vld [vmem:[#allocation71_spill] sm:$0xff] }
 0x22a   : > { %6800 = vst [vmem:[#allocation17_spill] sm:$0xff] %v5128_v28  ;;  %v6839_v28 = vld [vmem:[#allocation64_spill] sm:$0xff]  ;;  %v1248_v58 = vsel %vm1091_vm5, %v1247_v6, %v1246_v11  ;;  %v1359_v19 = vrot.slane %v6841_v7, 3  ;;  %v6847_v11 = vld [vmem:[#allocation85_spill] sm:$0xff] }
 0x22b   : > { %v1145_v7 = vrot.slane %v6847_v11, 5 }
 0x22c   : > { %v5140_v1 = vpop.permute.xlu0 %896 }
 0x22d   : > { %6807 = vst [vmem:[#allocation22_spill] sm:$0xff] %v5140_v1  ;;  %v5154_v15 = vpop.permute.xlu1 %912  ;;  %v6836_v1 = vld [vmem:[#allocation78_spill] sm:$0xff] }
 0x22e   : > { %6813 = vst [vmem:[#allocation29_spill] sm:$0xff] %v5154_v15  ;;  %v6829_v15 = vld [vmem:[#allocation55_spill] sm:$0xff]  ;;  %v1469_v57 = vrot.slane %v6836_v1, 4 }
 0x22f   : > { %v1135_v21 = vrot.slane %v6829_v15, 3  ;;  %v1457_v15 = vrot.slane %v6835_v30, 3  ;;  %v6842_v30 = vld [vmem:[#allocation82_spill] sm:$0xff] }
 0x230   : > { %v5166_v25 = vpop.permute.xlu0 %928  ;;  %v1142_v54 = vsel %vm1079_vm1, %v1141_v45, %v6842_v30 }
 0x231   : > { %6820 = vst [vmem:[#allocation35_spill] sm:$0xff] %v5166_v25  ;;  %v5177_v37 = vpop.permute.xlu1 %944  ;;  %v1347_v25 = vrot.slane %v6827_v46, 2  ;;  %v1134_v46 = vsel %vm1088_vm4, %v1133_v51, %v1132_v5  ;;  %v1468_v51 = vsel %vm1085_vm3, %v1467_v13, %v1466_v12  ;;  %v6840_v5 = vld [vmem:[#allocation84_spill] sm:$0xff]  ;;  %v6844_v13 = vld [vmem:[#allocation79_spill] sm:$0xff] }
 0x232   : > { %6826 = vst [vmem:[#allocation11_spill] sm:$0xff] %v5177_v37  ;;  %v1455_v37 = vrot.slane %v6833_v53, 4  ;;  %v1249_v53 = vrot.slane %v6839_v28, 2  ;;  %v1143_v23 = vrot.slane %v6840_v5, 6  ;;  %v1136_v2 = vsel %vm1091_vm5, %v1135_v21, %v1134_v46  ;;  %v6845_v5 = vld [vmem:[#allocation57_spill] sm:$0xff] }
 0x233   : > { %v1358_v28 = vsel %vm1088_vm4, %v1357_v20, %v1356_v55  ;;  %v1471_v12 = vrot.slane %v6844_v13, 3  ;;  %v1139_v42 = vrot.slane %v6845_v5, 1  ;;  %v6846_v21 = vld [vmem:[#allocation65_spill] sm:$0xff]  ;;  %v1470_v6 = vsel %vm1088_vm4, %v1469_v57, %v1468_v51  ;;  %v6850_v5 = vld [vmem:[#allocation80_spill] sm:$0xff] }
 0x234   : > { %v5187_v33 = vpop.permute.xlu0 %960  ;;  %v1456_v43 = vsel %vm1088_vm4, %v1455_v37, %v1454_v49  ;;  %v1251_v46 = vrot.slane %v6846_v21, 1  ;;  %v1250_v37 = vsel %vm1094_vm6, %v1249_v53, %v1248_v58  ;;  %v6849_v49 = vld [vmem:[#allocation72_spill] sm:$0xff]  ;;  %v1144_v20 = vsel %vm1082_vm2, %v1143_v23, %v1142_v54  ;;  %v6851_v21 = vld [vmem:[#allocation41_spill] sm:$0xff] }
 0x235   : > { %6832 = vst [vmem:[#allocation14_spill] sm:$0xff] %v5187_v33  ;;  %v5197_v40 = vpop.permute.xlu1 %976  ;;  %v1137_v33 = vrot.slane %v6838_v61, 2  ;;  %v6843_v61 = vld [vmem:[#allocation48_spill] sm:$0xff]  ;;  %v1361_v30 = vrot.slane %v6849_v49, 2  ;;  %v1348_v55 = vsel %vm1094_vm6, %v1347_v25, %v1346_v39  ;;  %v1360_v13 = vsel %vm1091_vm5, %v1359_v19, %v1358_v28  ;;  %v6856_v39 = vld [vmem:[#allocation73_spill] sm:$0xff] }
 0x236   : > { %6837 = vst [vmem:[#allocation18_spill] sm:$0xff] %v5197_v40  ;;  %v1459_v40 = vrot.slane %v6843_v61, 2  ;;  %v1458_v61 = vsel %vm1091_vm5, %v1457_v15, %v1456_v43  ;;  %v1473_v57 = vrot.slane %v6850_v5, 2  ;;  %v1349_v11 = vrot.slane %v6851_v21, 1  ;;  %v6858_v43 = vld [vmem:[#allocation20_spill] sm:$0xff] }
 0x237   : > { %v1138_v45 = vsel %vm1094_vm6, %v1137_v33, %v1136_v2  ;;  %v1472_v53 = vsel %vm1091_vm5, %v1471_v12, %v1470_v6  ;;  %v6853_v2 = vld [vmem:[#allocation86_spill] sm:$0xff]  ;;  %v5238_v25 = vsel %vm1097_vm7, %v1251_v46, %v1250_v37  ;;  %v1363_v15 = vrot.slane %v6856_v39, 1  ;;  %v6859_v6 = vld [vmem:[#allocation81_spill] sm:$0xff] }
 0x238   : > { %v5208_v1 = vpop.permute.xlu0 %992  ;;  %v1147_v58 = vrot.slane %v6853_v2, 4  ;;  %v5235_v23 = vsel %vm1097_vm7, %v1139_v42, %v1138_v45  ;;  %6855 = vst [vmem:[#allocation36_spill] sm:$0xff] %v5238_v25  ;;  %v1146_v19 = vsel %vm1085_vm3, %v1145_v7, %v1144_v20  ;;  %v1447_v28 = vrot.slane %v6858_v43, 1  ;;  %v6864_v20 = vld [vmem:[#allocation87_spill] sm:$0xff] }
 0x239   : > { %v5218_v35 = vpop.permute.xlu1 %1008  ;;  %6854 = vst [vmem:[#allocation30_spill] sm:$0xff] %v5235_v23  ;;  %v1362_v12 = vsel %vm1094_vm6, %v1361_v30, %v1360_v13  ;;  %v1475_v49 = vrot.slane %v6859_v6, 1  ;;  %v6860_v42 = vrot.slane %v6808_v29, 1  ;;  %v6862_v45 = vrot.slane %v6816_v10, 1 }
 0x23a   : > { %6848 = vst [vmem:[#allocation23_spill] sm:$0xff] %v5218_v35  ;;  %v6852_v35 = vld [vmem:[#allocation49_spill] sm:$0xff]  ;;  %v1474_v37 = vsel %vm1094_vm6, %v1473_v57, %v1472_v53  ;;  %v5265_v30 = vsel %vm1097_vm7, %v1349_v11, %v1348_v55  ;;  %v1581_v29 = vcombine.low %v5076_v41, %v5235_v23  ;;  %v1148_v10 = vsel %vm1088_vm4, %v1147_v58, %v1146_v19  ;;  %v6909_v41 = vld [vmem:[#allocation104_spill] sm:$0xff] }
 0x23b   : > { %v1461_v33 = vrot.slane %v6852_v35, 1  ;;  %v1460_v35 = vsel %vm1094_vm6, %v1459_v40, %v1458_v61  ;;  %v5252_v46 = vsel %vm1097_vm7, %v6860_v42, %v5143_v63  ;;  %v5258_v7 = vsel %vm1097_vm7, %v6862_v45, %v5149_v50  ;;  %6866 = vst [vmem:[#allocation24_spill] sm:$0xff] %v5265_v30  ;;  %v6910_v23 = vld [vmem:[#allocation105_spill] sm:$0xff] }
 0x23c   : > { %v5228_v51 = vpop.permute.xlu0 %1024  ;;  %6861 = vst [vmem:[#allocation15_spill] sm:$0xff] %v5252_v46  ;;  %6863 = vst [vmem:[#allocation34_spill] sm:$0xff] %v5258_v7  ;;  %v1149_v40 = vrot.slane %v6864_v20, 3  ;;  %v1717_v63 = vcombine.low %v5115_v3, %v5238_v25  ;;  %v6867_v50 = vrot.slane %v4210_v38, 1  ;;  %v5282_v55 = vsel %vm1097_vm7, %v1363_v15, %v1362_v12  ;;  %v6901_v3 = vld [vmem:[#allocation97_spill] sm:$0xff] }
 0x23d   : > { %v5242_v54 = vpop.permute.xlu1 %1040  ;;  %v5279_v5 = vsel %vm1097_vm7, %v1461_v33, %v1460_v35  ;;  %6870 = vst [vmem:[#allocation51_spill] sm:$0xff] %v5282_v55  ;;  %v1633_v21 = vunpack.c.0.s8 %v5063_v60  ;;  %v1565_v11 = vcombine.low %v5011_v17, %v5252_v46  ;;  %v1701_v53 = vcombine.low %v5014_v44, %v5258_v7  ;;  %v6878_v35 = vld [vmem:[#allocation10_spill] sm:$0xff]  ;;  %v6908_v7 = vld [vmem:[#allocation103_spill] sm:$0xff]  ;;  %v6912_v46 = vld [vmem:[#allocation120_spill] sm:$0xff] }
 0x23e   : > { %6857 = vst [vmem:[#allocation12_spill] sm:$0xff] %v5242_v54  ;;  %v5276_v13 = vsel %vm1097_vm7, %v6867_v50, %v5021_v56  ;;  %6869 = vst [vmem:[#allocation37_spill] sm:$0xff] %v5279_v5  ;;  %v5292_v38 = vsel %vm1097_vm7, %v1475_v49, %v1474_v37  ;;  %v6873_v56 = vld [vmem:[#allocation88_spill] sm:$0xff]  ;;  %v6874_v33 = vrot.slane %v6796_v34, 1  ;;  %v5303_v60 = vsel %vm1097_vm7, %v1447_v28, %v5123_v31  ;;  %v6881_v28 = vld [vmem:[#allocation89_spill] sm:$0xff] }
 0x23f   : > { %6868 = vst [vmem:[#allocation31_spill] sm:$0xff] %v5276_v13  ;;  %6872 = vst [vmem:[#allocation16_spill] sm:$0xff] %v5292_v38  ;;  %v1151_v2 = vrot.slane %v6873_v56, 2  ;;  %v1837_v39 = vcombine.low %v5018_v48, %v5265_v30  ;;  %v1150_v15 = vsel %vm1091_vm5, %v1149_v40, %v1148_v10  ;;  %v1973_v43 = vcombine.low %v5276_v13, %v5279_v5  ;;  %v6906_v30 = vld [vmem:[#allocation101_spill] sm:$0xff]  ;;  %v6907_v44 = vld [vmem:[#allocation102_spill] sm:$0xff] }
 0x240   : > { %v5262_v61 = vpop.permute.xlu0 %1056  ;;  %v5299_v58 = vsel %vm1097_vm7, %v6874_v33, %v5118_v4  ;;  %6876 = vst [vmem:[#allocation32_spill] sm:$0xff] %v5303_v60  ;;  %v5313_v12 = vrot.slane %v1581_v29, %v6878_v35  ;;  %v5316_v4 = vrot.slane %v1717_v63, %v6878_v35  ;;  %v1989_v31 = vcombine.low %v5303_v60, %v5292_v38  ;;  %v6887_v29 = vld [vmem:[#allocation9_spill] sm:$0xff]  ;;  %v6899_v60 = vld [vmem:[#allocation95_spill] sm:$0xff]  ;;  %v6900_v38 = vld [vmem:[#allocation96_spill] sm:$0xff] }
 0x241   : > { %6865 = vst [vmem:[#allocation19_spill] sm:$0xff] %v5262_v61  ;;  %v5284_v57 = vpop.permute.xlu1 %1072  ;;  %6875 = vst [vmem:[#allocation25_spill] sm:$0xff] %v5299_v58  ;;  %v1853_v34 = vcombine.low %v5299_v58, %v5282_v55  ;;  %v1153_v6 = vrot.slane %v6881_v28, 1  ;;  %v5326_v42 = vrot.slane %v1565_v11, %v6878_v35  ;;  %v5329_v45 = vrot.slane %v1701_v53, %v6878_v35  ;;  %v6898_v11 = vld [vmem:[#allocation94_spill] sm:$0xff]  ;;  %v6903_v58 = vld [vmem:[#allocation99_spill] sm:$0xff] }
 0x242   : > { %6871 = vst [vmem:[#allocation59_spill] sm:$0xff] %v5284_v57  ;;  %6879 = vst [vmem:[#allocation52_spill] sm:$0xff] %v5313_v12  ;;  %v1152_v37 = vsel %vm1094_vm6, %v1151_v2, %v1150_v15  ;;  %v5333_v20 = vrot.slane %v1837_v39, %v6878_v35  ;;  %v5338_v63 = vsub.s32 %v1633_v21, %v6887_v29  ;;  %v6893_v21 = vld [vmem:[#allocation90_spill] sm:$0xff]  ;;  %v6894_v39 = vld [vmem:[#allocation91_spill] sm:$0xff]  ;;  %v1267_v5 = vrot.slane %v6898_v11, 7 }
 0x243   : > { %6880 = vst [vmem:[#allocation60_spill] sm:$0xff] %v5316_v4  ;;  %6883 = vst [vmem:[#allocation50_spill] sm:$0xff] %v5326_v42  ;;  %v5341_v10 = vrot.slane %v1973_v43, %v6878_v35  ;;  %v5344_v50 = vrot.slane %v1853_v34, %v6878_v35  ;;  %v5351_v56 = vrot.slane %v1989_v31, %v6878_v35  ;;  %v1253_v33 = vrot.slane %v6893_v21, 7  ;;  %v6896_v34 = vld [vmem:[#allocation92_spill] sm:$0xff]  ;;  %v6897_v29 = vld [vmem:[#allocation93_spill] sm:$0xff] }
 0x244   : > { %v5308_v19 = vpop.permute.xlu0 %850  ;;  %6884 = vst [vmem:[#allocation58_spill] sm:$0xff] %v5329_v45  ;;  %6885 = vst [vmem:[#allocation67_spill] sm:$0xff] %v5333_v20  ;;  %v5354_v2 = vsel %vm1097_vm7, %v1153_v6, %v1152_v37  ;;  %v1365_v15 = vrot.slane %v6894_v39, 7  ;;  %v1477_v28 = vrot.slane %v6896_v34, 7  ;;  %v1155_v13 = vrot.slane %v6897_v29, 7  ;;  %v6902_v6 = vld [vmem:[#allocation98_spill] sm:$0xff] }
 0x245   : > { %6877 = vst [vmem:[#allocation38_spill] sm:$0xff] %v5308_v19  ;;  %v5323_v49 = vpop.permute.xlu1 %866  ;;  %6888 = vst [vmem:[#allocation39_spill] sm:$0xff] %v5338_v63  ;;  %v1379_v53 = vrot.slane %v6899_v60, 7  ;;  %v1491_v31 = vrot.slane %v6900_v38, 7  ;;  %v1169_v25 = vrot.slane %v6901_v3, 7  ;;  %v1281_v37 = vrot.slane %v6902_v6, 7 }
 0x246   : > { %6882 = vst [vmem:[#allocation43_spill] sm:$0xff] %v5323_v49  ;;  %6889 = vst [vmem:[#allocation75_spill] sm:$0xff] %v5341_v10  ;;  %v1393_v21 = vrot.slane %v6903_v58, 7  ;;  %v6905_v39 = vld [vmem:[#allocation100_spill] sm:$0xff]  ;;  %v1255_v38 = vrot.slane %v6910_v23, 6  ;;  %v6911_v17 = vld [vmem:[#allocation106_spill] sm:$0xff]  ;;  %v1254_v6 = vsel %vm1079_vm1, %v1253_v33, %v6912_v46 }
 0x247   : > { %6890 = vst [vmem:[#allocation53_spill] sm:$0xff] %v5344_v50  ;;  %6891 = vst [vmem:[#allocation61_spill] sm:$0xff] %v5351_v56  ;;  %v1505_v48 = vrot.slane %v6905_v39, 7  ;;  %v1367_v3 = vrot.slane %v6911_v17, 6  ;;  %v6914_v10 = vld [vmem:[#allocation107_spill] sm:$0xff]  ;;  %v6915_v39 = vld [vmem:[#allocation108_spill] sm:$0xff] }
 0x248   : > { %v5335_v40 = vpop.permute.xlu0 %882  ;;  %6892 = vst [vmem:[#allocation44_spill] sm:$0xff] %v5354_v2  ;;  %v1479_v56 = vrot.slane %v6914_v10, 6  ;;  %v1157_v4 = vrot.slane %v6915_v39, 6  ;;  %v6916_v34 = vld [vmem:[#allocation109_spill] sm:$0xff]  ;;  %v6918_v11 = vld [vmem:[#allocation110_spill] sm:$0xff]  ;;  %v6919_v60 = vld [vmem:[#allocation111_spill] sm:$0xff] }
 0x249   : > { %6886 = vst [vmem:[#allocation26_spill] sm:$0xff] %v5335_v40  ;;  %v5358_v43 = vpop.permute.xlu1 %898  ;;  %v1269_v45 = vrot.slane %v6916_v34, 6  ;;  %v6917_v29 = vld [vmem:[#allocation121_spill] sm:$0xff]  ;;  %v1381_v42 = vrot.slane %v6918_v11, 6  ;;  %v1493_v63 = vrot.slane %v6919_v60, 6  ;;  %v6920_v23 = vld [vmem:[#allocation112_spill] sm:$0xff]  ;;  %v1256_v34 = vsel %vm1082_vm2, %v1255_v38, %v1254_v6 }
 0x24a   : > { %6895 = vst [vmem:[#allocation68_spill] sm:$0xff] %v5358_v43  ;;  %v1257_v12 = vrot.slane %v6917_v29, 5  ;;  %v1171_v20 = vrot.slane %v6920_v23, 6  ;;  %v6921_v17 = vld [vmem:[#allocation113_spill] sm:$0xff]  ;;  %v6923_v46 = vld [vmem:[#allocation114_spill] sm:$0xff]  ;;  %v6924_v2 = vld [vmem:[#allocation115_spill] sm:$0xff] }
 0x24b   : > { %v1283_v50 = vrot.slane %v6921_v17, 6  ;;  %v1395_v33 = vrot.slane %v6923_v46, 6  ;;  %v1507_v10 = vrot.slane %v6924_v2, 6  ;;  %v6927_v11 = vld [vmem:[#allocation123_spill] sm:$0xff]  ;;  %v6928_v60 = vld [vmem:[#allocation124_spill] sm:$0xff]  ;;  %v6929_v40 = vld [vmem:[#allocation125_spill] sm:$0xff] }
 0x24c   : > { %v5368_v55 = vpop.permute.xlu0 %914  ;;  %v1369_v43 = vrot.slane %v6927_v11, 5  ;;  %v1478_v23 = vsel %vm1079_vm1, %v1477_v28, %v6928_v60  ;;  %v1481_v17 = vrot.slane %v6929_v40, 5  ;;  %v6932_v19 = vld [vmem:[#allocation118_spill] sm:$0xff]  ;;  %v6933_v57 = vld [vmem:[#allocation119_spill] sm:$0xff]  ;;  %v5407_v38 = vsel %vm1085_vm3, %v1257_v12, %v1256_v34  ;;  %v6936_v61 = vld [vmem:[#allocation128_spill] sm:$0xff] }
 0x24d   : > { %6904 = vst [vmem:[#allocation33_spill] sm:$0xff] %v5368_v55  ;;  %v5379_v58 = vpop.permute.xlu1 %930  ;;  %v6926_v55 = vld [vmem:[#allocation122_spill] sm:$0xff]  ;;  %v1409_v2 = vrot.slane %v6932_v19, 6  ;;  %v1268_v28 = vsel %vm1079_vm1, %v1267_v5, %v6936_v61  ;;  %v6937_v40 = vld [vmem:[#allocation129_spill] sm:$0xff]  ;;  %v1480_v19 = vsel %vm1082_vm2, %v1479_v56, %v1478_v23  ;;  %v6940_v34 = vld [vmem:[#allocation132_spill] sm:$0xff] }
 0x24e   : > { %6913 = vst [vmem:[#allocation42_spill] sm:$0xff] %v5379_v58  ;;  %v6925_v58 = vld [vmem:[#allocation116_spill] sm:$0xff]  ;;  %v1366_v29 = vsel %vm1079_vm1, %v1365_v15, %v6926_v55  ;;  %v6934_v6 = vld [vmem:[#allocation126_spill] sm:$0xff]  ;;  %v6935_v15 = vld [vmem:[#allocation127_spill] sm:$0xff]  ;;  %v1271_v60 = vrot.slane %v6937_v40, 5  ;;  %v1492_v54 = vsel %vm1079_vm1, %v1491_v31, %v6940_v34 }
 0x24f   : > { %v1185_v39 = vrot.slane %v6925_v58, 6  ;;  %v1521_v58 = vrot.slane %v6933_v57, 6  ;;  %v1156_v55 = vsel %vm1079_vm1, %v1155_v13, %v6934_v6  ;;  %v1159_v11 = vrot.slane %v6935_v15, 5  ;;  %v6939_v57 = vld [vmem:[#allocation130_spill] sm:$0xff]  ;;  %v6941_v61 = vld [vmem:[#allocation131_spill] sm:$0xff]  ;;  %v6942_v15 = vld [vmem:[#allocation133_spill] sm:$0xff] }
 0x250   : > { %v5389_v35 = vpop.permute.xlu0 %946  ;;  %v1380_v12 = vsel %vm1079_vm1, %v1379_v53, %v6939_v57  ;;  %v5427_v6 = vsel %vm1085_vm3, %v1481_v17, %v1480_v19  ;;  %v1383_v5 = vrot.slane %v6941_v61, 5  ;;  %v1495_v40 = vrot.slane %v6942_v15, 5  ;;  %v6943_v53 = vld [vmem:[#allocation134_spill] sm:$0xff]  ;;  %v6944_v31 = vld [vmem:[#allocation135_spill] sm:$0xff]  ;;  %v6945_v34 = vld [vmem:[#allocation136_spill] sm:$0xff] }
 0x251   : > { %6922 = vst [vmem:[#allocation66_spill] sm:$0xff] %v5389_v35  ;;  %v5401_v49 = vpop.permute.xlu1 %962  ;;  %v6931_v35 = vld [vmem:[#allocation117_spill] sm:$0xff]  ;;  %v1158_v56 = vsel %vm1082_vm2, %v1157_v4, %v1156_v55  ;;  %v1173_v23 = vrot.slane %v6944_v31, 5  ;;  %v1494_v19 = vsel %vm1082_vm2, %v1493_v63, %v1492_v54  ;;  %v1282_v4 = vsel %vm1079_vm1, %v1281_v37, %v6945_v34  ;;  %v6948_v61 = vld [vmem:[#allocation139_spill] sm:$0xff] }
 0x252   : > { %6930 = vst [vmem:[#allocation76_spill] sm:$0xff] %v5401_v49  ;;  %v1297_v46 = vrot.slane %v6931_v35, 6  ;;  %v1368_v35 = vsel %vm1082_vm2, %v1367_v3, %v1366_v29  ;;  %v1270_v3 = vsel %vm1082_vm2, %v1269_v45, %v1268_v28  ;;  %v1170_v29 = vsel %vm1079_vm1, %v1169_v25, %v6943_v53  ;;  %v6946_v55 = vld [vmem:[#allocation137_spill] sm:$0xff]  ;;  %v6947_v28 = vld [vmem:[#allocation138_spill] sm:$0xff]  ;;  %v6953_v34 = vld [vmem:[#allocation143_spill] sm:$0xff] }
 0x253   : > { %v5424_v13 = vsel %vm1085_vm3, %v1369_v43, %v1368_v35  ;;  %v1160_v43 = vsel %vm1085_vm3, %v1159_v11, %v1158_v56  ;;  %v1272_v17 = vsel %vm1085_vm3, %v1271_v60, %v1270_v3  ;;  %v1382_v35 = vsel %vm1082_vm2, %v1381_v42, %v1380_v12  ;;  %v6949_v12 = vld [vmem:[#allocation140_spill] sm:$0xff]  ;;  %v6950_v56 = vld [vmem:[#allocation141_spill] sm:$0xff]  ;;  %v6951_v53 = vld [vmem:[#allocation142_spill] sm:$0xff] }
 0x254   : > { %v5415_v49 = vpop.permute.xlu0 %978  ;;  %v1285_v45 = vrot.slane %v6946_v55, 5  ;;  %v1394_v25 = vsel %vm1079_vm1, %v1393_v21, %v6947_v28  ;;  %v1397_v15 = vrot.slane %v6948_v61, 5  ;;  %v1384_v11 = vsel %vm1085_vm3, %v1383_v5, %v1382_v35 }
 0x255   : > { %6938 = vst [vmem:[#allocation54_spill] sm:$0xff] %v5415_v49  ;;  %v5431_v49 = vpop.permute.xlu1 %994  ;;  %v1496_v60 = vsel %vm1085_vm3, %v1495_v40, %v1494_v19  ;;  %v1172_v42 = vsel %vm1082_vm2, %v1171_v20, %v1170_v29  ;;  %v1506_v54 = vsel %vm1079_vm1, %v1505_v48, %v6949_v12  ;;  %v1509_v3 = vrot.slane %v6950_v56, 5  ;;  %v6954_v29 = vld [vmem:[#allocation144_spill] sm:$0xff]  ;;  %v6956_v19 = vld [vmem:[#allocation145_spill] sm:$0xff] }
 0x256   : > { %v1174_v37 = vsel %vm1085_vm3, %v1173_v23, %v1172_v42  ;;  %v6952_v21 = vrot.slane %v6906_v30, 7  ;;  %v1187_v5 = vrot.slane %v6953_v34, 5  ;;  %v1284_v40 = vsel %vm1082_vm2, %v1283_v50, %v1282_v4  ;;  %v6957_v42 = vld [vmem:[#allocation146_spill] sm:$0xff]  ;;  %v6960_v12 = vld [vmem:[#allocation148_spill] sm:$0xff] }
 0x257   : > { %v1396_v20 = vsel %vm1082_vm2, %v1395_v33, %v1394_v25  ;;  %v6955_v48 = vrot.slane %v6907_v44, 7  ;;  %v1299_v23 = vrot.slane %v6956_v19, 5  ;;  %v1286_v28 = vsel %vm1085_vm3, %v1285_v45, %v1284_v40  ;;  %v6959_v44 = vld [vmem:[#allocation147_spill] sm:$0xff] }
 0x258   : > { %v5442_v57 = vpop.permute.xlu0 %1010  ;;  %v1184_v31 = vsel %vm1079_vm1, %v6952_v21, %v6951_v53  ;;  %v1398_v30 = vsel %vm1085_vm3, %v1397_v15, %v1396_v20  ;;  %v1508_v61 = vsel %vm1082_vm2, %v1507_v10, %v1506_v54  ;;  %v6958_v50 = vrot.slane %v6908_v7, 7 }
 0x259   : > { %v5455_v63 = vpop.permute.xlu1 %1026  ;;  %v1296_v35 = vsel %vm1079_vm1, %v6955_v48, %v6954_v29  ;;  %v1186_v4 = vsel %vm1082_vm2, %v1185_v39, %v1184_v31  ;;  %v1411_v25 = vrot.slane %v6959_v44, 5  ;;  %v6961_v56 = vrot.slane %v6909_v41, 7 }
 0x25a   : > { %v1408_v33 = vsel %vm1079_vm1, %v6958_v50, %v6957_v42  ;;  %v1523_v45 = vrot.slane %v4934_v62, 5  ;;  %v1510_v10 = vsel %vm1085_vm3, %v1509_v3, %v1508_v61  ;;  %v1188_v15 = vsel %vm1085_vm3, %v1187_v5, %v1186_v4  ;;  %v6963_v42 = vld [vmem:[#allocation13_spill] sm:$0xff] }
 0x25b   : > { %v1520_v53 = vsel %vm1079_vm1, %v6961_v56, %v6960_v12  ;;  %v1298_v7 = vsel %vm1082_vm2, %v1297_v46, %v1296_v35  ;;  %v1259_v54 = vrot.slane %v4941_v24, 4  ;;  %v1410_v31 = vsel %vm1082_vm2, %v1409_v2, %v1408_v33  ;;  %v6964_v50 = vld [vmem:[#allocation17_spill] sm:$0xff]  ;;  %v6965_v33 = vld [vmem:[#allocation22_spill] sm:$0xff]  ;;  %v6967_v12 = vld [vmem:[#allocation35_spill] sm:$0xff] }
 0x25c   : > { %v5471_v55 = vpop.permute.xlu0 %1042  ;;  %v1300_v39 = vsel %vm1085_vm3, %v1299_v23, %v1298_v7  ;;  %v1371_v41 = vrot.slane %v4953_v47, 4  ;;  %v1483_v34 = vrot.slane %v4962_v27, 4  ;;  %v1522_v62 = vsel %vm1082_vm2, %v1521_v58, %v1520_v53  ;;  %v6962_v23 = vld [vmem:[#allocation28_spill] sm:$0xff]  ;;  %v6968_v56 = vld [vmem:[#allocation11_spill] sm:$0xff] }
 0x25d   : > { %v5487_v21 = vpop.permute.xlu1 %1058  ;;  %v1161_v3 = vrot.slane %v4971_v14, 4  ;;  %v1273_v5 = vrot.slane %v4980_v59, 4  ;;  %v1385_v46 = vrot.slane %v4989_v32, 4  ;;  %v1412_v24 = vsel %vm1085_vm3, %v1411_v25, %v1410_v31  ;;  %v6966_v25 = vld [vmem:[#allocation29_spill] sm:$0xff] }
 0x25e   : > { %v1524_v20 = vsel %vm1085_vm3, %v1523_v45, %v1522_v62  ;;  %v1497_v2 = vrot.slane %v4998_v36, 4  ;;  %v1175_v47 = vrot.slane %v5006_v22, 4  ;;  %v1260_v27 = vsel %vm1088_vm4, %v1259_v54, %v5407_v38  ;;  %v6970_v54 = vld [vmem:[#allocation18_spill] sm:$0xff]  ;;  %v6971_v62 = vld [vmem:[#allocation23_spill] sm:$0xff] }
 0x25f   : > { %v1287_v58 = vrot.slane %v5024_v26, 4  ;;  %v1399_v14 = vrot.slane %v5036_v16, 4  ;;  %v1511_v59 = vrot.slane %v5046_v8, 4  ;;  %v1372_v32 = vsel %vm1088_vm4, %v1371_v41, %v5424_v13 }
 0x260   : > { %v5497_v40 = vpop.permute.xlu0 %1074  ;;  %v1484_v48 = vsel %vm1088_vm4, %v1483_v34, %v5427_v6  ;;  %v1189_v36 = vrot.slane %v5057_v18, 4  ;;  %v1301_v22 = vrot.slane %v5069_v52, 4  ;;  %v1162_v38 = vsel %vm1088_vm4, %v1161_v3, %v1160_v43 }
 0x261   : > { %v5507_v29 = vpop.permute.xlu1 %852  ;;  %v1274_v26 = vsel %vm1088_vm4, %v1273_v5, %v1272_v17  ;;  %v1386_v16 = vsel %vm1088_vm4, %v1385_v46, %v1384_v11  ;;  %v1413_v8 = vrot.slane %v5081_v9, 4  ;;  %v1498_v19 = vsel %vm1088_vm4, %v1497_v2, %v1496_v60 }
 0x262   : > { %v1176_v13 = vsel %vm1088_vm4, %v1175_v47, %v1174_v37  ;;  %v1525_v6 = vrot.slane %v5091_v0, 4  ;;  %v1261_v18 = vrot.slane %v6962_v23, 3  ;;  %v1288_v52 = vsel %vm1088_vm4, %v1287_v58, %v1286_v28  ;;  %v6973_v47 = vld [vmem:[#allocation19_spill] sm:$0xff] }
 0x263   : > { %v1400_v43 = vsel %vm1088_vm4, %v1399_v14, %v1398_v30  ;;  %v1512_v17 = vsel %vm1088_vm4, %v1511_v59, %v1510_v10  ;;  %v1373_v11 = vrot.slane %v6963_v42, 3  ;;  %v1190_v9 = vsel %vm1088_vm4, %v1189_v36, %v1188_v15  ;;  %v6969_v15 = vld [vmem:[#allocation14_spill] sm:$0xff] }
 0x264   : > { %v5520_v35 = vpop.permute.xlu0 %868  ;;  %v1302_v60 = vsel %vm1088_vm4, %v1301_v22, %v1300_v39  ;;  %v1485_v37 = vrot.slane %v6964_v50, 3  ;;  %v1163_v0 = vrot.slane %v6965_v33, 3  ;;  %v1414_v44 = vsel %vm1088_vm4, %v1413_v8, %v1412_v24  ;;  %v6975_v22 = vld [vmem:[#allocation38_spill] sm:$0xff]  ;;  %v6976_v8 = vld [vmem:[#allocation43_spill] sm:$0xff]  ;;  %v6978_v50 = vld [vmem:[#allocation68_spill] sm:$0xff] }
 0x265   : > { %v5530_v61 = vpop.permute.xlu1 %884  ;;  %v1275_v28 = vrot.slane %v6966_v25, 3  ;;  %v1387_v30 = vrot.slane %v6967_v12, 3  ;;  %v1499_v53 = vrot.slane %v6968_v56, 3  ;;  %v1526_v45 = vsel %vm1088_vm4, %v1525_v6, %v1524_v20  ;;  %v6972_v20 = vld [vmem:[#allocation12_spill] sm:$0xff]  ;;  %v6977_v42 = vld [vmem:[#allocation26_spill] sm:$0xff] }
 0x266   : > { %v1262_v10 = vsel %vm1091_vm5, %v1261_v18, %v1260_v27  ;;  %v1177_v7 = vrot.slane %v6969_v15, 3  ;;  %v1289_v39 = vrot.slane %v6970_v54, 3  ;;  %v1374_v41 = vsel %vm1091_vm5, %v1373_v11, %v1372_v32  ;;  %v6974_v32 = vld [vmem:[#allocation59_spill] sm:$0xff]  ;;  %v6981_v12 = vld [vmem:[#allocation66_spill] sm:$0xff] }
 0x267   : > { %v1401_v34 = vrot.slane %v5208_v1, 3  ;;  %v1513_v3 = vrot.slane %v6971_v62, 3  ;;  %v1191_v5 = vrot.slane %v5228_v51, 3  ;;  %v1486_v46 = vsel %vm1091_vm5, %v1485_v37, %v1484_v48  ;;  %v6979_v37 = vld [vmem:[#allocation33_spill] sm:$0xff] }
 0x268   : > { %v5540_v4 = vpop.permute.xlu0 %900  ;;  %v1164_v24 = vsel %vm1091_vm5, %v1163_v0, %v1162_v38  ;;  %v1303_v2 = vrot.slane %v6972_v20, 3  ;;  %v1415_v27 = vrot.slane %v6973_v47, 3  ;;  %v1276_v14 = vsel %vm1091_vm5, %v1275_v28, %v1274_v26  ;;  %v6980_v28 = vld [vmem:[#allocation42_spill] sm:$0xff] }
 0x269   : > { %v5550_v31 = vpop.permute.xlu1 %916  ;;  %v1388_v59 = vsel %vm1091_vm5, %v1387_v30, %v1386_v16  ;;  %v1500_v1 = vsel %vm1091_vm5, %v1499_v53, %v1498_v19  ;;  %v1527_v36 = vrot.slane %v6974_v32, 3  ;;  %v1178_v51 = vsel %vm1091_vm5, %v1177_v7, %v1176_v13  ;;  %v6982_v30 = vld [vmem:[#allocation76_spill] sm:$0xff]  ;;  %v6983_v53 = vld [vmem:[#allocation54_spill] sm:$0xff] }
 0x26a   : > { %v1290_v48 = vsel %vm1091_vm5, %v1289_v39, %v1288_v52  ;;  %v1263_v38 = vrot.slane %v6975_v22, 2  ;;  %v1375_v6 = vrot.slane %v6976_v8, 2  ;;  %v1402_v18 = vsel %vm1091_vm5, %v1401_v34, %v1400_v43 }
 0x26b   : > { %v1514_v26 = vsel %vm1091_vm5, %v1513_v3, %v1512_v17  ;;  %v1192_v16 = vsel %vm1091_vm5, %v1191_v5, %v1190_v9  ;;  %v1487_v19 = vrot.slane %v6977_v42, 2  ;;  %v1304_v11 = vsel %vm1091_vm5, %v1303_v2, %v1302_v60 }
 0x26c   : > { %v5560_v58 = vpop.permute.xlu0 %932  ;;  %v1416_v13 = vsel %vm1091_vm5, %v1415_v27, %v1414_v44  ;;  %v1165_v52 = vrot.slane %v6978_v50, 2  ;;  %v1277_v33 = vrot.slane %v6979_v37, 2  ;;  %v5581_v25 = vsel %vm1091_vm5, %v1527_v36, %v1526_v45 }
 0x26d   : > { %v5570_v23 = vpop.permute.xlu1 %948  ;;  %v1389_v43 = vrot.slane %v6980_v28, 2  ;;  %v1501_v17 = vrot.slane %v6981_v12, 2  ;;  %v1179_v9 = vrot.slane %v6982_v30, 2  ;;  %v1264_v56 = vsel %vm1094_vm6, %v1263_v38, %v1262_v10 }
 0x26e   : > { %v1376_v60 = vsel %vm1094_vm6, %v1375_v6, %v1374_v41  ;;  %v1291_v44 = vrot.slane %v6983_v53, 2  ;;  %v1403_v15 = vrot.slane %v5431_v49, 2  ;;  %v1488_v54 = vsel %vm1094_vm6, %v1487_v19, %v1486_v46 }
 0x26f   : > { %v1515_v45 = vrot.slane %v5442_v57, 2  ;;  %v1193_v39 = vrot.slane %v5455_v63, 2  ;;  %v1305_v34 = vrot.slane %v5471_v55, 2  ;;  %v1166_v62 = vsel %vm1094_vm6, %v1165_v52, %v1164_v24 }
 0x270   : > { %v965_v0 = vpop.permute.xlu0 %964  ;;  %v1278_v3 = vsel %vm1094_vm6, %v1277_v33, %v1276_v14  ;;  %v1417_v10 = vrot.slane %v5487_v21, 2  ;;  %v1390_v20 = vsel %vm1094_vm6, %v1389_v43, %v1388_v59  ;;  %v1502_v49 = vsel %vm1094_vm6, %v1501_v17, %v1500_v1  ;;  %v6985_v43 = vld [vmem:[#allocation10_spill] sm:$0xff] }
 0x271   : > { %v981_v7 = vpop.permute.xlu1 %980  ;;  %v1181_v41 = vrot.slane %v965_v0, 1  ;;  %v1180_v46 = vsel %vm1094_vm6, %v1179_v9, %v1178_v51  ;;  %v1265_v57 = vrot.slane %v5507_v29, 1  ;;  %v1292_v63 = vsel %vm1094_vm6, %v1291_v44, %v1290_v48 }
 0x272   : > { %v1404_v55 = vsel %vm1094_vm6, %v1403_v15, %v1402_v18  ;;  %v1167_v24 = vrot.slane %v5540_v4, 1  ;;  %v1293_v2 = vrot.slane %v981_v7, 1  ;;  %v1516_v21 = vsel %vm1094_vm6, %v1515_v45, %v1514_v26  ;;  %v6984_v26 = vld [vmem:[#allocation44_spill] sm:$0xff] }
 0x273   : > { %v1194_v27 = vsel %vm1094_vm6, %v1193_v39, %v1192_v16  ;;  %v1306_v14 = vsel %vm1094_vm6, %v1305_v34, %v1304_v11  ;;  %v1418_v1 = vsel %vm1094_vm6, %v1417_v10, %v1416_v13  ;;  %v1377_v32 = vrot.slane %v5520_v35, 1 }
 0x274   : > { %v997_v5 = vpop.permute.xlu0 %996  ;;  %v1279_v29 = vrot.slane %v5550_v31, 1  ;;  %v5611_v36 = vsel %vm1097_vm7, %v1181_v41, %v1180_v46  ;;  %v1529_v4 = vrot.slane %v5497_v40, 2  ;;  %v5615_v48 = vsel %vm1097_vm7, %v1265_v57, %v1264_v56  ;;  %v6986_v41 = vld [vmem:[#allocation53_spill] sm:$0xff]  ;;  %v6988_v46 = vld [vmem:[#allocation39_spill] sm:$0xff]  ;;  %v6990_v57 = vld [vmem:[#allocation52_spill] sm:$0xff] }
 0x275   : > { %v1013_v47 = vpop.permute.xlu1 %1012  ;;  %v1405_v59 = vrot.slane %v997_v5, 1  ;;  %v1489_v8 = vrot.slane %v5530_v61, 1  ;;  %v5619_v6 = vsel %vm1097_vm7, %v1167_v24, %v1166_v62  ;;  %v1391_v35 = vrot.slane %v5560_v58, 1  ;;  %v6987_v5 = vld [vmem:[#allocation67_spill] sm:$0xff] }
 0x276   : > { %v1517_v22 = vrot.slane %v1013_v47, 1  ;;  %v5623_v31 = vsel %vm1097_vm7, %v1293_v2, %v1292_v63  ;;  %v1597_v16 = vcombine.low %v6984_v26, %v5611_v36  ;;  %v5634_v61 = vsel %vm1097_vm7, %v1377_v32, %v1376_v60  ;;  %v6992_v2 = vld [vmem:[#allocation58_spill] sm:$0xff]  ;;  %v6993_v47 = vld [vmem:[#allocation60_spill] sm:$0xff] }
 0x277   : > { %v5628_v40 = vsel %vm1097_vm7, %v1405_v59, %v1404_v55  ;;  %v5637_v11 = vsel %vm1097_vm7, %v1279_v29, %v1278_v3  ;;  %v1503_v58 = vrot.slane %v5570_v23, 1  ;;  %v1733_v52 = vcombine.low %v5615_v48, %v5623_v31 }
 0x278   : > { %v1029_v51 = vpop.permute.xlu0 %1028  ;;  %v5645_v37 = vsel %vm1097_vm7, %v1517_v22, %v1516_v21  ;;  %v5651_v28 = vsel %vm1097_vm7, %v1489_v8, %v1488_v54  ;;  %v1869_v23 = vcombine.low %v5634_v61, %v5628_v40  ;;  %v5659_v9 = vsel %vm1097_vm7, %v1391_v35, %v1390_v20  ;;  %v6995_v22 = vld [vmem:[#allocation61_spill] sm:$0xff] }
 0x279   : > { %v1195_v38 = vrot.slane %v1029_v51, 1  ;;  %v1045_v18 = vpop.permute.xlu1 %1044  ;;  %v1605_v56 = vrot.slane %v1597_v16, %v6985_v43  ;;  %v1530_v44 = vsel %vm1094_vm6, %v1529_v4, %v5581_v25  ;;  %v2005_v15 = vcombine.low %v5651_v28, %v5645_v37 }
 0x27a   : > { %v1307_v19 = vrot.slane %v1045_v18, 1  ;;  %v5675_v45 = vsel %vm1097_vm7, %v1503_v58, %v1502_v49  ;;  %v5678_v39 = vrot.slane %v1733_v52, %v6985_v43  ;;  %v1877_v25 = vrot.slane %v1869_v23, %v6985_v43  ;;  %v6989_v49 = vld [vmem:[#allocation50_spill] sm:$0xff] }
 0x27b   : > { %v5631_v42 = vsel %vm1097_vm7, %v1195_v38, %v1194_v27  ;;  %v1901_v20 = vcombine.low %v6987_v5, %v6986_v41  ;;  %v6991_v63 = vcombine.low %v6989_v49, %v6990_v57  ;;  %v6994_v21 = vcombine.low %v6992_v2, %v6993_v47  ;;  %v6996_v38 = vld [vmem:[#allocation75_spill] sm:$0xff] }
 0x27c   : > { %v1613_v13 = vcombine.low %v5619_v6, %v5631_v42  ;;  %v1061_v50 = vpop.permute.xlu0 %1060  ;;  %v5648_v33 = vsel %vm1097_vm7, %v1307_v19, %v1306_v14  ;;  %v5701_v59 = vrot.slane %v2005_v15, %v6985_v43  ;;  %v2037_v8 = vcombine.low %v6996_v38, %v6995_v22 }
 0x27d   : > { %v1419_v0 = vrot.slane %v1061_v50, 1  ;;  %v1749_v17 = vcombine.low %v5637_v11, %v5648_v33  ;;  %v1077_v30 = vpop.permute.xlu1 %1076  ;;  %v1637_v55 = vrot.slane %v6991_v63, %v6988_v46  ;;  %v1773_v27 = vrot.slane %v6994_v21, %v6988_v46 }
 0x27e   : > { %v1621_v12 = vrot.slane %v1613_v13, %v6985_v43  ;;  %v1531_v53 = vrot.slane %v1077_v30, 1  ;;  %v1909_v35 = vrot.slane %v1901_v20, %v6988_v46  ;;  %v1630_v23 = vcombine.high %v6989_v49, %v6990_v57  ;;  %v6998_v20 = vld [vmem:[#allocation149_spill] sm:$0xff] }
 0x27f   : > { %v5663_v60 = vsel %vm1097_vm7, %v1419_v0, %v1418_v1  ;;  %v5670_v7 = vrot.slane %v1749_v17, %v6985_v43  ;;  %v2045_v17 = vrot.slane %v2037_v8, %v6988_v46  ;;  %v1614_v57 = vcombine.high %v5619_v6, %v5631_v42 }
 0x280   : > { %v1885_v54 = vcombine.low %v5659_v9, %v5663_v60  ;;  %v5681_v34 = vsel %vm1097_vm7, %v1531_v53, %v1530_v44  ;;  %v1661_v62 = vcombine.low %v1605_v56, %v1621_v12  ;;  %v1662_v19 = vcombine.high %v1605_v56, %v1621_v12 }
 0x281   : > { %v2021_v10 = vcombine.low %v5675_v45, %v5681_v34  ;;  %v1797_v14 = vcombine.low %v5678_v39, %v5670_v7  ;;  %v1798_v21 = vcombine.high %v5678_v39, %v5670_v7  ;;  %v5749_v7 = vrot.slane %v1614_v57, %v6985_v43 }
 0x282   : > { %v1893_v3 = vrot.slane %v1885_v54, %v6985_v43  ;;  %v1669_v24 = vrot.slane %v1661_v62, %v6988_v46  ;;  %v1676_v53 = vrot.slane %v1662_v19, %v6988_v46  ;;  %v1644_v54 = vrot.slane %v1630_v23, %v6988_v46  ;;  %v7003_v19 = vld [vmem:[#allocation24_spill] sm:$0xff] }
 0x283   : > { %v5704_v1 = vrot.slane %v2021_v10, %v6985_v43  ;;  %v1805_v4 = vrot.slane %v1797_v14, %v6988_v46  ;;  %v1902_v62 = vcombine.high %v6987_v5, %v6986_v41  ;;  %v6997_v10 = vld [vmem:[#allocation15_spill] sm:$0xff]  ;;  %v7000_v41 = vld [vmem:[#allocation21_spill] sm:$0xff]  ;;  %v1598_v14 = vcombine.high %v6984_v26, %v5611_v36 }
 0x284   : > { %v1933_v32 = vcombine.low %v1877_v25, %v1893_v3  ;;  %v1694_v29 = vcombine.high %v1637_v55, %v1669_v24  ;;  %v1693_v51 = vcombine.low %v1637_v55, %v1669_v24  ;;  %v1934_v12 = vcombine.high %v1877_v25, %v1893_v3 }
 0x285   : > { %v2069_v16 = vcombine.low %v5701_v59, %v5704_v1  ;;  %v1829_v50 = vcombine.low %v1773_v27, %v1805_v4  ;;  %v1830_v15 = vcombine.high %v1773_v27, %v1805_v4  ;;  %v1566_v49 = vcombine.high %v6998_v20, %v6997_v10  ;;  %v6999_v27 = vld [vmem:[#allocation30_spill] sm:$0xff] }
 0x286   : > { %v1941_v18 = vrot.slane %v1933_v32, %v6988_v46  ;;  %v2113_v58 = vsel %vm2109_vm8, %v1694_v29, -inf  ;;  %v2110_v13 = vsel %vm2109_vm8, %v1693_v51, -inf  ;;  %v1695_v63 = vcombine.low %v1644_v54, %v1676_v53  ;;  %v7001_v32 = vld [vmem:[#allocation34_spill] sm:$0xff] }
 0x287   : > { %2114 = vmax.xlane.f32.xlu1 %v2113_v58  ;;  %2111 = vmax.xlane.f32.xlu0 %v2110_v13  ;;  %v2077_v0 = vrot.slane %v2069_v16, %v6988_v46  ;;  %v2134_v56 = vsel %vm2109_vm8, %v1829_v50, -inf  ;;  %v5730_v25 = vrot.slane %v1934_v12, %v6988_v46  ;;  %v2137_v55 = vsel %vm2109_vm8, %v1830_v15, -inf  ;;  %v7002_v29 = vld [vmem:[#allocation150_spill] sm:$0xff]  ;;  %v7006_v13 = vld [vmem:[#allocation25_spill] sm:$0xff] }
 0x288   : > { %v1965_v52 = vcombine.low %v1909_v35, %v1941_v18  ;;  %v1966_v24 = vcombine.high %v1909_v35, %v1941_v18  ;;  %v1582_v5 = vcombine.high %v7000_v41, %v6999_v27  ;;  %v1916_v6 = vrot.slane %v1902_v62, %v6988_v46 }
 0x289   : > { %v2101_v44 = vcombine.low %v2045_v17, %v2077_v0  ;;  %v5742_v42 = vrot.slane %v1566_v49, %v6985_v43  ;;  %v1702_v51 = vcombine.high %v7002_v29, %v7001_v32  ;;  %v1766_v4 = vcombine.high %v6992_v2, %v6993_v47  ;;  %v7004_v2 = vld [vmem:[#allocation151_spill] sm:$0xff] }
 0x28a   : > { %v2158_v30 = vsel %vm2109_vm8, %v1965_v52, -inf  ;;  %v1886_v39 = vcombine.high %v5659_v9, %v5663_v60  ;;  %v2116_v36 = vsel %vm2109_vm8, %v1695_v63, -inf  ;;  %v1967_v26 = vcombine.low %v1916_v6, %v5730_v25  ;;  %v7005_v60 = vld [vmem:[#allocation51_spill] sm:$0xff] }
 0x28b   : > { %2159 = vmax.xlane.f32.xlu1 %v2158_v30  ;;  %2135 = vmax.xlane.f32.xlu0 %v2134_v56  ;;  %v2182_v3 = vsel %vm2109_vm8, %v2101_v44, -inf  ;;  %v2161_v8 = vsel %vm2109_vm8, %v1966_v24, -inf  ;;  %v2102_v35 = vcombine.high %v2045_v17, %v2077_v0  ;;  %v1812_v18 = vrot.slane %v1798_v21, %v6988_v46 }
 0x28c   : > { %v2070_v16 = vcombine.high %v5701_v59, %v5704_v1  ;;  %v1838_v47 = vcombine.high %v7004_v2, %v7003_v19  ;;  %v5762_v58 = vrot.slane %v1582_v5, %v6985_v43  ;;  %v5765_v9 = vrot.slane %v1598_v14, %v6985_v43  ;;  %v7011_v14 = vld [vmem:[#allocation37_spill] sm:$0xff] }
 0x28d   : > { %v1854_v50 = vcombine.high %v7006_v13, %v7005_v60  ;;  %v1870_v52 = vcombine.high %v5634_v61, %v5628_v40  ;;  %v1780_v0 = vrot.slane %v1766_v4, %v6988_v46  ;;  %v2038_v59 = vcombine.high %v6996_v38, %v6995_v22  ;;  %v7007_v22 = vld [vmem:[#allocation36_spill] sm:$0xff]  ;;  %v7008_v38 = vld [vmem:[#allocation27_spill] sm:$0xff] }
 0x28e   : > { %v1750_v1 = vcombine.high %v5637_v11, %v5648_v33  ;;  %v5777_v23 = vrot.slane %v1886_v39, %v6985_v43  ;;  %v1696_v17 = vcombine.high %v1644_v54, %v1676_v53  ;;  %v1677_v30 = vcombine.low %v5765_v9, %v5749_v7 }
 0x28f   : > { %2183 = vmax.xlane.f32.xlu1 %v2182_v3  ;;  %2138 = vmax.xlane.f32.xlu0 %v2137_v55  ;;  %v2164_v12 = vsel %vm2109_vm8, %v1967_v26, -inf  ;;  %v2185_v56 = vsel %vm2109_vm8, %v2102_v35, -inf  ;;  %v1831_v40 = vcombine.low %v1780_v0, %v1812_v18  ;;  %v2084_v61 = vrot.slane %v2070_v16, %v6988_v46 }
 0x290   : > { %v5785_v44 = vrot.slane %v1838_v47, %v6985_v43  ;;  %v1718_v11 = vcombine.high %v7008_v38, %v7007_v22  ;;  %v1645_v33 = vcombine.low %v5742_v42, %v5762_v58  ;;  %v5792_v53 = vrot.slane %v1854_v50, %v6985_v43 }
 0x291   : > { %v1734_v15 = vcombine.high %v5615_v48, %v5623_v31  ;;  %v5797_v54 = vrot.slane %v1870_v52, %v6985_v43  ;;  %v2052_v62 = vrot.slane %v2038_v59, %v6988_v46  ;;  %v5801_v10 = vrot.slane %v1750_v1, %v6985_v43 }
 0x292   : > { %v2022_v20 = vcombine.high %v5675_v45, %v5681_v34  ;;  %v2119_v49 = vsel %vm2109_vm8, %v1696_v17, -inf  ;;  %v1968_v57 = vcombine.high %v1916_v6, %v5730_v25  ;;  %v2140_v63 = vsel %vm2109_vm8, %v1831_v40, -inf  ;;  %v7009_v34 = vld [vmem:[#allocation16_spill] sm:$0xff]  ;;  %v7012_v6 = vld [vmem:[#allocation31_spill] sm:$0xff] }
 0x293   : > { %2117 = vmax.xlane.f32.xlu1 %v2116_v36  ;;  %2162 = vmax.xlane.f32.xlu0 %v2161_v8  ;;  %v2103_v3 = vcombine.low %v2052_v62, %v2084_v61  ;;  %v1685_v48 = vrot.slane %v1677_v30, %v6988_v46  ;;  %v1949_v31 = vcombine.low %v5797_v54, %v5777_v23  ;;  %v7010_v25 = vld [vmem:[#allocation32_spill] sm:$0xff] }
 0x294   : > { %v5812_v55 = vrot.slane %v1702_v51, %v6985_v43  ;;  %v5815_v24 = vrot.slane %v1718_v11, %v6985_v43  ;;  %v1653_v45 = vrot.slane %v1645_v33, %v6988_v46  ;;  %v1990_v21 = vcombine.high %v7010_v25, %v7009_v34 }
 0x295   : > { %v5821_v27 = vrot.slane %v1734_v15, %v6985_v43  ;;  %v2006_v41 = vcombine.high %v5651_v28, %v5645_v37  ;;  %v1917_v5 = vcombine.low %v5785_v44, %v5792_v53  ;;  %v1974_v32 = vcombine.high %v7012_v6, %v7011_v14 }
 0x296   : > { %v5830_v29 = vrot.slane %v2022_v20, %v6985_v43  ;;  %v2167_v51 = vsel %vm2109_vm8, %v1968_v57, -inf  ;;  %v1832_v4 = vcombine.high %v1780_v0, %v1812_v18  ;;  %v2188_v39 = vsel %vm2109_vm8, %v2103_v3, -inf }
 0x297   : > { %2165 = vmax.xlane.f32.xlu1 %v2164_v12  ;;  %2186 = vmax.xlane.f32.xlu0 %v2185_v56  ;;  %v1697_v36 = vcombine.low %v1653_v45, %v1685_v48  ;;  %v1957_v26 = vrot.slane %v1949_v31, %v6988_v46  ;;  %v1813_v37 = vcombine.low %v5821_v27, %v5801_v10 }
 0x298   : > { %v5838_v28 = vrot.slane %v1990_v21, %v6985_v43  ;;  %v2020_v8 = vrot.slane %v2006_v41, %v6985_v43  ;;  %v1925_v35 = vrot.slane %v1917_v5, %v6988_v46  ;;  %v1781_v18 = vcombine.low %v5812_v55, %v5815_v24 }
 0x299   : > { %v1988_v16 = vrot.slane %v1974_v32, %v6985_v43  ;;  %v2143_v19 = vsel %vm2109_vm8, %v1832_v4, -inf  ;;  %v2104_v2 = vcombine.high %v2052_v62, %v2084_v61  ;;  %v2122_v47 = vsel %vm2109_vm8, %v1697_v36, -inf }
 0x29a   : > { %v1969_v60 = vcombine.low %v1925_v35, %v1957_v26  ;;  %v1821_v13 = vrot.slane %v1813_v37, %v6988_v46  ;;  %v2085_v50 = vcombine.low %v2020_v8, %v5830_v29  ;;  %v1789_v52 = vrot.slane %v1781_v18, %v6988_v46 }
 0x29b   : > { %2120 = vmax.xlane.f32.xlu1 %v2119_v49  ;;  %2141 = vmax.xlane.f32.xlu0 %v2140_v63  ;;  %v2053_v0 = vcombine.low %v1988_v16, %v5838_v28  ;;  %v2191_v59 = vsel %vm2109_vm8, %v2104_v2, -inf  ;;  %v1698_v1 = vcombine.high %v1653_v45, %v1685_v48  ;;  %v1678_v56 = vcombine.high %v5765_v9, %v5749_v7 }
 0x29c   : > { %v2170_v17 = vsel %vm2109_vm8, %v1969_v60, -inf  ;;  %v1833_v30 = vcombine.low %v1789_v52, %v1821_v13  ;;  %v2093_v12 = vrot.slane %v2085_v50, %v6988_v46  ;;  %v1646_v61 = vcombine.high %v5742_v42, %v5762_v58 }
 0x29d   : > { %v2061_v40 = vrot.slane %v2053_v0, %v6988_v46  ;;  %v2125_v22 = vsel %vm2109_vm8, %v1698_v1, -inf  ;;  %v1970_v38 = vcombine.high %v1925_v35, %v1957_v26  ;;  %v1692_v15 = vrot.slane %v1678_v56, %v6988_v46 }
 0x29e   : > { %v2146_v11 = vsel %vm2109_vm8, %v1833_v30, -inf  ;;  %v1950_v62 = vcombine.high %v5797_v54, %v5777_v23  ;;  %v1660_v7 = vrot.slane %v1646_v61, %v6988_v46  ;;  %v1918_v9 = vcombine.high %v5785_v44, %v5792_v53 }
 0x29f   : > { %2168 = vmax.xlane.f32.xlu1 %v2167_v51  ;;  %2189 = vmax.xlane.f32.xlu0 %v2188_v39  ;;  %v2105_v33 = vcombine.low %v2061_v40, %v2093_v12  ;;  %v2173_v42 = vsel %vm2109_vm8, %v1970_v38, -inf  ;;  %v1834_v58 = vcombine.high %v1789_v52, %v1821_v13  ;;  %v1814_v63 = vcombine.high %v5821_v27, %v5801_v10 }
 0x2a0   : > { %v1699_v49 = vcombine.low %v1660_v7, %v1692_v15  ;;  %v1964_v57 = vrot.slane %v1950_v62, %v6988_v46  ;;  %v1932_v23 = vrot.slane %v1918_v9, %v6988_v46  ;;  %v1782_v54 = vcombine.high %v5812_v55, %v5815_v24 }
 0x2a1   : > { %v2194_v20 = vsel %vm2109_vm8, %v2105_v33, -inf  ;;  %v2149_v44 = vsel %vm2109_vm8, %v1834_v58, -inf  ;;  %v2086_v53 = vcombine.high %v2020_v8, %v5830_v29  ;;  %v2106_v31 = vcombine.high %v2061_v40, %v2093_v12 }
 0x2a2   : > { %v2128_v3 = vsel %vm2109_vm8, %v1699_v49, -inf  ;;  %v1971_v48 = vcombine.low %v1932_v23, %v1964_v57  ;;  %v1828_v45 = vrot.slane %v1814_v63, %v6988_v46  ;;  %v1796_v10 = vrot.slane %v1782_v54, %v6988_v46 }
 0x2a3   : > { %2123 = vmax.xlane.f32.xlu1 %v2122_v47  ;;  %2144 = vmax.xlane.f32.xlu0 %v2143_v19  ;;  %v2054_v34 = vcombine.high %v1988_v16, %v5838_v28  ;;  %v1700_v25 = vcombine.high %v1660_v7, %v1692_v15  ;;  %v2197_v55 = vsel %vm2109_vm8, %v2106_v31, -inf  ;;  %v2100_v27 = vrot.slane %v2086_v53, %v6988_v46  ;;  %v7014_v15 = vld [vmem:[#allocation9_spill] sm:$0xff] }
 0x2a4   : > { %v2176_v21 = vsel %vm2109_vm8, %v1971_v48, -inf  ;;  %v1835_v24 = vcombine.low %v1796_v10, %v1828_v45  ;;  %v1972_v6 = vcombine.high %v1932_v23, %v1964_v57  ;;  %v1836_v4 = vcombine.high %v1796_v10, %v1828_v45 }
 0x2a5   : > { %v2068_v41 = vrot.slane %v2054_v34, %v6988_v46  ;;  %v2131_v5 = vsel %vm2109_vm8, %v1700_v25, -inf  ;;  %v3853_v26 = vmov 0.0   ;;  %v7013_v56 = vlaneseq }
 0x2a6   : > { %v2152_v14 = vsel %vm2109_vm8, %v1835_v24, -inf  ;;  %v2179_v29 = vsel %vm2109_vm8, %v1972_v6, -inf  ;;  %v2155_v39 = vsel %vm2109_vm8, %v1836_v4, -inf  ;;  %2207 = vst.msk [vmem:[#allocation2] sm:$0xff] %vm2206_vm9, %v3853_v26  ;;  %2210 = vst.msk [vmem:[#allocation2 + $0x10] sm:$0xff] %vm2206_vm9, %v3853_v26  ;;  %3656 = vmatprep.subr.mxu0 %v3853_v26  ;;  %3666 = vmatprep.mubr.msk.f32.mxu0 %vm3862_vm14, %v3853_v26 }
 0x2a7   : > { %2171 = vmax.xlane.f32.xlu1 %v2170_v17  ;;  %2192 = vmax.xlane.f32.xlu0 %v2191_v59  ;;  %v2107_v32 = vcombine.low %v2068_v41, %v2100_v27  ;;  %v2108_v36 = vcombine.high %v2068_v41, %v2100_v27  ;;  %2209 = vst.msk [vmem:[#allocation2 + $0x8] sm:$0x3] %vm2208_vm10, %v3853_v26  ;;  %2211 = vst.msk [vmem:[#allocation2 + $0x18] sm:$0x3] %vm2208_vm10, %v3853_v26  ;;  %v2249_v40 = vand.u32 127, %v7013_v56 }
 0x2a8   : > { %2212 = vst.msk [vmem:[#allocation2 + $0x20] sm:$0xff] %vm2206_vm9, %v3853_v26  ;;  %2214 = vst.msk [vmem:[#allocation2 + $0x30] sm:$0xff] %vm2206_vm9, %v3853_v26 }
 0x2a9   : > { %v2200_v51 = vsel %vm2109_vm8, %v2107_v32, -inf  ;;  %2213 = vst.msk [vmem:[#allocation2 + $0x28] sm:$0x3] %vm2208_vm10, %v3853_v26  ;;  %2215 = vst.msk [vmem:[#allocation2 + $0x38] sm:$0x3] %vm2208_vm10, %v3853_v26  ;;  %v2203_v37 = vsel %vm2109_vm8, %v2108_v36, -inf }
 0x2aa   : > { %v2250_v38 = vadd.s32 4294967295, %v2249_v40 }
 0x2ab   : > { %2126 = vmax.xlane.f32.xlu1 %v2125_v22  ;;  %2147 = vmax.xlane.f32.xlu0 %v2146_v11 }
 0x2ac   : > { %v5914_v62 = vsub.s32 %v2250_v38, %v7014_v15 }
 0x2af   : > { %2174 = vmax.xlane.f32.xlu1 %v2173_v42  ;;  %2195 = vmax.xlane.f32.xlu0 %v2194_v20 }
 0x2b3   : > { %2129 = vmax.xlane.f32.xlu1 %v2128_v3  ;;  %2150 = vmax.xlane.f32.xlu0 %v2149_v44 }
 0x2b7   : > { %2177 = vmax.xlane.f32.xlu1 %v2176_v21  ;;  %2198 = vmax.xlane.f32.xlu0 %v2197_v55 }
 0x2bb   : > { %2132 = vmax.xlane.f32.xlu1 %v2131_v5  ;;  %2153 = vmax.xlane.f32.xlu0 %v2152_v14 }
 0x2bf   : > { %2180 = vmax.xlane.f32.xlu1 %v2179_v29  ;;  %2201 = vmax.xlane.f32.xlu0 %v2200_v51 }
 0x2c3   : > { %2156 = vmax.xlane.f32.xlu0 %v2155_v39 }
 0x2c7   : > { %2204 = vmax.xlane.f32.xlu0 %v2203_v37 }
 0x310   : > { %v2115_v28 = vpop.xlane.xlu1 %2114  ;;  %v2112_v8 = vpop.xlane.xlu0 %2111 }
 0x311   : > { %v2258_v42 = vrot.slane %v2115_v28, %v5914_v62  ;;  %v2254_v58 = vrot.slane %v2112_v8, %v5914_v62 }
 0x313   : > { %v2379_v54 = vsel %vm1079_vm1, %v2258_v42, %v2254_v58 }
 0x314   : > { %v2160_v35 = vpop.xlane.xlu1 %2159  ;;  %v2136_v18 = vpop.xlane.xlu0 %2135 }
 0x315   : > { %v2318_v45 = vrot.slane %v2160_v35, %v5914_v62  ;;  %v2286_v25 = vrot.slane %v2136_v18, %v5914_v62 }
 0x318   : > { %v5900_v16 = vpop.xlane.xlu1 %2183  ;;  %v2139_v19 = vpop.xlane.xlu0 %2138 }
 0x319   : > { %v2290_v21 = vrot.slane %v2139_v19, %v5914_v62  ;;  %v2350_v56 = vrot.slane %v5900_v16, %v5914_v62 }
 0x31b   : > { %v2386_v8 = vsel %vm1079_vm1, %v2290_v21, %v2286_v25 }
 0x31c   : > { %v2118_v2 = vpop.xlane.xlu1 %2117  ;;  %v2163_v47 = vpop.xlane.xlu0 %2162 }
 0x31d   : > { %v2262_v20 = vrot.slane %v2118_v2, %v5914_v62  ;;  %v2322_v44 = vrot.slane %v2163_v47, %v5914_v62 }
 0x31f   : > { %v2380_v3 = vsel %vm1082_vm2, %v2262_v20, %v2379_v54  ;;  %v2393_v5 = vsel %vm1079_vm1, %v2322_v44, %v2318_v45 }
 0x320   : > { %v2166_v60 = vpop.xlane.xlu1 %2165  ;;  %v5902_v13 = vpop.xlane.xlu0 %2186 }
 0x321   : > { %v2326_v48 = vrot.slane %v2166_v60, %v5914_v62  ;;  %v2354_v47 = vrot.slane %v5902_v13, %v5914_v62 }
 0x323   : > { %v2394_v29 = vsel %vm1082_vm2, %v2326_v48, %v2393_v5 }
 0x324   : > { %v2121_v50 = vpop.xlane.xlu1 %2120  ;;  %v2142_v52 = vpop.xlane.xlu0 %2141 }
 0x325   : > { %v2266_v49 = vrot.slane %v2121_v50, %v5914_v62  ;;  %v2294_v51 = vrot.slane %v2142_v52, %v5914_v62 }
 0x327   : > { %v2381_v10 = vsel %vm1085_vm3, %v2266_v49, %v2380_v3 }
 0x328   : > { %v2169_v0 = vpop.xlane.xlu1 %2168  ;;  %v5904_v59 = vpop.xlane.xlu0 %2189 }
 0x329   : > { %v2330_v34 = vrot.slane %v2169_v0, %v5914_v62  ;;  %v2387_v0 = vsel %vm1082_vm2, %v2294_v51, %v2386_v8 }
 0x32b   : > { %v2395_v36 = vsel %vm1085_vm3, %v2330_v34, %v2394_v29 }
 0x32c   : > { %v2124_v1 = vpop.xlane.xlu1 %2123  ;;  %v5906_v17 = vpop.xlane.xlu0 %2144 }
 0x32d   : > { %v2270_v57 = vrot.slane %v2124_v1, %v5914_v62  ;;  %v2298_v37 = vrot.slane %v5906_v17, %v5914_v62  ;;  %v2358_v1 = vrot.slane %v5904_v59, %v5914_v62 }
 0x32f   : > { %v2382_v55 = vsel %vm1088_vm4, %v2270_v57, %v2381_v10  ;;  %v2388_v13 = vsel %vm1085_vm3, %v2298_v37, %v2387_v0 }
 0x330   : > { %v2172_v30 = vpop.xlane.xlu1 %2171  ;;  %v5908_v12 = vpop.xlane.xlu0 %2192 }
 0x331   : > { %v2334_v24 = vrot.slane %v2172_v30, %v5914_v62  ;;  %v2362_v40 = vrot.slane %v5908_v12, %v5914_v62 }
 0x333   : > { %v2396_v35 = vsel %vm1088_vm4, %v2334_v24, %v2395_v36 }
 0x334   : > { %v2127_v61 = vpop.xlane.xlu1 %2126  ;;  %v2148_v22 = vpop.xlane.xlu0 %2147 }
 0x335   : > { %v2274_v53 = vrot.slane %v2127_v61, %v5914_v62  ;;  %v2302_v18 = vrot.slane %v2148_v22, %v5914_v62 }
 0x337   : > { %v2383_v14 = vsel %vm1091_vm5, %v2274_v53, %v2382_v55  ;;  %v2389_v22 = vsel %vm1088_vm4, %v2302_v18, %v2388_v13 }
 0x338   : > { %v2175_v11 = vpop.xlane.xlu1 %2174  ;;  %v5911_v33 = vpop.xlane.xlu0 %2195 }
 0x339   : > { %v2338_v6 = vrot.slane %v2175_v11, %v5914_v62  ;;  %v2366_v38 = vrot.slane %v5911_v33, %v5914_v62  ;;  %v2400_v11 = vsel %vm1079_vm1, %v2354_v47, %v2350_v56  ;;  %vm2524_vm1 = vcmask 326656  }
 0x33a   : > { %v2401_v12 = vsel %vm1082_vm2, %v2358_v1, %v2400_v11  ;;  %vm2526_vm2 = vcmask 392192  }
 0x33b   : > { %v2397_v60 = vsel %vm1091_vm5, %v2338_v6, %v2396_v35  ;;  %v2402_v33 = vsel %vm1085_vm3, %v2362_v40, %v2401_v12  ;;  %vm3458_vm3 = vcmask 1043456  }
 0x33c   : > { %v2130_v7 = vpop.xlane.xlu1 %2129  ;;  %v2151_v9 = vpop.xlane.xlu0 %2150  ;;  %v2403_v49 = vsel %vm1088_vm4, %v2366_v38, %v2402_v33  ;;  %vm2528_vm4 = vcmask 457728  }
 0x33d   : > { %v2278_v31 = vrot.slane %v2130_v7, %v5914_v62  ;;  %v2306_v50 = vrot.slane %v2151_v9, %v5914_v62 }
 0x33f   : > { %v2384_v4 = vsel %vm1094_vm6, %v2278_v31, %v2383_v14  ;;  %v2390_v15 = vsel %vm1091_vm5, %v2306_v50, %v2389_v22 }
 0x340   : > { %v2178_v63 = vpop.xlane.xlu1 %2177  ;;  %v5921_v23 = vpop.xlane.xlu0 %2198 }
 0x341   : > { %v2342_v39 = vrot.slane %v2178_v63, %v5914_v62  ;;  %v2370_v16 = vrot.slane %v5921_v23, %v5914_v62 }
 0x343   : > { %v2398_v17 = vsel %vm1094_vm6, %v2342_v39, %v2397_v60  ;;  %v2404_v63 = vsel %vm1091_vm5, %v2370_v16, %v2403_v49  ;;  %vm3470_vm5 = vcmask 293888  }
 0x344   : > { %v2133_v27 = vpop.xlane.xlu1 %2132  ;;  %v2154_v41 = vpop.xlane.xlu0 %2153 }
 0x345   : > { %v2282_v32 = vrot.slane %v2133_v27, %v5914_v62  ;;  %v2310_v30 = vrot.slane %v2154_v41, %v5914_v62 }
 0x347   : > { %v2385_v28 = vsel %vm1097_vm7, %v2282_v32, %v2384_v4  ;;  %v2391_v9 = vsel %vm1094_vm6, %v2310_v30, %v2390_v15 }
 0x348   : > { %2412 = vst.msk [vmem:[#allocation2 + $0x1] sm:$0xff] %vm2411_vm11, %v2385_v28  ;;  %v2181_v19 = vpop.xlane.xlu1 %2180  ;;  %v2202_v2 = vpop.xlane.xlu0 %2201 }
 0x349   : > { %v2346_v52 = vrot.slane %v2181_v19, %v5914_v62  ;;  %v2374_v42 = vrot.slane %v2202_v2, %v5914_v62 }
 0x34b   : > { %v2399_v61 = vsel %vm1097_vm7, %v2346_v52, %v2398_v17  ;;  %v2405_v54 = vsel %vm1094_vm6, %v2374_v42, %v2404_v63  ;;  %vm3548_vm6 = vcmask 523264  }
 0x34c   : > { %2414 = vst.msk [vmem:[#allocation2 + $0x21] sm:$0xff] %vm2411_vm11, %v2399_v61  ;;  %v2157_v59 = vpop.xlane.xlu0 %2156 }
 0x34d   : > { %v2314_v7 = vrot.slane %v2157_v59, %v5914_v62 }
 0x34f   : > { %v2392_v58 = vsel %vm1097_vm7, %v2314_v7, %v2391_v9  ;;  %v3105_v20 = vld [vmem:[#allocation2 + $0x2] sm:$0xff] }
 0x350   : > { %2413 = vst.msk [vmem:[#allocation2 + $0x11] sm:$0xff] %vm2411_vm11, %v2392_v58  ;;  %3216 = vrot.lane.b32.xlu1 %v3105_v20, %s3854_s20  ;;  %v2205_v57 = vpop.xlane.xlu0 %2204  ;;  %v2764_v44 = vld [vmem:[#allocation2 + $0x1] sm:$0xff] }
 0x351   : > { %v2378_v23 = vrot.slane %v2205_v57, %v5914_v62  ;;  %v2416_v21 = vld [vmem:[#allocation2] sm:$0xff] }
 0x353   : > { %v2406_v53 = vsel %vm1097_vm7, %v2378_v23, %v2405_v54  ;;  %v3107_v3 = vld [vmem:[#allocation2 + $0x22] sm:$0xff] }
 0x354   : > { %v2766_v48 = vld [vmem:[#allocation2 + $0x21] sm:$0xff]  ;;  %2415 = vst.msk [vmem:[#allocation2 + $0x31] sm:$0xff] %vm2411_vm11, %v2406_v53  ;;  %3220 = vrot.lane.b32.xlu1 %v3107_v3, %s3854_s20  ;;  %v3109_v45 = vcombine.low %v3105_v20, %v3107_v3  ;;  %v3110_v10 = vcombine.high %v3105_v20, %v3107_v3 }
 0x355   : > { %v5989_v31 = vld [vmem:[#allocation2 + $0x20] sm:$0xff]  ;;  %v2768_v34 = vcombine.low %v2764_v44, %v2766_v48  ;;  %v2769_v25 = vcombine.high %v2764_v44, %v2766_v48 }
 0x356   : > { %v2420_v62 = vcombine.low %v2416_v21, %v5989_v31  ;;  %v2421_v55 = vcombine.high %v2416_v21, %v5989_v31  ;;  %v5997_v41 = vrot.slane %v3109_v45, %v6985_v43  ;;  %v6002_v39 = vrot.slane %v3110_v10, %v6985_v43 }
 0x357   : > { %v3106_v24 = vld [vmem:[#allocation2 + $0x12] sm:$0xff]  ;;  %v6011_v18 = vrot.slane %v2768_v34, %v6985_v43  ;;  %v6017_v2 = vrot.slane %v2769_v25, %v6985_v43 }
 0x358   : > { %3218 = vrot.lane.b32.xlu0 %v3106_v24, %s3854_s20  ;;  %v2765_v27 = vld [vmem:[#allocation2 + $0x11] sm:$0xff]  ;;  %v6023_v60 = vrot.slane %v2420_v62, %v6985_v43  ;;  %v6052_v22 = vrot.slane %v2421_v55, %v6985_v43 }
 0x359   : > { %v2417_v4 = vld [vmem:[#allocation2 + $0x10] sm:$0xff] }
 0x35b   : > { %v3108_v5 = vld [vmem:[#allocation2 + $0x32] sm:$0xff] }
 0x35c   : > { %v2767_v14 = vld [vmem:[#allocation2 + $0x31] sm:$0xff]  ;;  %3331 = vrot.lane.b32.xlu0 %v3105_v20, %s3845_s23  ;;  %3222 = vrot.lane.b32.xlu1 %v3108_v5, %s3854_s20  ;;  %v3125_v32 = vcombine.low %v3106_v24, %v3108_v5  ;;  %v3126_v29 = vcombine.high %v3106_v24, %v3108_v5 }
 0x35d   : > { %v2419_v6 = vld [vmem:[#allocation2 + $0x30] sm:$0xff]  ;;  %v2784_v51 = vcombine.low %v2765_v27, %v2767_v14  ;;  %v2785_v36 = vcombine.high %v2765_v27, %v2767_v14 }
 0x35e   : > { %v2436_v37 = vcombine.low %v2417_v4, %v2419_v6  ;;  %v2437_v28 = vcombine.high %v2417_v4, %v2419_v6  ;;  %v6005_v8 = vrot.slane %v3125_v32, %v6985_v43  ;;  %v6008_v35 = vrot.slane %v3126_v29, %v6985_v43 }
 0x35f   : > { %v6014_v19 = vrot.slane %v2784_v51, %v6985_v43  ;;  %v6020_v47 = vrot.slane %v2785_v36, %v6985_v43 }
 0x360   : > { %v6026_v50 = vrot.slane %v2436_v37, %v6985_v43  ;;  %3335 = vrot.lane.b32.xlu0 %v3107_v3, %s3845_s23  ;;  %3333 = vrot.lane.b32.xlu1 %v3106_v24, %s3845_s23  ;;  %v3141_v52 = vcombine.low %v5997_v41, %v6005_v8  ;;  %v3142_v0 = vcombine.high %v5997_v41, %v6005_v8 }
 0x361   : > { %v2800_v1 = vcombine.low %v6011_v18, %v6014_v19  ;;  %v2801_v17 = vcombine.high %v6011_v18, %v6014_v19  ;;  %v3157_v30 = vcombine.low %v6002_v39, %v6008_v35  ;;  %v2816_v56 = vcombine.low %v6017_v2, %v6020_v47 }
 0x362   : > { %v3158_v13 = vcombine.high %v6002_v39, %v6008_v35  ;;  %v6045_v40 = vrot.slane %v2437_v28, %v6985_v43  ;;  %v2452_v61 = vcombine.low %v6023_v60, %v6026_v50  ;;  %v2453_v38 = vcombine.high %v6023_v60, %v6026_v50 }
 0x363   : > { %v2817_v59 = vcombine.high %v6017_v2, %v6020_v47  ;;  %v6132_v29 = vrot.slane %v3141_v52, %v6988_v46 }
 0x364   : > { %2990 = vrot.lane.b32.xlu0 %v2764_v44, %s3845_s23  ;;  %3337 = vrot.lane.b32.xlu1 %v3108_v5, %s3845_s23  ;;  %v2468_v11 = vcombine.low %v6052_v22, %v6045_v40  ;;  %v2469_v15 = vcombine.high %v6052_v22, %v6045_v40  ;;  %v3464_v22 = vld [vmem:[%s6573_s2] sm:$0xff] }
 0x368   : > { %2994 = vrot.lane.b32.xlu0 %v2766_v48, %s3845_s23  ;;  %2992 = vrot.lane.b32.xlu1 %v2765_v27, %s3845_s23 }
 0x36c   : > { %2875 = vrot.lane.b32.xlu0 %v2764_v44, %s3854_s20  ;;  %2996 = vrot.lane.b32.xlu1 %v2767_v14, %s3845_s23 }
 0x370   : > { %2879 = vrot.lane.b32.xlu0 %v2766_v48, %s3854_s20  ;;  %2877 = vrot.lane.b32.xlu1 %v2765_v27, %s3854_s20 }
 0x374   : > { %2534 = vrot.lane.b32.xlu0 %v2416_v21, %s3854_s20  ;;  %2881 = vrot.lane.b32.xlu1 %v2767_v14, %s3854_s20 }
 0x378   : > { %2538 = vrot.lane.b32.xlu0 %v5989_v31, %s3854_s20  ;;  %2536 = vrot.lane.b32.xlu1 %v2417_v4, %s3854_s20 }
 0x37c   : > { %2649 = vrot.lane.b32.xlu0 %v2416_v21, %s3845_s23  ;;  %2540 = vrot.lane.b32.xlu1 %v2419_v6, %s3854_s20 }
 0x380   : > { %2653 = vrot.lane.b32.xlu0 %v5989_v31, %s3845_s23  ;;  %2651 = vrot.lane.b32.xlu1 %v2417_v4, %s3845_s23 }
 0x384   : > { %2655 = vrot.lane.b32.xlu1 %v2419_v6, %s3845_s23 }
 0x3c2   : > { %v6079_v16 = vpop.permute.xlu1 %3216 }
 0x3c6   : > { %v6081_v7 = vpop.permute.xlu1 %3220 }
 0x3c7   : > { %v3228_v9 = vcombine.low %v6079_v16, %v6081_v7 }
 0x3c9   : > { %v3236_v20 = vrot.slane %v3228_v9, %v6985_v43 }
 0x3ca   : > { %v3219_v12 = vpop.permute.xlu0 %3218 }
 0x3ce   : > { %v3223_v42 = vpop.permute.xlu1 %3222  ;;  %v6085_v33 = vpop.permute.xlu0 %3331 }
 0x3cf   : > { %v3244_v58 = vcombine.low %v3219_v12, %v3223_v42 }
 0x3d1   : > { %v3252_v49 = vrot.slane %v3244_v58, %v6985_v43  ;;  %v3173_v58 = vcombine.high %v6132_v29, %v3853_v26 }
 0x3d2   : > { %v6089_v57 = vpop.permute.xlu1 %3333  ;;  %v6091_v63 = vpop.permute.xlu0 %3335 }
 0x3d3   : > { %v3260_v23 = vcombine.low %v3236_v20, %v3252_v49  ;;  %v3261_v54 = vcombine.high %v3236_v20, %v3252_v49  ;;  %v3343_v53 = vcombine.low %v6085_v33, %v6091_v63 }
 0x3d5   : > { %v6094_v44 = vrot.slane %v3260_v23, %v6988_v46  ;;  %v3275_v3 = vrot.slane %v3261_v54, %v6988_v46  ;;  %v3351_v34 = vrot.slane %v3343_v53, %v6985_v43  ;;  %v3245_v23 = vcombine.high %v3219_v12, %v3223_v42 }
 0x3d6   : > { %v6099_v48 = vpop.permute.xlu1 %3337  ;;  %v6101_v31 = vpop.permute.xlu0 %2990  ;;  %v3156_v42 = vrot.slane %v3142_v0, %v6988_v46 }
 0x3d7   : > { %v3359_v45 = vcombine.low %v6089_v57, %v6099_v48  ;;  %3301 = vrot.lane.b32.xlu1 %v3275_v3, %s3855_s22  ;;  %v3292_v10 = vcombine.high %v6094_v44, %v3853_v26 }
 0x3d9   : > { %v3367_v25 = vrot.slane %v3359_v45, %v6985_v43  ;;  %3297 = vrot.lane.b32.xlu0 %v3292_v10, %s3856_s26 }
 0x3da   : > { %v6111_v21 = vpop.permute.xlu1 %2992  ;;  %v6113_v62 = vpop.permute.xlu0 %2994 }
 0x3db   : > { %v3375_v55 = vcombine.low %v3351_v34, %v3367_v25  ;;  %v3002_v27 = vcombine.low %v6101_v31, %v6113_v62  ;;  %v3376_v28 = vcombine.high %v3351_v34, %v3367_v25  ;;  %v3229_v34 = vcombine.high %v6079_v16, %v6081_v7 }
 0x3dc   : > { %v3293_v7 = vcombine.high %v3275_v3, %v3853_v26 }
 0x3dd   : > { %v6116_v24 = vrot.slane %v3375_v55, %v6988_v46  ;;  %v3010_v51 = vrot.slane %v3002_v27, %v6985_v43  ;;  %v3390_v53 = vrot.slane %v3376_v28, %v6988_v46  ;;  %v6171_v27 = vrot.slane %v3245_v23, %v6985_v43 }
 0x3de   : > { %v6120_v5 = vpop.permute.xlu1 %2996  ;;  %v6122_v14 = vpop.permute.xlu0 %2875  ;;  %v3360_v28 = vcombine.high %v6089_v57, %v6099_v48  ;;  %v6208_v23 = vrot.slane %v2800_v1, %v6988_v46 }
 0x3df   : > { %v3018_v6 = vcombine.low %v6111_v21, %v6120_v5  ;;  %v3407_v32 = vcombine.high %v6116_v24, %v3853_v26 }
 0x3e0   : > { %v6197_v57 = vrot.slane %v3360_v28, %v6985_v43 }
 0x3e1   : > { %v3026_v4 = vrot.slane %v3018_v6, %v6985_v43  ;;  %3412 = vrot.lane.b32.xlu0 %v3407_v32, %s3856_s26  ;;  %v6175_v32 = vrot.slane %v3229_v34, %v6985_v43 }
 0x3e2   : > { %v6137_v36 = vpop.permute.xlu1 %2877  ;;  %v6139_v37 = vpop.permute.xlu0 %2879 }
 0x3e3   : > { %v3034_v9 = vcombine.low %v3010_v51, %v3026_v4  ;;  %v2887_v52 = vcombine.low %v6122_v14, %v6139_v37  ;;  %v3035_v6 = vcombine.high %v3010_v51, %v3026_v4  ;;  %v3276_v0 = vcombine.low %v6175_v32, %v6171_v27 }
 0x3e4   : > { %v3408_v51 = vcombine.high %v3390_v53, %v3853_v26  ;;  %v3277_v18 = vcombine.high %v6175_v32, %v6171_v27 }
 0x3e5   : > { %v6144_v20 = vrot.slane %v3034_v9, %v6988_v46  ;;  %3178 = vrot.lane.b32.xlu0 %v3173_v58, %s3856_s26  ;;  %v2895_v25 = vrot.slane %v2887_v52, %v6985_v43  ;;  %v3049_v4 = vrot.slane %v3035_v6, %v6988_v46  ;;  %v3344_v9 = vcombine.high %v6085_v33, %v6091_v63 }
 0x3e6   : > { %v6149_v49 = vpop.permute.xlu1 %2881  ;;  %v6156_v10 = vpop.permute.xlu0 %2534  ;;  %v3284_v58 = vrot.slane %v3276_v0, %v6988_v46 }
 0x3e7   : > { %v2903_v54 = vcombine.low %v6137_v36, %v6149_v49  ;;  %v3066_v45 = vcombine.high %v6144_v20, %v3853_v26  ;;  %v6211_v33 = vrot.slane %v3344_v9, %v6985_v43  ;;  %v3067_v0 = vcombine.high %v3049_v4, %v3853_v26 }
 0x3e8   : > { %v3294_v9 = vcombine.high %v3284_v58, %v3853_v26 }
 0x3e9   : > { %v2911_v55 = vrot.slane %v2903_v54, %v6985_v43  ;;  %3416 = vrot.lane.b32.xlu0 %v3390_v53, %s3855_s22  ;;  %3071 = vrot.lane.b32.xlu1 %v3066_v45, %s3856_s26  ;;  %v3391_v54 = vcombine.low %v6211_v33, %v6197_v57  ;;  %v2832_v53 = vcombine.high %v6208_v23, %v3853_v26 }
 0x3ea   : > { %v6164_v12 = vpop.permute.xlu1 %2536  ;;  %v6181_v41 = vpop.permute.xlu0 %2538  ;;  %v3174_v45 = vcombine.high %v3156_v42, %v3853_v26 }
 0x3eb   : > { %v2919_v16 = vcombine.low %v2895_v25, %v2911_v55  ;;  %v3399_v6 = vrot.slane %v3391_v54, %v6988_v46 }
 0x3ed   : > { %3182 = vrot.lane.b32.xlu0 %v3156_v42, %s3855_s22  ;;  %3305 = vrot.lane.b32.xlu1 %v3293_v7, %s3857_s27  ;;  %v6188_v3 = vrot.slane %v2919_v16, %v6988_v46  ;;  %v3019_v16 = vcombine.high %v6111_v21, %v6120_v5  ;;  %v2920_v7 = vcombine.high %v2895_v25, %v2911_v55 }
 0x3ee   : > { %v6183_v8 = vpop.permute.xlu1 %2540  ;;  %v6213_v63 = vpop.permute.xlu0 %2649  ;;  %v3003_v42 = vcombine.high %v6101_v31, %v6113_v62  ;;  %v2546_v62 = vcombine.low %v6156_v10, %v6181_v41 }
 0x3ef   : > { %v2951_v52 = vcombine.high %v6188_v3, %v3853_v26  ;;  %v6242_v21 = vrot.slane %v3019_v16, %v6985_v43  ;;  %v2562_v5 = vcombine.low %v6164_v12, %v6183_v8  ;;  %v2934_v55 = vrot.slane %v2920_v7, %v6988_v46 }
 0x3f0   : > { %v6249_v31 = vrot.slane %v3003_v42, %v6985_v43  ;;  %v2554_v16 = vrot.slane %v2546_v62, %v6985_v43  ;;  %v3392_v42 = vcombine.high %v6211_v33, %v6197_v57  ;;  %v2888_v62 = vcombine.high %v6122_v14, %v6139_v37 }
 0x3f1   : > { %3420 = vrot.lane.b32.xlu0 %v3408_v51, %s3857_s27  ;;  %3075 = vrot.lane.b32.xlu1 %v3049_v4, %s3855_s22  ;;  %v2570_v54 = vrot.slane %v2562_v5, %v6985_v43  ;;  %v2563_v39 = vcombine.high %v6164_v12, %v6183_v8 }
 0x3f2   : > { %v6199_v48 = vpop.permute.xlu1 %2651  ;;  %v6226_v34 = vpop.permute.xlu0 %2653  ;;  %v3406_v33 = vrot.slane %v3392_v42, %v6988_v46 }
 0x3f3   : > { %v2661_v51 = vcombine.low %v6213_v63, %v6226_v34  ;;  %v2578_v19 = vcombine.low %v2554_v16, %v2570_v54  ;;  %v2579_v37 = vcombine.high %v2554_v16, %v2570_v54  ;;  %v3051_v54 = vcombine.high %v6249_v31, %v6242_v21 }
 0x3f4   : > { %v6333_v16 = vrot.slane %v2452_v61, %v6988_v46  ;;  %v3410_v35 = vcombine.high %v3406_v33, %v3853_v26  ;;  %v2547_v61 = vcombine.high %v6156_v10, %v6181_v41 }
 0x3f5   : > { %3309 = vrot.lane.b32.xlu1 %v3284_v58, %s3858_s28  ;;  %2956 = vrot.lane.b32.xlu0 %v2951_v52, %s3856_s26  ;;  %v2669_v4 = vrot.slane %v2661_v51, %v6985_v43  ;;  %v2815_v58 = vrot.slane %v2801_v17, %v6988_v46  ;;  %v3050_v52 = vcombine.low %v6249_v31, %v6242_v21 }
 0x3f6   : > { %v6222_v1 = vpop.permute.xlu1 %2655  ;;  %v2904_v51 = vcombine.high %v6137_v36, %v6149_v49  ;;  %v2902_v36 = vrot.slane %v2888_v62, %v6985_v43  ;;  %v3065_v21 = vrot.slane %v3051_v54, %v6988_v46  ;;  %v2577_v31 = vrot.slane %v2563_v39, %v6985_v43 }
 0x3f7   : > { %v2677_v28 = vcombine.low %v6199_v48, %v6222_v1  ;;  %v3058_v7 = vrot.slane %v3050_v52, %v6988_v46  ;;  %v2678_v10 = vcombine.high %v6199_v48, %v6222_v1  ;;  %v2831_v1 = vrot.slane %v2817_v59, %v6988_v46 }
 0x3f8   : > { %v2476_v62 = vrot.slane %v2468_v11, %v6988_v46 }
 0x3f9   : > { %2837 = vrot.lane.b32.xlu1 %v2832_v53, %s3856_s26  ;;  %3186 = vrot.lane.b32.xlu0 %v3174_v45, %s3857_s27  ;;  %v2685_v25 = vrot.slane %v2677_v28, %v6985_v43  ;;  %v3165_v45 = vrot.slane %v3157_v30, %v6988_v46  ;;  %v3409_v28 = vcombine.high %v3399_v6, %v3853_v26 }
 0x3fa   : > { %v6280_v30 = vrot.slane %v2578_v19, %v6988_v46  ;;  %v3068_v57 = vcombine.high %v3058_v7, %v3853_v26 }
 0x3fb   : > { %v2693_v53 = vcombine.low %v2669_v4, %v2685_v25  ;;  %v3175_v5 = vcombine.high %v3165_v45, %v3853_v26  ;;  %v2694_v52 = vcombine.high %v2669_v4, %v2685_v25  ;;  %v2593_v25 = vrot.slane %v2579_v37, %v6988_v46 }
 0x3fc   : > { %v2610_v32 = vcombine.high %v6280_v30, %v3853_v26  ;;  %v3863_v37 = vmov 0  }
 0x3fd   : > { %3079 = vrot.lane.b32.xlu1 %v3067_v0, %s3857_s27  ;;  %3424 = vrot.lane.b32.xlu0 %v3399_v6, %s3858_s28  ;;  %v6273_v17 = vrot.slane %v2693_v53, %v6988_v46  ;;  %v3291_v0 = vrot.slane %v3277_v18, %v6988_v46  ;;  %v2952_v6 = vcombine.high %v2934_v55, %v3853_v26 }
 0x3fe   : > { %v2824_v53 = vrot.slane %v2816_v56, %v6988_v46  ;;  %v2484_v56 = vcombine.high %v6333_v16, %v3853_v26  ;;  %v2611_v18 = vcombine.high %v2593_v25, %v3853_v26  ;;  %3737 = vset.pattern.permute.xlu1 %v3863_v37  ;;  %3738 = vset.pattern.permute.xlu0 %v3863_v37 }
 0x3ff   : > { %v2725_v27 = vcombine.high %v6273_v17, %v3853_v26  ;;  %v3295_v49 = vcombine.high %v3291_v0, %v3853_v26 }
 0x400   : > { %v2834_v41 = vcombine.high %v2824_v53, %v3853_v26 }
 0x401   : > { %3313 = vrot.lane.b32.xlu1 %v3294_v9, %s3859_s29  ;;  %2960 = vrot.lane.b32.xlu0 %v2934_v55, %s3855_s22  ;;  %v2833_v9 = vcombine.high %v2815_v58, %v3853_v26  ;;  %v6303_v55 = vrot.slane %v2904_v51, %v6985_v43 }
 0x403   : > { %v2935_v14 = vcombine.low %v2902_v36, %v6303_v55 }
 0x405   : > { %2841 = vrot.lane.b32.xlu1 %v2815_v58, %s3855_s22  ;;  %3190 = vrot.lane.b32.xlu0 %v3165_v45, %s3858_s28  ;;  %v2708_v58 = vrot.slane %v2694_v52, %v6988_v46  ;;  %v2943_v4 = vrot.slane %v2935_v14, %v6988_v46  ;;  %v3172_v45 = vrot.slane %v3158_v13, %v6988_v46 }
 0x407   : > { %v2726_v13 = vcombine.high %v2708_v58, %v3853_v26  ;;  %v2953_v19 = vcombine.high %v2943_v4, %v3853_v26  ;;  %v3176_v8 = vcombine.high %v3172_v45, %v3853_v26 }
 0x409   : > { %3083 = vrot.lane.b32.xlu1 %v3058_v7, %s3858_s28  ;;  %3428 = vrot.lane.b32.xlu0 %v3409_v28, %s3859_s29  ;;  %v2561_v7 = vrot.slane %v2547_v61, %v6985_v43  ;;  %v2662_v28 = vcombine.high %v6213_v63, %v6226_v34  ;;  %v2467_v63 = vrot.slane %v2453_v38, %v6988_v46 }
 0x40b   : > { %v2594_v12 = vcombine.low %v2561_v7, %v2577_v31  ;;  %v2485_v42 = vcombine.high %v2467_v63, %v3853_v26  ;;  %v2595_v2 = vcombine.high %v2561_v7, %v2577_v31 }
 0x40d   : > { %3317 = vrot.lane.b32.xlu1 %v3291_v0, %s3860_s30  ;;  %2730 = vrot.lane.b32.xlu0 %v2725_v27, %s3856_s26  ;;  %v2692_v0 = vrot.slane %v2678_v10, %v6985_v43  ;;  %v3069_v27 = vcombine.high %v3065_v21, %v3853_v26 }
 0x411   : > { %2615 = vrot.lane.b32.xlu1 %v2610_v32, %s3856_s26  ;;  %2964 = vrot.lane.b32.xlu0 %v2952_v6, %s3857_s27  ;;  %v2602_v32 = vrot.slane %v2594_v12, %v6988_v46  ;;  %v2676_v6 = vrot.slane %v2662_v28, %v6985_v43  ;;  %v2936_v43 = vcombine.high %v2902_v36, %v6303_v55 }
 0x413   : > { %v2709_v48 = vcombine.low %v2676_v6, %v2692_v0  ;;  %v2950_v60 = vrot.slane %v2936_v43, %v6988_v46  ;;  %v2612_v47 = vcombine.high %v2602_v32, %v3853_v26  ;;  %v2710_v59 = vcombine.high %v2676_v6, %v2692_v0 }
 0x415   : > { %2845 = vrot.lane.b32.xlu1 %v2833_v9, %s3857_s27  ;;  %3194 = vrot.lane.b32.xlu0 %v3175_v5, %s3859_s29  ;;  %v2717_v34 = vrot.slane %v2709_v48, %v6988_v46  ;;  %v2954_v38 = vcombine.high %v2950_v60, %v3853_v26  ;;  %v2835_v9 = vcombine.high %v2831_v1, %v3853_v26 }
 0x416   : > { %v2609_v5 = vrot.slane %v2595_v2, %v6988_v46  ;;  %v2724_v36 = vrot.slane %v2710_v59, %v6988_v46 }
 0x417   : > { %v2727_v50 = vcombine.high %v2717_v34, %v3853_v26 }
 0x418   : > { %v2728_v11 = vcombine.high %v2724_v36, %v3853_v26 }
 0x419   : > { %3087 = vrot.lane.b32.xlu1 %v3068_v57, %s3859_s29  ;;  %3432 = vrot.lane.b32.xlu0 %v3406_v33, %s3860_s30  ;;  %v2486_v33 = vcombine.high %v2476_v62, %v3853_v26 }
 0x41d   : > { %3321 = vrot.lane.b32.xlu1 %v3295_v49, %s3861_s9  ;;  %2734 = vrot.lane.b32.xlu0 %v2708_v58, %s3855_s22  ;;  %v2613_v58 = vcombine.high %v2609_v5, %v3853_v26 }
 0x421   : > { %2619 = vrot.lane.b32.xlu1 %v2593_v25, %s3855_s22  ;;  %2968 = vrot.lane.b32.xlu0 %v2943_v4, %s3858_s28 }
 0x425   : > { %2849 = vrot.lane.b32.xlu1 %v2824_v53, %s3858_s28  ;;  %3198 = vrot.lane.b32.xlu0 %v3172_v45, %s3860_s30 }
 0x429   : > { %3091 = vrot.lane.b32.xlu1 %v3065_v21, %s3860_s30  ;;  %2489 = vrot.lane.b32.xlu0 %v2484_v56, %s3856_s26  ;;  %s3551_s26 = scalar_lea.sflag [#allocation5], %s3982_s5 }
 0x42d   : > { %3436 = vrot.lane.b32.xlu1 %v3410_v35, %s3861_s9  ;;  %2738 = vrot.lane.b32.xlu0 %v2726_v13, %s3857_s27 }
 0x431   : > { %2623 = vrot.lane.b32.xlu1 %v2611_v18, %s3857_s27  ;;  %2972 = vrot.lane.b32.xlu0 %v2953_v19, %s3859_s29 }
 0x435   : > { %2853 = vrot.lane.b32.xlu1 %v2834_v41, %s3859_s29  ;;  %3202 = vrot.lane.b32.xlu0 %v3176_v8, %s3861_s9 }
 0x439   : > { %3095 = vrot.lane.b32.xlu1 %v3069_v27, %s3861_s9  ;;  %2627 = vrot.lane.b32.xlu0 %v2602_v32, %s3858_s28 }
 0x43d   : > { %2493 = vrot.lane.b32.xlu1 %v2467_v63, %s3855_s22  ;;  %2857 = vrot.lane.b32.xlu0 %v2831_v1, %s3860_s30  ;;  %s3562_s22 = scalar_lea.hbm %s6574_s3, %s3646_s7 }
 0x441   : > { %2742 = vrot.lane.b32.xlu1 %v2717_v34, %s3858_s28  ;;  %2497 = vrot.lane.b32.xlu0 %v2485_v42, %s3857_s27  ;;  %s3775_s27 = scalar_lea.vmem %s3565_s17, 128 }
 0x442   : > { %p3776_p11 = scmp.ne.s32.totalorder %s3565_s17, %s3775_s27 }
 0x444   : > { %p3777_p13 = pnand %p3776_p11, %p7015_p12 }
 0x445   : > { %2976 = vrot.lane.b32.xlu1 %v2950_v60, %s3860_s30  ;;  %2746 = vrot.lane.b32.xlu0 %v2727_v50, %s3859_s29 }
 0x446   : > { %p3778_p4 = pneg %p3777_p13 }
 0x449   : > { %2631 = vrot.lane.b32.xlu1 %v2612_v47, %s3859_s29  ;;  %2980 = vrot.lane.b32.xlu0 %v2954_v38, %s3861_s9  ;;  %v3302_v55 = vpop.permute.xlu1 %3301 }
 0x44b   : > { %v3298_v51 = vpop.permute.xlu0 %3297 }
 0x44c   : > { %v3324_v52 = vsel %vm2516_vm12, %v6094_v44, %v3298_v51  ;;  %v2483_v44 = vrot.slane %v2469_v15, %v6988_v46 }
 0x44d   : > { %2861 = vrot.lane.b32.xlu1 %v2835_v9, %s3861_s9  ;;  %2635 = vrot.lane.b32.xlu0 %v2609_v5, %s3860_s30  ;;  %v3325_v57 = vsel %vm2518_vm13, %v3324_v52, %v3302_v55 }
 0x44e   : > { %v2487_v25 = vcombine.high %v2483_v44, %v3853_v26 }
 0x451   : > { %2501 = vrot.lane.b32.xlu1 %v2476_v62, %s3858_s28  ;;  %2505 = vrot.lane.b32.xlu0 %v2486_v33, %s3859_s29  ;;  %s3864_s28 = smov [#allocation6]  }
 0x452   : > { %s3779_s16 = sshll.u32 %s3864_s28, 4  ;;  %s3780_s16 = int_to_ptr.vmem [resolvable:$false] %s3779_s16 }
 0x453   : > { %v3413_v14 = vpop.permute.xlu0 %3412  ;;  %s3781_s29 = scalar_lea.vmem %s3780_s16, 256  ;;  %p3782_p5 = scmp.lt.s32.totalorder %s3565_s17, %s3780_s16 }
 0x454   : > { %v3439_v51 = vsel %vm2516_vm12, %v6116_v24, %v3413_v14  ;;  %p3783_p7 = scmp.lt.s32.totalorder %s3781_s29, %s3775_s27 }
 0x455   : > { %2750 = vrot.lane.b32.xlu1 %v2724_v36, %s3860_s30  ;;  %2754 = vrot.lane.b32.xlu0 %v2728_v11, %s3861_s9 }
 0x456   : > { %p3784_p8 = por %p3783_p7, %p3782_p5 }
 0x457   : > { %v3179_v49 = vpop.permute.xlu0 %3178 }
 0x458   : > { %v3205_v15 = vsel %vm2516_vm12, %v6132_v29, %v3179_v49  ;;  %p3785_p10 = pnand %p3784_p8, %p3778_p4 }
 0x459   : > { %2639 = vrot.lane.b32.xlu1 %v2613_v58, %s3861_s9  ;;  %2513 = vrot.lane.b32.xlu0 %v2487_v25, %s3861_s9 }
 0x45b   : > { %v3072_v46 = vpop.permute.xlu1 %3071  ;;  %v3417_v40 = vpop.permute.xlu0 %3416 }
 0x45c   : > { %v3098_v21 = vsel %vm2516_vm12, %v6144_v20, %v3072_v46  ;;  %v3440_v9 = vsel %vm2518_vm13, %v3439_v51, %v3417_v40 }
 0x45d   : > { %2509 = vrot.lane.b32.xlu1 %v2483_v44, %s3860_s30 }
 0x45f   : > { %v3306_v4 = vpop.permute.xlu1 %3305  ;;  %v3183_v54 = vpop.permute.xlu0 %3182 }
 0x460   : > { %v3326_v53 = vsel %vm2520_vm15, %v3325_v57, %v3306_v4  ;;  %v3206_v45 = vsel %vm2518_vm13, %v3205_v15, %v3183_v54 }
 0x461   : > { %3467 = vperm.xlu1 %3737, %v3464_v22  }
 0x463   : > { %v3076_v56 = vpop.permute.xlu1 %3075  ;;  %v3421_v39 = vpop.permute.xlu0 %3420 }
 0x464   : > { %v3099_v35 = vsel %vm2518_vm13, %v3098_v21, %v3076_v56  ;;  %v3441_v55 = vsel %vm2520_vm15, %v3440_v9, %v3421_v39 }
 0x467   : > { %v3310_v13 = vpop.permute.xlu1 %3309  ;;  %v2957_v61 = vpop.permute.xlu0 %2956 }
 0x468   : > { %v2983_v12 = vsel %vm2516_vm12, %v6188_v3, %v2957_v61  ;;  %v3327_v11 = vsel %vm2522_vm0, %v3326_v53, %v3310_v13 }
 0x46b   : > { %v2838_v31 = vpop.permute.xlu1 %2837  ;;  %v3187_v18 = vpop.permute.xlu0 %3186 }
 0x46c   : > { %v2864_v8 = vsel %vm2516_vm12, %v6208_v23, %v2838_v31  ;;  %v3207_v25 = vsel %vm2520_vm15, %v3206_v45, %v3187_v18 }
 0x46f   : > { %v3080_v19 = vpop.permute.xlu1 %3079  ;;  %v3425_v29 = vpop.permute.xlu0 %3424 }
 0x470   : > { %v6432_v7 = vsel %vm2520_vm15, %v3099_v35, %v3080_v19  ;;  %v3442_v52 = vsel %vm2522_vm0, %v3441_v55, %v3425_v29 }
 0x473   : > { %v3314_v10 = vpop.permute.xlu1 %3313  ;;  %v2961_v41 = vpop.permute.xlu0 %2960 }
 0x474   : > { %v6437_v20 = vsel %vm2518_vm13, %v2983_v12, %v2961_v41  ;;  %v3328_v44 = vsel %vm2524_vm1, %v3327_v11, %v3314_v10 }
 0x477   : > { %v2842_v28 = vpop.permute.xlu1 %2841  ;;  %v3191_v0 = vpop.permute.xlu0 %3190 }
 0x478   : > { %v6442_v27 = vsel %vm2518_vm13, %v2864_v8, %v2842_v28  ;;  %v3208_v40 = vsel %vm2522_vm0, %v3207_v25, %v3191_v0 }
 0x47b   : > { %v3084_v32 = vpop.permute.xlu1 %3083  ;;  %v3429_v6 = vpop.permute.xlu0 %3428 }
 0x47c   : > { %v3443_v57 = vsel %vm2524_vm1, %v3442_v52, %v3429_v6  ;;  %v3101_v18 = vsel %vm2522_vm0, %v6432_v7, %v3084_v32 }
 0x47f   : > { %v3318_v48 = vpop.permute.xlu1 %3317  ;;  %v6444_v63 = vpop.permute.xlu0 %2730 }
 0x480   : > { %v3329_v37 = vsel %vm2526_vm2, %v3328_v44, %v3318_v48 }
 0x483   : > { %v6446_v1 = vpop.permute.xlu1 %2615  ;;  %v2965_v3 = vpop.permute.xlu0 %2964 }
 0x484   : > { %v2985_v41 = vsel %vm2520_vm15, %v6437_v20, %v2965_v3 }
 0x487   : > { %v6448_v43 = vpop.permute.xlu1 %2845  ;;  %v3195_v34 = vpop.permute.xlu0 %3194 }
 0x488   : > { %v3209_v22 = vsel %vm2524_vm1, %v3208_v40, %v3195_v34  ;;  %v2866_v20 = vsel %vm2520_vm15, %v6442_v27, %v6448_v43 }
 0x48b   : > { %v3088_v42 = vpop.permute.xlu1 %3087  ;;  %v3433_v60 = vpop.permute.xlu0 %3432 }
 0x48c   : > { %v3444_v33 = vsel %vm2526_vm2, %v3443_v57, %v3433_v60  ;;  %v3102_v19 = vsel %vm2524_vm1, %v3101_v18, %v3088_v42 }
 0x48f   : > { %v3322_v50 = vpop.permute.xlu1 %3321  ;;  %v6450_v23 = vpop.permute.xlu0 %2734 }
 0x490   : > { %v3330_v46 = vsel %vm2528_vm4, %v3329_v37, %v3322_v50 }
 0x491   : > { %v3456_v15 = vrot.slane %v3330_v46, 4 }
 0x493   : > { %v6452_v2 = vpop.permute.xlu1 %2619  ;;  %v2969_v47 = vpop.permute.xlu0 %2968 }
 0x494   : > { %v2986_v28 = vsel %vm2522_vm0, %v2985_v41, %v2969_v47  ;;  %v2757_v47 = vsel %vm2516_vm12, %v6273_v17, %v6444_v63 }
 0x497   : > { %v6454_v38 = vpop.permute.xlu1 %2849  ;;  %v3199_v59 = vpop.permute.xlu0 %3198 }
 0x498   : > { %v3210_v4 = vsel %vm2526_vm2, %v3209_v22, %v3199_v59  ;;  %v2867_v3 = vsel %vm2522_vm0, %v2866_v20, %v6454_v38  ;;  %v2642_v38 = vsel %vm2516_vm12, %v6280_v30, %v6446_v1 }
 0x49b   : > { %v3092_v5 = vpop.permute.xlu1 %3091  ;;  %v6459_v62 = vpop.permute.xlu0 %2489 }
 0x49c   : > { %v3103_v29 = vsel %vm2526_vm2, %v3102_v19, %v3092_v5  ;;  %v2758_v5 = vsel %vm2518_vm13, %v2757_v47, %v6450_v23 }
 0x49f   : > { %v3437_v36 = vpop.permute.xlu1 %3436  ;;  %v2739_v24 = vpop.permute.xlu0 %2738 }
 0x4a0   : > { %v3445_v14 = vsel %vm2528_vm4, %v3444_v33, %v3437_v36  ;;  %v2759_v52 = vsel %vm2520_vm15, %v2758_v5, %v2739_v24  ;;  %v2643_v33 = vsel %vm2518_vm13, %v2642_v38, %v6452_v2  ;;  %v2517_v24 = vsel %vm2516_vm12, %v6333_v16, %v6459_v62 }
 0x4a1   : > { %3657 = vmatpush3.msk.msra.mxu0 %vm3458_vm3, %v3445_v14 }
 0x4a2   : > { %3658 = vmatprep.subr.mxu0 %v3853_v26 }
 0x4a3   : > { %v2624_v49 = vpop.permute.xlu1 %2623  ;;  %v2973_v58 = vpop.permute.xlu0 %2972 }
 0x4a4   : > { %v2987_v0 = vsel %vm2524_vm1, %v2986_v28, %v2973_v58  ;;  %v2644_v14 = vsel %vm2520_vm15, %v2643_v33, %v2624_v49 }
 0x4a7   : > { %v2854_v54 = vpop.permute.xlu1 %2853  ;;  %v3203_v53 = vpop.permute.xlu0 %3202 }
 0x4a8   : > { %v3211_v21 = vsel %vm2528_vm4, %v3210_v4, %v3203_v53  ;;  %v2868_v59 = vsel %vm2524_vm1, %v2867_v3, %v2854_v54  ;;  %v3463_v54 = vld [vmem:[%s6572_s1] sm:$0xff] }
 0x4a9   : > { %v3462_v56 = vsel %vm3458_vm3, %v3211_v21, %v3456_v15 }
 0x4aa   : > { %3659 = vmatpush3.msra.mxu0 %v3462_v56 }
 0x4ab   : > { %v3096_v39 = vpop.permute.xlu1 %3095  ;;  %v2628_v35 = vpop.permute.xlu0 %2627  ;;  %3660 = vmatprep.subr.mxu0 %v3853_v26 }
 0x4ac   : > { %v3104_v8 = vsel %vm2528_vm4, %v3103_v29, %v3096_v39  ;;  %v2645_v30 = vsel %vm2522_vm0, %v2644_v14, %v2628_v35 }
 0x4ad   : > { %v3453_v6 = vrot.slane %v3104_v8, 4 }
 0x4af   : > { %v2494_v45 = vpop.permute.xlu1 %2493  ;;  %v2858_v13 = vpop.permute.xlu0 %2857 }
 0x4b0   : > { %v2869_v55 = vsel %vm2526_vm2, %v2868_v59, %v2858_v13  ;;  %v2519_v1 = vsel %vm2518_vm13, %v2517_v24, %v2494_v45 }
 0x4b3   : > { %v2743_v61 = vpop.permute.xlu1 %2742  ;;  %v2498_v31 = vpop.permute.xlu0 %2497 }
 0x4b4   : > { %v2760_v43 = vsel %vm2522_vm0, %v2759_v52, %v2743_v61  ;;  %v2521_v37 = vsel %vm2520_vm15, %v2519_v1, %v2498_v31 }
 0x4b7   : > { %v2977_v12 = vpop.permute.xlu1 %2976  ;;  %v2747_v10 = vpop.permute.xlu0 %2746 }
 0x4b8   : > { %v2988_v48 = vsel %vm2526_vm2, %v2987_v0, %v2977_v12  ;;  %v2761_v17 = vsel %vm2524_vm1, %v2760_v43, %v2747_v10 }
 0x4bb   : > { %v2632_v34 = vpop.permute.xlu1 %2631  ;;  %v2981_v7 = vpop.permute.xlu0 %2980 }
 0x4bc   : > { %v2989_v32 = vsel %vm2528_vm4, %v2988_v48, %v2981_v7  ;;  %v2646_v2 = vsel %vm2524_vm1, %v2645_v30, %v2632_v34 }
 0x4bd   : > { %v3461_v42 = vsel %vm3458_vm3, %v2989_v32, %v3453_v6 }
 0x4be   : > { %3661 = vmatpush3.msra.mxu0 %v3461_v42 }
 0x4bf   : > { %v2862_v60 = vpop.permute.xlu1 %2861  ;;  %v2636_v50 = vpop.permute.xlu0 %2635  ;;  %3662 = vmatprep.subr.mxu0 %v3853_v26 }
 0x4c0   : > { %v2870_v27 = vsel %vm2528_vm4, %v2869_v55, %v2862_v60  ;;  %v2647_v25 = vsel %vm2526_vm2, %v2646_v2, %v2636_v50 }
 0x4c1   : > { %v3450_v23 = vrot.slane %v2870_v27, 4 }
 0x4c3   : > { %v2502_v51 = vpop.permute.xlu1 %2501  ;;  %v2506_v9 = vpop.permute.xlu0 %2505 }
 0x4c4   : > { %v2523_v16 = vsel %vm2522_vm0, %v2521_v37, %v2502_v51 }
 0x4c5   : > { %v2525_v49 = vsel %vm2524_vm1, %v2523_v16, %v2506_v9 }
 0x4c7   : > { %v2751_v63 = vpop.permute.xlu1 %2750  ;;  %v2755_v57 = vpop.permute.xlu0 %2754 }
 0x4c8   : > { %v2762_v36 = vsel %vm2526_vm2, %v2761_v17, %v2751_v63 }
 0x4c9   : > { %v2763_v11 = vsel %vm2528_vm4, %v2762_v36, %v2755_v57 }
 0x4ca   : > { %v3460_v44 = vsel %vm3458_vm3, %v2763_v11, %v3450_v23 }
 0x4cb   : > { %v2640_v58 = vpop.permute.xlu1 %2639  ;;  %3663 = vmatpush3.msra.mxu0 %v3460_v44  ;;  %v2514_v22 = vpop.permute.xlu0 %2513 }
 0x4cc   : > { %3664 = vmatprep.subr.mxu0 %v3853_v26  ;;  %v2648_v62 = vsel %vm2528_vm4, %v2647_v25, %v2640_v58 }
 0x4cd   : > { %v3447_v40 = vrot.slane %v2648_v62, 4 }
 0x4cf   : > { %v2510_v46 = vpop.permute.xlu1 %2509 }
 0x4d0   : > { %v2527_v15 = vsel %vm2526_vm2, %v2525_v49, %v2510_v46 }
 0x4d1   : > { %v2529_v4 = vsel %vm2528_vm4, %v2527_v15, %v2514_v22 }
 0x4d2   : > { %v3459_v53 = vsel %vm3458_vm3, %v2529_v4, %v3447_v40 }
 0x4d3   : > { %3665 = vmatpush3.msra.mxu0 %v3459_v53 }
 0x4d4   : > { %3667 = vmatmul.mubr.msk.f32.vlgmr.msra.gmra.mxu0 %vm3470_vm5, %v3463_v54 }
 0x4dc   : > { %v3468_v26 = vpop.permute.xlu1 %3467 }
 0x594   : > { %v3543_v21 = vpop.f32.mrf.mxu0 }
 0x595   : > { %v3544_v56 = vadd.f32 %v3543_v21, %v3468_v26 }
 0x596   : > { %v3668_v39 = vpop.f32.mrf.mxu0 }
 0x597   : > { %v3547_v35 = vmax.f32 %v3544_v56, 0.0 }
 0x599   : > { %3549 = vst.msk [vmem:[%s188_s8] sm:$0xff] %vm3548_vm6, %v3547_v35 }
 0x59a   : > { %3788 = shalt.err (!%p3785_p10)
}
 0x59b   : > { %s3789_s30 = scalar_lea.hbm %s3562_s22, 128  ;;  %s3793_s10 = scalar_lea.hbm %s6574_s3, 256 }
 0x59c   : > { %p3790_p0 = scmp.ne.s32.totalorder %s3562_s22, %s3789_s30  ;;  %p3794_p1 = scmp.lt.s32.totalorder %s3562_s22, %s6574_s3 }
 0x59d   : > { %p3795_p3 = scmp.lt.s32.totalorder %s3793_s10, %s3789_s30 }
 0x59e   : > { %p3791_p2 = pnand %p3790_p0, %p7015_p12 }
 0x59f   : > { %p3796_p6 = por %p3795_p3, %p3794_p1 }
 0x5a0   : > { %p3792_p9 = pneg %p3791_p2 }
 0x5a2   : > { %p3797_p11 = pnand %p3796_p6, %p3792_p9 }
 0x5a4   : > { %3800 = shalt.err (!%p3797_p11)
}
 0x5a5   : > { %3671 = dma.vmem_to_hbm [thread:$0]  (%p7015_p12), %s3565_s17, 128, %s3562_s22, %s3551_s26  }
 0x5a6 PF: > { %s3576_s4 = sand.u32 1, %s3827_s12   ;;  %p7016_p13 = scmp.ne.s32.totalorder %s6623_s25, 0 }
 0x5a7   : > { %p7017_p4 = scmp.ge.s32.totalorder %s3839_s15, 2  ;;  %s3577_s6 = scalar_lea.sflag [#allocation5], %s3576_s4 }
 0x5a9   : > { %p3678_p5 = pnand %p7017_p4, %p7016_p13 }
 0x5ab   : > { %p3679_p7 = pneg %p3678_p5 }
 0x5ad   : > { %3822 = dma.done.wait (%p3679_p7), %s3577_s6, 128  }
 0x5ae   : > { %3824 = vsyncadd (%p3679_p7), %s3577_s6, 4294967168  ;;  %p16_p8 = scmp.ge.s32.totalorder %s3910_s18, 4   ;;  %s7018_s12 = smov %s3831_s13 }
 0x5af   : > { %s7019_s13 = smov %s3835_s14  ;;  %s7020_s14 = smov %s3922_s21 }
 0x5b0   : > { %s7021_s15 = smov %s3910_s18  ;;  %18 = sbr.rel (!%p16_p8) target bundleno = 5 (0x5), region = 77 }
 0x5b5   :  { %3582 = vsyncpa [#allocation4], 1 }
 0x5b6   :  { %3584 = vsyncpa [#allocation4 + $0x1], 1 }
 0x5b7   :  { %3585 = vsyncpa [#allocation5], 1 }
 0x5b8   :  { %3587 = vsyncpa [#allocation5 + $0x1], 1 }

</bundles_post_ra>
